<compile_context>
chip_gen: v6e
topology: v6e:2x2x1
jax: 0.10.0
libtpu: 0.0.40
codegen_flags: <defaults>
</compile_context>

<pallas_src>
import jax
import jax.numpy as jnp
from jax.experimental import pallas as pl
from jax.experimental.pallas import tpu as pltpu


def _se_kernel(x_ref, w1t_ref, w2t_ref, cp_ref, o_ref):
    # x_ref:   (Bt, H, W, C)  channels-last activation block
    # w1t_ref: (C, Crp)       fc1.weight.T, zero-padded along lanes
    # w2t_ref: (Crp, C)       fc2.weight.T, zero-padded along rows
    # cp_ref:  (10,) f32 SMEM: 3x3 conv weights (row-major) + conv bias
    # o_ref:   (Bt, H, W, C)
    bt, H, W, C = x_ref.shape

    x = x_ref[...]                          # native dtype for the scale path
    xf = x.astype(jnp.float32)              # f32 only for the reductions

    # ----------------- channel attention (SE) -----------------
    # global average pool over H, W  (outer-dim add + sublane reduce)
    pooled = jnp.sum(jnp.sum(xf, axis=1), axis=1) * (1.0 / float(H * W))   # (Bt, C)
    h = jnp.dot(pooled, w1t_ref[...].astype(jnp.float32),
                preferred_element_type=jnp.float32)                        # (Bt, Crp)
    h = jnp.maximum(h, 0.0)
    y = jnp.dot(h, w2t_ref[...].astype(jnp.float32),
                preferred_element_type=jnp.float32)                        # (Bt, C)
    y = jax.nn.sigmoid(y)

    # ----------------- spatial attention -----------------
    # channel mean + channel max (lane reduces)
    s = jnp.sum(xf, axis=-1) * (1.0 / float(C)) + jnp.max(xf, axis=-1)     # (Bt, H, W)

    h_idx = jax.lax.broadcasted_iota(jnp.int32, (bt, H, W), 1)
    w_idx = jax.lax.broadcasted_iota(jnp.int32, (bt, H, W), 2)
    conv = jnp.zeros((bt, H, W), jnp.float32)
    for kh in range(3):                     # static 3x3, fully unrolled
        for kw in range(3):
            dh, dw = kh - 1, kw - 1
            shifted = s
            if dh != 0:
                shifted = pltpu.roll(shifted, shift=(-dh) % H, axis=1)
            if dw != 0:
                shifted = pltpu.roll(shifted, shift=(-dw) % W, axis=2)
            valid = ((h_idx + dh >= 0) & (h_idx + dh < H) &
                     (w_idx + dw >= 0) & (w_idx + dw < W))
            conv = conv + cp_ref[kh * 3 + kw] * jnp.where(valid, shifted, 0.0)
    sa = jax.nn.sigmoid(conv + cp_ref[9])                                   # (Bt, H, W)

    # ----------------- combine: x*y + x*sa = x*(y + sa) -----------------
    scale = y[:, None, None, :] + sa[:, :, :, None]                         # (Bt, H, W, C)
    o_ref[...] = (x * scale.astype(x.dtype)).astype(o_ref.dtype)


def se_module(x, w1, w2, conv_w, conv_b, *, max_batch_block=8):
    """SeModule forward.

    x:      (B, C, H, W)  NCHW, like the PyTorch module.
    w1:     (C//r, C)     fc1.weight (PyTorch Linear layout, no bias)
    w2:     (C, C//r)     fc2.weight (no bias)
    conv_w: (1, 1, 3, 3)  spatial-attention conv weight
    conv_b: (1,)          spatial-attention conv bias
    """
    B, C, H, W = x.shape
    Cr = w1.shape[0]
    assert w1.shape == (Cr, C) and w2.shape == (C, Cr)
    assert conv_w.shape == (1, 1, 3, 3) and conv_b.shape == (1,)

    # channels-last so C sits on the 128-lane axis inside the kernel
    x_nhwc = jnp.transpose(x, (0, 2, 3, 1))                                 # (B, H, W, C)

    # zero-pad the bottleneck dim to a lane multiple (inert: relu(0)=0, zero rows)
    Crp = max(128, ((Cr + 127) // 128) * 128)
    w1t = jnp.zeros((C, Crp), jnp.float32).at[:, :Cr].set(w1.T.astype(jnp.float32))
    w2t = jnp.zeros((Crp, C), jnp.float32).at[:Cr, :].set(w2.T.astype(jnp.float32))

    conv_params = jnp.concatenate(
        [conv_w.reshape(9).astype(jnp.float32), conv_b.astype(jnp.float32)])  # (10,)

    # batch-group size: largest divisor of B that keeps the double-buffered
    # in+out working set inside a conservative VMEM budget (v7x: 64 MiB physical)
    bytes_per_b = H * W * C * x.dtype.itemsize
    vmem_budget = 8 * 1024 * 1024
    fit = max(1, vmem_budget // (4 * max(1, bytes_per_b)))
    bt = 1
    for d in range(1, min(B, max_batch_block, fit) + 1):
        if B % d == 0:
            bt = d
    grid = (B // bt,)

    flops = B * (4 * C * Crp + 5 * H * W * C + 20 * H * W)
    transcendentals = B * (C + H * W)
    bytes_accessed = 2 * B * H * W * C * x.dtype.itemsize + (w1t.size + w2t.size) * 4 + 40

    out_nhwc = pl.pallas_call(
        _se_kernel,
        out_shape=jax.ShapeDtypeStruct((B, H, W, C), x.dtype),
        grid_spec=pltpu.PrefetchScalarGridSpec(
            num_scalar_prefetch=0,
            grid=grid,
            in_specs=[
                pl.BlockSpec((bt, H, W, C), lambda g: (g, 0, 0, 0)),
                pl.BlockSpec((C, Crp), lambda g: (0, 0)),
                pl.BlockSpec((Crp, C), lambda g: (0, 0)),
                pl.BlockSpec(memory_space=pltpu.MemorySpace.SMEM),
            ],
            out_specs=pl.BlockSpec((bt, H, W, C), lambda g: (g, 0, 0, 0)),
        ),
        compiler_params=pltpu.CompilerParams(
            dimension_semantics=("parallel",)),
        cost_estimate=pl.CostEstimate(
            flops=int(flops),
            transcendentals=int(transcendentals),
            bytes_accessed=int(bytes_accessed)),
    )(x_nhwc, w1t, w2t, conv_params)

    return jnp.transpose(out_nhwc, (0, 3, 1, 2))                            # back to NCHW


def _reference(x, w1, w2, conv_w, conv_b):
    B, C, H, W = x.shape
    # channel attention
    pooled = jnp.mean(x, axis=(2, 3))                                       # (B, C)
    h = jnp.maximum(pooled @ w1.T, 0.0)
    y = jax.nn.sigmoid(h @ w2.T)                                            # (B, C)
    out1 = x * y[:, :, None, None]
    # spatial attention (explicit f32 3x3 "same" cross-correlation)
    s = jnp.mean(x, axis=1) + jnp.max(x, axis=1)                            # (B, H, W)
    sp = jnp.pad(s, ((0, 0), (1, 1), (1, 1)))
    conv = jnp.zeros_like(s)
    k = conv_w[0, 0]
    for kh in range(3):
        for kw in range(3):
            conv = conv + k[kh, kw] * sp[:, kh:kh + H, kw:kw + W]
    sa = jax.nn.sigmoid(conv + conv_b[0])[:, None, :, :]                    # (B, 1, H, W)
    out2 = sa * x
    return out1 + out2


if __name__ == "__main__":
    B, C, H, W = 2, 4, 16, 16
    reduction = 4
    Cr = max(1, C // reduction)

    key = jax.random.PRNGKey(0)
    kx, k1, k2, k3, k4 = jax.random.split(key, 5)

    x = jax.random.normal(kx, (B, C, H, W), dtype=jnp.float32)
    w1 = jax.random.normal(k1, (Cr, C), dtype=jnp.float32) * 0.5            # fc1 (out,in)
    w2 = jax.random.normal(k2, (C, Cr), dtype=jnp.float32) * 0.5            # fc2 (out,in)
    conv_w = jax.random.normal(k3, (1, 1, 3, 3), dtype=jnp.float32) * 0.3
    conv_b = jax.random.normal(k4, (1,), dtype=jnp.float32) * 0.1

    out = se_module(x, w1, w2, conv_w, conv_b)
    out = jax.block_until_ready(out)

    ref = _reference(x, w1, w2, conv_w, conv_b)
    assert out.shape == (B, C, H, W)
    max_err = float(jnp.max(jnp.abs(out - ref)))
    assert jnp.allclose(out, ref, atol=1e-4, rtol=1e-4), f"max abs err {max_err}"

    print("KERNEL_OK")
</pallas_src>

<mosaic_0001>
module attributes {stable_mosaic.version = 11 : i64} {
  func.func @_se_kernel(%arg0: i32, %arg1: memref<2x16x16x4xf32, #tpu.memory_space<vmem>>, %arg2: memref<4x128xf32, #tpu.memory_space<vmem>>, %arg3: memref<128x4xf32, #tpu.memory_space<vmem>>, %arg4: memref<10xf32, #tpu.memory_space<smem>>, %arg5: memref<2x16x16x4xf32, #tpu.memory_space<vmem>>) attributes {dimension_semantics = [#tpu.dimension_semantics<parallel>], iteration_bounds = array<i64: 1>, scalar_prefetch = 0 : i64, scratch_operands = 0 : i64, tpu.core_type = #tpu.core_type<tc>, window_params = [{transform_indices = @transform_0, window_bounds = array<i64: 2, 16, 16, 4>}, {pipeline_mode = #tpu.pipeline_mode<synchronous>, transform_indices = @transform_1, window_bounds = array<i64: 4, 128>}, {pipeline_mode = #tpu.pipeline_mode<synchronous>, transform_indices = @transform_2, window_bounds = array<i64: 128, 4>}, {transform_indices = @transform_3, window_bounds = array<i64: 10>}, {transform_indices = @transform_4, window_bounds = array<i64: 2, 16, 16, 4>}]} {
    %c0 = arith.constant 0 : index
    %c0_0 = arith.constant 0 : index
    %c0_1 = arith.constant 0 : index
    %c0_2 = arith.constant 0 : index
    %0 = vector.load %arg1[%c0, %c0_0, %c0_1, %c0_2] : memref<2x16x16x4xf32, #tpu.memory_space<vmem>>, vector<2x16x16x4xf32>
    %cst = arith.constant dense<0.000000e+00> : vector<2x16x4xf32>
    %1 = vector.multi_reduction <add>, %0, %cst [1] : vector<2x16x16x4xf32> to vector<2x16x4xf32>
    %cst_3 = arith.constant dense<0.000000e+00> : vector<2x4xf32>
    %2 = vector.multi_reduction <add>, %1, %cst_3 [1] : vector<2x16x4xf32> to vector<2x4xf32>
    %cst_4 = arith.constant 3.906250e-03 : f32
    %3 = vector.broadcast %cst_4 : f32 to vector<2x4xf32>
    %4 = arith.mulf %2, %3 : vector<2x4xf32>
    %c0_5 = arith.constant 0 : index
    %c0_6 = arith.constant 0 : index
    %5 = vector.load %arg2[%c0_5, %c0_6] : memref<4x128xf32, #tpu.memory_space<vmem>>, vector<4x128xf32>
    %cst_7 = arith.constant dense<0.000000e+00> : vector<2x128xf32>
    %6 = tpu.matmul %4, %5, %cst_7 {dimension_numbers = #tpu.dot_dimension_numbers<[1], [0], [0], [1], [0, 0, 1, 1], [], []>} : vector<2x4xf32>, vector<4x128xf32>, vector<2x128xf32> -> vector<2x128xf32>
    %cst_8 = arith.constant 0.000000e+00 : f32
    %7 = vector.broadcast %cst_8 : f32 to vector<2x128xf32>
    %8 = arith.maximumf %6, %7 : vector<2x128xf32>
    %c0_9 = arith.constant 0 : index
    %c0_10 = arith.constant 0 : index
    %9 = vector.load %arg3[%c0_9, %c0_10] : memref<128x4xf32, #tpu.memory_space<vmem>>, vector<128x4xf32>
    %cst_11 = arith.constant dense<0.000000e+00> : vector<2x4xf32>
    %10 = tpu.matmul %8, %9, %cst_11 {dimension_numbers = #tpu.dot_dimension_numbers<[1], [0], [0], [1], [0, 0, 1, 1], [], []>} : vector<2x128xf32>, vector<128x4xf32>, vector<2x4xf32> -> vector<2x4xf32>
    %11 = arith.negf %10 : vector<2x4xf32>
    %12 = math.exp %11 : vector<2x4xf32>
    %cst_12 = arith.constant 1.000000e+00 : f32
    %13 = vector.broadcast %cst_12 : f32 to vector<2x4xf32>
    %14 = arith.addf %13, %12 : vector<2x4xf32>
    %15 = arith.divf %13, %14 : vector<2x4xf32>
    %cst_13 = arith.constant dense<0.000000e+00> : vector<2x16x16xf32>
    %16 = vector.multi_reduction <add>, %0, %cst_13 [3] : vector<2x16x16x4xf32> to vector<2x16x16xf32>
    %cst_14 = arith.constant 2.500000e-01 : f32
    %17 = vector.broadcast %cst_14 : f32 to vector<2x16x16xf32>
    %18 = arith.mulf %16, %17 : vector<2x16x16xf32>
    %cst_15 = arith.constant dense<0xFF800000> : vector<2x16x16xf32>
    %19 = vector.multi_reduction <maximumf>, %0, %cst_15 [3] : vector<2x16x16x4xf32> to vector<2x16x16xf32>
    %20 = arith.addf %18, %19 : vector<2x16x16xf32>
    %21 = tpu.iota {dimensions = array<i32: 1>} : vector<2x16x16xi32>
    %22 = tpu.iota {dimensions = array<i32: 2>} : vector<2x16x16xi32>
    %cst_16 = arith.constant 0.000000e+00 : f32
    %23 = vector.broadcast %cst_16 : f32 to vector<2x16x16xf32>
    %c1_i32 = arith.constant 1 : i32
    %24 = tpu.dynamic_rotate %20 by %c1_i32 dim 1 : vector<2x16x16xf32>, i32 -> vector<2x16x16xf32>
    %c1_i32_17 = arith.constant 1 : i32
    %25 = tpu.dynamic_rotate %24 by %c1_i32_17 dim 2 : vector<2x16x16xf32>, i32 -> vector<2x16x16xf32>
    %c-1_i32 = arith.constant -1 : i32
    %26 = vector.broadcast %c-1_i32 : i32 to vector<2x16x16xi32>
    %27 = arith.addi %21, %26 : vector<2x16x16xi32>
    %c0_i32 = arith.constant 0 : i32
    %28 = vector.broadcast %c0_i32 : i32 to vector<2x16x16xi32>
    %29 = arith.cmpi sge, %27, %28 : vector<2x16x16xi32>
    %c-1_i32_18 = arith.constant -1 : i32
    %30 = vector.broadcast %c-1_i32_18 : i32 to vector<2x16x16xi32>
    %31 = arith.addi %21, %30 : vector<2x16x16xi32>
    %c16_i32 = arith.constant 16 : i32
    %32 = vector.broadcast %c16_i32 : i32 to vector<2x16x16xi32>
    %33 = arith.cmpi slt, %31, %32 : vector<2x16x16xi32>
    %34 = arith.andi %29, %33 : vector<2x16x16xi1>
    %c-1_i32_19 = arith.constant -1 : i32
    %35 = vector.broadcast %c-1_i32_19 : i32 to vector<2x16x16xi32>
    %36 = arith.addi %22, %35 : vector<2x16x16xi32>
    %c0_i32_20 = arith.constant 0 : i32
    %37 = vector.broadcast %c0_i32_20 : i32 to vector<2x16x16xi32>
    %38 = arith.cmpi sge, %36, %37 : vector<2x16x16xi32>
    %39 = arith.andi %34, %38 : vector<2x16x16xi1>
    %c-1_i32_21 = arith.constant -1 : i32
    %40 = vector.broadcast %c-1_i32_21 : i32 to vector<2x16x16xi32>
    %41 = arith.addi %22, %40 : vector<2x16x16xi32>
    %c16_i32_22 = arith.constant 16 : i32
    %42 = vector.broadcast %c16_i32_22 : i32 to vector<2x16x16xi32>
    %43 = arith.cmpi slt, %41, %42 : vector<2x16x16xi32>
    %44 = arith.andi %39, %43 : vector<2x16x16xi1>
    %c0_23 = arith.constant 0 : index
    %45 = memref.load %arg4[%c0_23] : memref<10xf32, #tpu.memory_space<smem>>
    %cst_24 = arith.constant 0.000000e+00 : f32
    %46 = vector.broadcast %cst_24 : f32 to vector<2x16x16xf32>
    %47 = arith.select %44, %25, %46 : vector<2x16x16xi1>, vector<2x16x16xf32>
    %48 = vector.broadcast %45 : f32 to vector<2x16x16xf32>
    %49 = arith.mulf %48, %47 : vector<2x16x16xf32>
    %50 = arith.addf %23, %49 : vector<2x16x16xf32>
    %c1_i32_25 = arith.constant 1 : i32
    %51 = tpu.dynamic_rotate %20 by %c1_i32_25 dim 1 : vector<2x16x16xf32>, i32 -> vector<2x16x16xf32>
    %c-1_i32_26 = arith.constant -1 : i32
    %52 = vector.broadcast %c-1_i32_26 : i32 to vector<2x16x16xi32>
    %53 = arith.addi %21, %52 : vector<2x16x16xi32>
    %c0_i32_27 = arith.constant 0 : i32
    %54 = vector.broadcast %c0_i32_27 : i32 to vector<2x16x16xi32>
    %55 = arith.cmpi sge, %53, %54 : vector<2x16x16xi32>
    %c-1_i32_28 = arith.constant -1 : i32
    %56 = vector.broadcast %c-1_i32_28 : i32 to vector<2x16x16xi32>
    %57 = arith.addi %21, %56 : vector<2x16x16xi32>
    %c16_i32_29 = arith.constant 16 : i32
    %58 = vector.broadcast %c16_i32_29 : i32 to vector<2x16x16xi32>
    %59 = arith.cmpi slt, %57, %58 : vector<2x16x16xi32>
    %60 = arith.andi %55, %59 : vector<2x16x16xi1>
    %c0_i32_30 = arith.constant 0 : i32
    %61 = vector.broadcast %c0_i32_30 : i32 to vector<2x16x16xi32>
    %62 = arith.addi %22, %61 : vector<2x16x16xi32>
    %c0_i32_31 = arith.constant 0 : i32
    %63 = vector.broadcast %c0_i32_31 : i32 to vector<2x16x16xi32>
    %64 = arith.cmpi sge, %62, %63 : vector<2x16x16xi32>
    %65 = arith.andi %60, %64 : vector<2x16x16xi1>
    %c0_i32_32 = arith.constant 0 : i32
    %66 = vector.broadcast %c0_i32_32 : i32 to vector<2x16x16xi32>
    %67 = arith.addi %22, %66 : vector<2x16x16xi32>
    %c16_i32_33 = arith.constant 16 : i32
    %68 = vector.broadcast %c16_i32_33 : i32 to vector<2x16x16xi32>
    %69 = arith.cmpi slt, %67, %68 : vector<2x16x16xi32>
    %70 = arith.andi %65, %69 : vector<2x16x16xi1>
    %c1 = arith.constant 1 : index
    %71 = memref.load %arg4[%c1] : memref<10xf32, #tpu.memory_space<smem>>
    %cst_34 = arith.constant 0.000000e+00 : f32
    %72 = vector.broadcast %cst_34 : f32 to vector<2x16x16xf32>
    %73 = arith.select %70, %51, %72 : vector<2x16x16xi1>, vector<2x16x16xf32>
    %74 = vector.broadcast %71 : f32 to vector<2x16x16xf32>
    %75 = arith.mulf %74, %73 : vector<2x16x16xf32>
    %76 = arith.addf %50, %75 : vector<2x16x16xf32>
    %c1_i32_35 = arith.constant 1 : i32
    %77 = tpu.dynamic_rotate %20 by %c1_i32_35 dim 1 : vector<2x16x16xf32>, i32 -> vector<2x16x16xf32>
    %c15_i32 = arith.constant 15 : i32
    %78 = tpu.dynamic_rotate %77 by %c15_i32 dim 2 : vector<2x16x16xf32>, i32 -> vector<2x16x16xf32>
    %c-1_i32_36 = arith.constant -1 : i32
    %79 = vector.broadcast %c-1_i32_36 : i32 to vector<2x16x16xi32>
    %80 = arith.addi %21, %79 : vector<2x16x16xi32>
    %c0_i32_37 = arith.constant 0 : i32
    %81 = vector.broadcast %c0_i32_37 : i32 to vector<2x16x16xi32>
    %82 = arith.cmpi sge, %80, %81 : vector<2x16x16xi32>
    %c-1_i32_38 = arith.constant -1 : i32
    %83 = vector.broadcast %c-1_i32_38 : i32 to vector<2x16x16xi32>
    %84 = arith.addi %21, %83 : vector<2x16x16xi32>
    %c16_i32_39 = arith.constant 16 : i32
    %85 = vector.broadcast %c16_i32_39 : i32 to vector<2x16x16xi32>
    %86 = arith.cmpi slt, %84, %85 : vector<2x16x16xi32>
    %87 = arith.andi %82, %86 : vector<2x16x16xi1>
    %c1_i32_40 = arith.constant 1 : i32
    %88 = vector.broadcast %c1_i32_40 : i32 to vector<2x16x16xi32>
    %89 = arith.addi %22, %88 : vector<2x16x16xi32>
    %c0_i32_41 = arith.constant 0 : i32
    %90 = vector.broadcast %c0_i32_41 : i32 to vector<2x16x16xi32>
    %91 = arith.cmpi sge, %89, %90 : vector<2x16x16xi32>
    %92 = arith.andi %87, %91 : vector<2x16x16xi1>
    %c1_i32_42 = arith.constant 1 : i32
    %93 = vector.broadcast %c1_i32_42 : i32 to vector<2x16x16xi32>
    %94 = arith.addi %22, %93 : vector<2x16x16xi32>
    %c16_i32_43 = arith.constant 16 : i32
    %95 = vector.broadcast %c16_i32_43 : i32 to vector<2x16x16xi32>
    %96 = arith.cmpi slt, %94, %95 : vector<2x16x16xi32>
    %97 = arith.andi %92, %96 : vector<2x16x16xi1>
    %c2 = arith.constant 2 : index
    %98 = memref.load %arg4[%c2] : memref<10xf32, #tpu.memory_space<smem>>
    %cst_44 = arith.constant 0.000000e+00 : f32
    %99 = vector.broadcast %cst_44 : f32 to vector<2x16x16xf32>
    %100 = arith.select %97, %78, %99 : vector<2x16x16xi1>, vector<2x16x16xf32>
    %101 = vector.broadcast %98 : f32 to vector<2x16x16xf32>
    %102 = arith.mulf %101, %100 : vector<2x16x16xf32>
    %103 = arith.addf %76, %102 : vector<2x16x16xf32>
    %c1_i32_45 = arith.constant 1 : i32
    %104 = tpu.dynamic_rotate %20 by %c1_i32_45 dim 2 : vector<2x16x16xf32>, i32 -> vector<2x16x16xf32>
    %c0_i32_46 = arith.constant 0 : i32
    %105 = vector.broadcast %c0_i32_46 : i32 to vector<2x16x16xi32>
    %106 = arith.addi %21, %105 : vector<2x16x16xi32>
    %c0_i32_47 = arith.constant 0 : i32
    %107 = vector.broadcast %c0_i32_47 : i32 to vector<2x16x16xi32>
    %108 = arith.cmpi sge, %106, %107 : vector<2x16x16xi32>
    %c0_i32_48 = arith.constant 0 : i32
    %109 = vector.broadcast %c0_i32_48 : i32 to vector<2x16x16xi32>
    %110 = arith.addi %21, %109 : vector<2x16x16xi32>
    %c16_i32_49 = arith.constant 16 : i32
    %111 = vector.broadcast %c16_i32_49 : i32 to vector<2x16x16xi32>
    %112 = arith.cmpi slt, %110, %111 : vector<2x16x16xi32>
    %113 = arith.andi %108, %112 : vector<2x16x16xi1>
    %c-1_i32_50 = arith.constant -1 : i32
    %114 = vector.broadcast %c-1_i32_50 : i32 to vector<2x16x16xi32>
    %115 = arith.addi %22, %114 : vector<2x16x16xi32>
    %c0_i32_51 = arith.constant 0 : i32
    %116 = vector.broadcast %c0_i32_51 : i32 to vector<2x16x16xi32>
    %117 = arith.cmpi sge, %115, %116 : vector<2x16x16xi32>
    %118 = arith.andi %113, %117 : vector<2x16x16xi1>
    %c-1_i32_52 = arith.constant -1 : i32
    %119 = vector.broadcast %c-1_i32_52 : i32 to vector<2x16x16xi32>
    %120 = arith.addi %22, %119 : vector<2x16x16xi32>
    %c16_i32_53 = arith.constant 16 : i32
    %121 = vector.broadcast %c16_i32_53 : i32 to vector<2x16x16xi32>
    %122 = arith.cmpi slt, %120, %121 : vector<2x16x16xi32>
    %123 = arith.andi %118, %122 : vector<2x16x16xi1>
    %c3 = arith.constant 3 : index
    %124 = memref.load %arg4[%c3] : memref<10xf32, #tpu.memory_space<smem>>
    %cst_54 = arith.constant 0.000000e+00 : f32
    %125 = vector.broadcast %cst_54 : f32 to vector<2x16x16xf32>
    %126 = arith.select %123, %104, %125 : vector<2x16x16xi1>, vector<2x16x16xf32>
    %127 = vector.broadcast %124 : f32 to vector<2x16x16xf32>
    %128 = arith.mulf %127, %126 : vector<2x16x16xf32>
    %129 = arith.addf %103, %128 : vector<2x16x16xf32>
    %c0_i32_55 = arith.constant 0 : i32
    %130 = vector.broadcast %c0_i32_55 : i32 to vector<2x16x16xi32>
    %131 = arith.addi %21, %130 : vector<2x16x16xi32>
    %c0_i32_56 = arith.constant 0 : i32
    %132 = vector.broadcast %c0_i32_56 : i32 to vector<2x16x16xi32>
    %133 = arith.cmpi sge, %131, %132 : vector<2x16x16xi32>
    %c0_i32_57 = arith.constant 0 : i32
    %134 = vector.broadcast %c0_i32_57 : i32 to vector<2x16x16xi32>
    %135 = arith.addi %21, %134 : vector<2x16x16xi32>
    %c16_i32_58 = arith.constant 16 : i32
    %136 = vector.broadcast %c16_i32_58 : i32 to vector<2x16x16xi32>
    %137 = arith.cmpi slt, %135, %136 : vector<2x16x16xi32>
    %138 = arith.andi %133, %137 : vector<2x16x16xi1>
    %c0_i32_59 = arith.constant 0 : i32
    %139 = vector.broadcast %c0_i32_59 : i32 to vector<2x16x16xi32>
    %140 = arith.addi %22, %139 : vector<2x16x16xi32>
    %c0_i32_60 = arith.constant 0 : i32
    %141 = vector.broadcast %c0_i32_60 : i32 to vector<2x16x16xi32>
    %142 = arith.cmpi sge, %140, %141 : vector<2x16x16xi32>
    %143 = arith.andi %138, %142 : vector<2x16x16xi1>
    %c0_i32_61 = arith.constant 0 : i32
    %144 = vector.broadcast %c0_i32_61 : i32 to vector<2x16x16xi32>
    %145 = arith.addi %22, %144 : vector<2x16x16xi32>
    %c16_i32_62 = arith.constant 16 : i32
    %146 = vector.broadcast %c16_i32_62 : i32 to vector<2x16x16xi32>
    %147 = arith.cmpi slt, %145, %146 : vector<2x16x16xi32>
    %148 = arith.andi %143, %147 : vector<2x16x16xi1>
    %c4 = arith.constant 4 : index
    %149 = memref.load %arg4[%c4] : memref<10xf32, #tpu.memory_space<smem>>
    %cst_63 = arith.constant 0.000000e+00 : f32
    %150 = vector.broadcast %cst_63 : f32 to vector<2x16x16xf32>
    %151 = arith.select %148, %20, %150 : vector<2x16x16xi1>, vector<2x16x16xf32>
    %152 = vector.broadcast %149 : f32 to vector<2x16x16xf32>
    %153 = arith.mulf %152, %151 : vector<2x16x16xf32>
    %154 = arith.addf %129, %153 : vector<2x16x16xf32>
    %c15_i32_64 = arith.constant 15 : i32
    %155 = tpu.dynamic_rotate %20 by %c15_i32_64 dim 2 : vector<2x16x16xf32>, i32 -> vector<2x16x16xf32>
    %c0_i32_65 = arith.constant 0 : i32
    %156 = vector.broadcast %c0_i32_65 : i32 to vector<2x16x16xi32>
    %157 = arith.addi %21, %156 : vector<2x16x16xi32>
    %c0_i32_66 = arith.constant 0 : i32
    %158 = vector.broadcast %c0_i32_66 : i32 to vector<2x16x16xi32>
    %159 = arith.cmpi sge, %157, %158 : vector<2x16x16xi32>
    %c0_i32_67 = arith.constant 0 : i32
    %160 = vector.broadcast %c0_i32_67 : i32 to vector<2x16x16xi32>
    %161 = arith.addi %21, %160 : vector<2x16x16xi32>
    %c16_i32_68 = arith.constant 16 : i32
    %162 = vector.broadcast %c16_i32_68 : i32 to vector<2x16x16xi32>
    %163 = arith.cmpi slt, %161, %162 : vector<2x16x16xi32>
    %164 = arith.andi %159, %163 : vector<2x16x16xi1>
    %c1_i32_69 = arith.constant 1 : i32
    %165 = vector.broadcast %c1_i32_69 : i32 to vector<2x16x16xi32>
    %166 = arith.addi %22, %165 : vector<2x16x16xi32>
    %c0_i32_70 = arith.constant 0 : i32
    %167 = vector.broadcast %c0_i32_70 : i32 to vector<2x16x16xi32>
    %168 = arith.cmpi sge, %166, %167 : vector<2x16x16xi32>
    %169 = arith.andi %164, %168 : vector<2x16x16xi1>
    %c1_i32_71 = arith.constant 1 : i32
    %170 = vector.broadcast %c1_i32_71 : i32 to vector<2x16x16xi32>
    %171 = arith.addi %22, %170 : vector<2x16x16xi32>
    %c16_i32_72 = arith.constant 16 : i32
    %172 = vector.broadcast %c16_i32_72 : i32 to vector<2x16x16xi32>
    %173 = arith.cmpi slt, %171, %172 : vector<2x16x16xi32>
    %174 = arith.andi %169, %173 : vector<2x16x16xi1>
    %c5 = arith.constant 5 : index
    %175 = memref.load %arg4[%c5] : memref<10xf32, #tpu.memory_space<smem>>
    %cst_73 = arith.constant 0.000000e+00 : f32
    %176 = vector.broadcast %cst_73 : f32 to vector<2x16x16xf32>
    %177 = arith.select %174, %155, %176 : vector<2x16x16xi1>, vector<2x16x16xf32>
    %178 = vector.broadcast %175 : f32 to vector<2x16x16xf32>
    %179 = arith.mulf %178, %177 : vector<2x16x16xf32>
    %180 = arith.addf %154, %179 : vector<2x16x16xf32>
    %c15_i32_74 = arith.constant 15 : i32
    %181 = tpu.dynamic_rotate %20 by %c15_i32_74 dim 1 : vector<2x16x16xf32>, i32 -> vector<2x16x16xf32>
    %c1_i32_75 = arith.constant 1 : i32
    %182 = tpu.dynamic_rotate %181 by %c1_i32_75 dim 2 : vector<2x16x16xf32>, i32 -> vector<2x16x16xf32>
    %c1_i32_76 = arith.constant 1 : i32
    %183 = vector.broadcast %c1_i32_76 : i32 to vector<2x16x16xi32>
    %184 = arith.addi %21, %183 : vector<2x16x16xi32>
    %c0_i32_77 = arith.constant 0 : i32
    %185 = vector.broadcast %c0_i32_77 : i32 to vector<2x16x16xi32>
    %186 = arith.cmpi sge, %184, %185 : vector<2x16x16xi32>
    %c1_i32_78 = arith.constant 1 : i32
    %187 = vector.broadcast %c1_i32_78 : i32 to vector<2x16x16xi32>
    %188 = arith.addi %21, %187 : vector<2x16x16xi32>
    %c16_i32_79 = arith.constant 16 : i32
    %189 = vector.broadcast %c16_i32_79 : i32 to vector<2x16x16xi32>
    %190 = arith.cmpi slt, %188, %189 : vector<2x16x16xi32>
    %191 = arith.andi %186, %190 : vector<2x16x16xi1>
    %c-1_i32_80 = arith.constant -1 : i32
    %192 = vector.broadcast %c-1_i32_80 : i32 to vector<2x16x16xi32>
    %193 = arith.addi %22, %192 : vector<2x16x16xi32>
    %c0_i32_81 = arith.constant 0 : i32
    %194 = vector.broadcast %c0_i32_81 : i32 to vector<2x16x16xi32>
    %195 = arith.cmpi sge, %193, %194 : vector<2x16x16xi32>
    %196 = arith.andi %191, %195 : vector<2x16x16xi1>
    %c-1_i32_82 = arith.constant -1 : i32
    %197 = vector.broadcast %c-1_i32_82 : i32 to vector<2x16x16xi32>
    %198 = arith.addi %22, %197 : vector<2x16x16xi32>
    %c16_i32_83 = arith.constant 16 : i32
    %199 = vector.broadcast %c16_i32_83 : i32 to vector<2x16x16xi32>
    %200 = arith.cmpi slt, %198, %199 : vector<2x16x16xi32>
    %201 = arith.andi %196, %200 : vector<2x16x16xi1>
    %c6 = arith.constant 6 : index
    %202 = memref.load %arg4[%c6] : memref<10xf32, #tpu.memory_space<smem>>
    %cst_84 = arith.constant 0.000000e+00 : f32
    %203 = vector.broadcast %cst_84 : f32 to vector<2x16x16xf32>
    %204 = arith.select %201, %182, %203 : vector<2x16x16xi1>, vector<2x16x16xf32>
    %205 = vector.broadcast %202 : f32 to vector<2x16x16xf32>
    %206 = arith.mulf %205, %204 : vector<2x16x16xf32>
    %207 = arith.addf %180, %206 : vector<2x16x16xf32>
    %c15_i32_85 = arith.constant 15 : i32
    %208 = tpu.dynamic_rotate %20 by %c15_i32_85 dim 1 : vector<2x16x16xf32>, i32 -> vector<2x16x16xf32>
    %c1_i32_86 = arith.constant 1 : i32
    %209 = vector.broadcast %c1_i32_86 : i32 to vector<2x16x16xi32>
    %210 = arith.addi %21, %209 : vector<2x16x16xi32>
    %c0_i32_87 = arith.constant 0 : i32
    %211 = vector.broadcast %c0_i32_87 : i32 to vector<2x16x16xi32>
    %212 = arith.cmpi sge, %210, %211 : vector<2x16x16xi32>
    %c1_i32_88 = arith.constant 1 : i32
    %213 = vector.broadcast %c1_i32_88 : i32 to vector<2x16x16xi32>
    %214 = arith.addi %21, %213 : vector<2x16x16xi32>
    %c16_i32_89 = arith.constant 16 : i32
    %215 = vector.broadcast %c16_i32_89 : i32 to vector<2x16x16xi32>
    %216 = arith.cmpi slt, %214, %215 : vector<2x16x16xi32>
    %217 = arith.andi %212, %216 : vector<2x16x16xi1>
    %c0_i32_90 = arith.constant 0 : i32
    %218 = vector.broadcast %c0_i32_90 : i32 to vector<2x16x16xi32>
    %219 = arith.addi %22, %218 : vector<2x16x16xi32>
    %c0_i32_91 = arith.constant 0 : i32
    %220 = vector.broadcast %c0_i32_91 : i32 to vector<2x16x16xi32>
    %221 = arith.cmpi sge, %219, %220 : vector<2x16x16xi32>
    %222 = arith.andi %217, %221 : vector<2x16x16xi1>
    %c0_i32_92 = arith.constant 0 : i32
    %223 = vector.broadcast %c0_i32_92 : i32 to vector<2x16x16xi32>
    %224 = arith.addi %22, %223 : vector<2x16x16xi32>
    %c16_i32_93 = arith.constant 16 : i32
    %225 = vector.broadcast %c16_i32_93 : i32 to vector<2x16x16xi32>
    %226 = arith.cmpi slt, %224, %225 : vector<2x16x16xi32>
    %227 = arith.andi %222, %226 : vector<2x16x16xi1>
    %c7 = arith.constant 7 : index
    %228 = memref.load %arg4[%c7] : memref<10xf32, #tpu.memory_space<smem>>
    %cst_94 = arith.constant 0.000000e+00 : f32
    %229 = vector.broadcast %cst_94 : f32 to vector<2x16x16xf32>
    %230 = arith.select %227, %208, %229 : vector<2x16x16xi1>, vector<2x16x16xf32>
    %231 = vector.broadcast %228 : f32 to vector<2x16x16xf32>
    %232 = arith.mulf %231, %230 : vector<2x16x16xf32>
    %233 = arith.addf %207, %232 : vector<2x16x16xf32>
    %c15_i32_95 = arith.constant 15 : i32
    %234 = tpu.dynamic_rotate %20 by %c15_i32_95 dim 1 : vector<2x16x16xf32>, i32 -> vector<2x16x16xf32>
    %c15_i32_96 = arith.constant 15 : i32
    %235 = tpu.dynamic_rotate %234 by %c15_i32_96 dim 2 : vector<2x16x16xf32>, i32 -> vector<2x16x16xf32>
    %c1_i32_97 = arith.constant 1 : i32
    %236 = vector.broadcast %c1_i32_97 : i32 to vector<2x16x16xi32>
    %237 = arith.addi %21, %236 : vector<2x16x16xi32>
    %c0_i32_98 = arith.constant 0 : i32
    %238 = vector.broadcast %c0_i32_98 : i32 to vector<2x16x16xi32>
    %239 = arith.cmpi sge, %237, %238 : vector<2x16x16xi32>
    %c1_i32_99 = arith.constant 1 : i32
    %240 = vector.broadcast %c1_i32_99 : i32 to vector<2x16x16xi32>
    %241 = arith.addi %21, %240 : vector<2x16x16xi32>
    %c16_i32_100 = arith.constant 16 : i32
    %242 = vector.broadcast %c16_i32_100 : i32 to vector<2x16x16xi32>
    %243 = arith.cmpi slt, %241, %242 : vector<2x16x16xi32>
    %244 = arith.andi %239, %243 : vector<2x16x16xi1>
    %c1_i32_101 = arith.constant 1 : i32
    %245 = vector.broadcast %c1_i32_101 : i32 to vector<2x16x16xi32>
    %246 = arith.addi %22, %245 : vector<2x16x16xi32>
    %c0_i32_102 = arith.constant 0 : i32
    %247 = vector.broadcast %c0_i32_102 : i32 to vector<2x16x16xi32>
    %248 = arith.cmpi sge, %246, %247 : vector<2x16x16xi32>
    %249 = arith.andi %244, %248 : vector<2x16x16xi1>
    %c1_i32_103 = arith.constant 1 : i32
    %250 = vector.broadcast %c1_i32_103 : i32 to vector<2x16x16xi32>
    %251 = arith.addi %22, %250 : vector<2x16x16xi32>
    %c16_i32_104 = arith.constant 16 : i32
    %252 = vector.broadcast %c16_i32_104 : i32 to vector<2x16x16xi32>
    %253 = arith.cmpi slt, %251, %252 : vector<2x16x16xi32>
    %254 = arith.andi %249, %253 : vector<2x16x16xi1>
    %c8 = arith.constant 8 : index
    %255 = memref.load %arg4[%c8] : memref<10xf32, #tpu.memory_space<smem>>
    %cst_105 = arith.constant 0.000000e+00 : f32
    %256 = vector.broadcast %cst_105 : f32 to vector<2x16x16xf32>
    %257 = arith.select %254, %235, %256 : vector<2x16x16xi1>, vector<2x16x16xf32>
    %258 = vector.broadcast %255 : f32 to vector<2x16x16xf32>
    %259 = arith.mulf %258, %257 : vector<2x16x16xf32>
    %260 = arith.addf %233, %259 : vector<2x16x16xf32>
    %c9 = arith.constant 9 : index
    %261 = memref.load %arg4[%c9] : memref<10xf32, #tpu.memory_space<smem>>
    %262 = vector.broadcast %261 : f32 to vector<2x16x16xf32>
    %263 = arith.addf %260, %262 : vector<2x16x16xf32>
    %264 = arith.negf %263 : vector<2x16x16xf32>
    %265 = math.exp %264 : vector<2x16x16xf32>
    %cst_106 = arith.constant 1.000000e+00 : f32
    %266 = vector.broadcast %cst_106 : f32 to vector<2x16x16xf32>
    %267 = arith.addf %266, %265 : vector<2x16x16xf32>
    %268 = arith.divf %266, %267 : vector<2x16x16xf32>
    %269 = vector.shape_cast %15 : vector<2x4xf32> to vector<2x1x1x4xf32>
    %270 = vector.shape_cast %268 : vector<2x16x16xf32> to vector<2x16x16x1xf32>
    %271 = vector.broadcast %269 : vector<2x1x1x4xf32> to vector<2x16x16x4xf32>
    %272 = vector.broadcast %270 : vector<2x16x16x1xf32> to vector<2x16x16x4xf32>
    %273 = arith.addf %271, %272 : vector<2x16x16x4xf32>
    %274 = arith.mulf %0, %273 : vector<2x16x16x4xf32>
    %c0_107 = arith.constant 0 : index
    %c0_108 = arith.constant 0 : index
    %c0_109 = arith.constant 0 : index
    %c0_110 = arith.constant 0 : index
    %275 = vector.load %arg5[%c0_107, %c0_108, %c0_109, %c0_110] : memref<2x16x16x4xf32, #tpu.memory_space<vmem>>, vector<2x16x16x4xf32>
    tpu.vector_store %arg5[%c0_107, %c0_108, %c0_109, %c0_110], %274 {strides = array<i32>} : memref<2x16x16x4xf32, #tpu.memory_space<vmem>>, vector<2x16x16x4xf32>,
    return
  }
  func.func @transform_0(%arg0: i32) -> (i32, i32, i32, i32) {
    %c0_i32 = arith.constant 0 : i32
    %c0_i32_0 = arith.constant 0 : i32
    %c0_i32_1 = arith.constant 0 : i32
    %c0_i32_2 = arith.constant 0 : i32
    return %arg0, %c0_i32, %c0_i32_0, %c0_i32_1 : i32, i32, i32, i32
  }
  func.func @transform_1(%arg0: i32) -> (i32, i32) {
    %c0_i32 = arith.constant 0 : i32
    %c0_i32_0 = arith.constant 0 : i32
    %c0_i32_1 = arith.constant 0 : i32
    return %c0_i32, %c0_i32_0 : i32, i32
  }
  func.func @transform_2(%arg0: i32) -> (i32, i32) {
    %c0_i32 = arith.constant 0 : i32
    %c0_i32_0 = arith.constant 0 : i32
    %c0_i32_1 = arith.constant 0 : i32
    return %c0_i32, %c0_i32_0 : i32, i32
  }
  func.func @transform_3(%arg0: i32) -> i32 {
    %c0_i32 = arith.constant 0 : i32
    %c0_i32_0 = arith.constant 0 : i32
    return %c0_i32 : i32
  }
  func.func @transform_4(%arg0: i32) -> (i32, i32, i32, i32) {
    %c0_i32 = arith.constant 0 : i32
    %c0_i32_0 = arith.constant 0 : i32
    %c0_i32_1 = arith.constant 0 : i32
    %c0_i32_2 = arith.constant 0 : i32
    return %arg0, %c0_i32, %c0_i32_0, %c0_i32_1 : i32, i32, i32, i32
  }
}

</mosaic_0001>

<bundles_post_ra>
// kernel: tpu_custom_call.1
= control target key start
LH: loop header
LB: loop body
LE: loop exit
PB: predicated region body
PF: predicated region fallthrough
CT: control target
= control target key end

     0   :  { %9 = vsyncpa [#allocation3], 0  ;;  %s4701_s0 = inlined_call_operand.vmem [shape: f32[2,16,16,4], index: 0, kind: input, shape index: {}]   ;;  %s4702_s1 = inlined_call_operand.vmem [shape: f32[4,128], index: 1, kind: input, shape index: {}]   ;;  %s4703_s2 = inlined_call_operand.vmem [shape: f32[128,4], index: 2, kind: input, shape index: {}]   ;;  %s4704_s3 = inlined_call_operand.vmem [shape: f32[10], index: 3, kind: input, shape index: {}]   ;;  %s4705_s4 = inlined_call_operand.vmem [shape: f32[2,16,16,4], index: 4, kind: output, shape index: {}]  }
   0x1   :  { %s22_s17 = sshll.u32 %s4704_s3, 4  ;;  %s23_s17 = int_to_ptr.vmem [resolvable:$true] %s22_s17 }
   0x2   :  { %s2403_s18 = scalar_lea.vmem %s23_s17, 16  ;;  %p2408_p1 = scmp.lt.s32.totalorder %s23_s17, %s23_s17 }
   0x3   :  { %p2404_p0 = scmp.ne.s32.totalorder %s23_s17, %s2403_s18  ;;  %p2409_p2 = scmp.lt.s32.totalorder %s2403_s18, %s2403_s18 }
   0x5   :  { %p2410_p3 = por %p2409_p2, %p2408_p1 }
   0x7   :  { %p2411_p4 = pnand %p2410_p3, %p2404_p0 }
   0x9   :  { %2414 = shalt.err (!%p2411_p4)
}
   0xa   :  { %s2417_s19 = smov [#allocation2]  }
   0xb   :  { %25 = dma.vmem_to_smem %s23_s17, 16, %s2417_s19, [#allocation3]  }
   0xc   :  { %2415 = dma.done.wait [#allocation3], 16  }
   0xd   :  { %2416 = vsyncadd [#allocation3], 4294967280 }
   0xe   :  { %29 = sfence }
   0xf   :  { %v2455_v0 = vld [vmem:[%s4701_s0 + $0x10] sm:$0xff]  ;;  %vm94_vm0 = vcmask 31744   ;;  %v2460_v1 = vld [vmem:[%s4701_s0] sm:$0xff]  ;;  %v2465_v2 = vld [vmem:[%s4701_s0 + $0x18] sm:$0xff]  ;;  %vm939_vm1 = vcmask 130112   ;;  %vm242_vm2 = vcmask 1041409  }
  0x10   :  { %v96_v3 = vsel %vm94_vm0, %v2455_v0, 0.0  ;;  %v95_v4 = vsel %vm94_vm0, %v2460_v1, 0.0  ;;  %v2474_v5 = vld [vmem:[%s4701_s0 + $0x8] sm:$0xff]  ;;  %v2484_v7 = vld [vmem:[%s4701_s0 + $0x20] sm:$0xff]  ;;  %v127_v9 = vsel %vm94_vm0, %v2465_v2, 0.0  ;;  %v2493_v11 = vld [vmem:[%s4701_s0 + $0x30] sm:$0xff] }
  0x11   :  { %v2479_v6 = vld [vmem:[%s4701_s0 + $0x28] sm:$0xff]  ;;  %417 = vadd.xlane.f32.xlu1 %v96_v3  ;;  %413 = vadd.xlane.f32.xlu0 %v95_v4  ;;  %v97_v8 = vadd.f32 %v96_v3, %v95_v4  ;;  %v126_v10 = vsel %vm94_vm0, %v2474_v5, 0.0  ;;  %v98_v13 = vsel %vm94_vm0, %v2484_v7, 0.0  ;;  %v2500_v14 = vld [vmem:[%s4701_s0 + $0x38] sm:$0xff]  ;;  %v2507_v17 = vld [vmem:[%s4701_s0 + $0x40] sm:$0xff]  ;;  %v100_v19 = vsel %vm94_vm0, %v2493_v11, 0.0 }
  0x12   :  { %v128_v12 = vadd.f32 %v127_v9, %v126_v10  ;;  %v129_v15 = vsel %vm94_vm0, %v2479_v6, 0.0  ;;  %4746 = vst [vmem:[#allocation5_spill] sm:$0xff] %v2507_v17  ;;  %v2514_v20 = vld [vmem:[%s4701_s0 + $0x48] sm:$0xff]  ;;  %v131_v21 = vsel %vm94_vm0, %v2500_v14, 0.0  ;;  %v2521_v23 = vld [vmem:[%s4701_s0 + $0x50] sm:$0xff]  ;;  %v102_v25 = vsel %vm94_vm0, %v2507_v17, 0.0 }
  0x13   :  { %v99_v16 = vadd.f32 %v98_v13, %v97_v8  ;;  %4747 = vst [vmem:[#allocation6_spill] sm:$0xff] %v2514_v20  ;;  %4748 = vst [vmem:[#allocation7_spill] sm:$0xff] %v2521_v23  ;;  %v2528_v26 = vld [vmem:[%s4701_s0 + $0x58] sm:$0xff]  ;;  %v133_v27 = vsel %vm94_vm0, %v2514_v20, 0.0  ;;  %v2535_v29 = vld [vmem:[%s4701_s0 + $0x68] sm:$0xff]  ;;  %v2544_v32 = vsel %vm94_vm0, %v2521_v23, 0.0 }
  0x14   :  { %v130_v18 = vadd.f32 %v129_v15, %v128_v12  ;;  %4749 = vst [vmem:[#allocation8_spill] sm:$0xff] %v2528_v26  ;;  %4750 = vst [vmem:[#allocation9_spill] sm:$0xff] %v2535_v29  ;;  %v2540_v30 = vld [vmem:[%s4701_s0 + $0x60] sm:$0xff]  ;;  %v2548_v33 = vsel %vm94_vm0, %v2528_v26, 0.0  ;;  %v2554_v35 = vld [vmem:[%s4701_s0 + $0x78] sm:$0xff]  ;;  %v2569_v39 = vsel %vm94_vm0, %v2535_v29, 0.0 }
  0x15   :  { %419 = vadd.xlane.f32.xlu1 %v127_v9  ;;  %415 = vadd.xlane.f32.xlu0 %v126_v10  ;;  %v101_v22 = vadd.f32 %v100_v19, %v99_v16  ;;  %4751 = vst [vmem:[#allocation10_spill] sm:$0xff] %v2540_v30  ;;  %4752 = vst [vmem:[#allocation11_spill] sm:$0xff] %v2554_v35  ;;  %v2559_v36 = vld [vmem:[%s4701_s0 + $0x70] sm:$0xff]  ;;  %v2564_v37 = vld [vmem:[%s4701_s0 + $0x108] sm:$0xff]  ;;  %v2573_v40 = vsel %vm94_vm0, %v2540_v30, 0.0  ;;  %v2648_v59 = vsel %vm94_vm0, %v2554_v35, 0.0 }
  0x16   :  { %v132_v24 = vadd.f32 %v131_v21, %v130_v18  ;;  %4753 = vst [vmem:[#allocation12_spill] sm:$0xff] %v2559_v36  ;;  %v2577_v41 = vsel %vm94_vm0, %v2564_v37, 0.0  ;;  %v2582_v42 = vld [vmem:[%s4701_s0 + $0x100] sm:$0xff]  ;;  %v2587_v43 = vld [vmem:[%s4701_s0 + $0x118] sm:$0xff]  ;;  %v2592_v44 = vld [vmem:[%s4701_s0 + $0x110] sm:$0xff]  ;;  %v2625_v53 = vsel %vm94_vm0, %v2559_v36, 0.0 }
  0x17   :  { %v103_v28 = vadd.f32 %v102_v25, %v101_v22  ;;  %v2598_v46 = vld [vmem:[%s4701_s0 + $0x80] sm:$0xff]  ;;  %v2602_v47 = vsel %vm94_vm0, %v2582_v42, 0.0  ;;  %v2606_v48 = vsel %vm94_vm0, %v2587_v43, 0.0  ;;  %v2610_v49 = vsel %vm94_vm0, %v2592_v44, 0.0  ;;  %v2615_v50 = vld [vmem:[%s4701_s0 + $0x128] sm:$0xff]  ;;  %v2639_v57 = vld [vmem:[%s4701_s0 + $0x138] sm:$0xff] }
  0x18   :  { %v134_v31 = vadd.f32 %v133_v27, %v132_v24  ;;  %v2620_v51 = vld [vmem:[%s4701_s0 + $0x120] sm:$0xff]  ;;  %v2630_v54 = vld [vmem:[%s4701_s0 + $0x88] sm:$0xff]  ;;  %v190_v55 = vadd.f32 %v2606_v48, %v2577_v41  ;;  %v159_v56 = vadd.f32 %v2610_v49, %v2602_v47  ;;  %v2644_v58 = vld [vmem:[%s4701_s0 + $0x130] sm:$0xff]  ;;  %v2658_v62 = vsel %vm94_vm0, %v2615_v50, 0.0  ;;  %s2418_s13 = smov 16   ;;  %s3665_s14 = sld [smem:[#allocation2 + $0x1]] }
  0x19   :  { %423 = vadd.xlane.f32.xlu1 %v129_v15  ;;  %421 = vadd.xlane.f32.xlu0 %v98_v13  ;;  %v105_v34 = vadd.f32 %v2544_v32, %v103_v28  ;;  %v2654_v61 = vld [vmem:[%s4701_s0 + $0x90] sm:$0xff]  ;;  %v2662_v63 = vsel %vm94_vm0, %v2620_v51, 0.0  ;;  %v2667_v4 = vsel %vm94_vm0, %v2598_v46, 0.0  ;;  %v2672_v8 = vld [vmem:[%s4701_s0 + $0x98] sm:$0xff]  ;;  %v2679_v12 = vld [vmem:[%s4701_s0 + $0x148] sm:$0xff]  ;;  %v141_v15 = vsel %vm94_vm0, %v2630_v54, 0.0 }
  0x1a   :  { %v136_v38 = vadd.f32 %v2548_v33, %v134_v31  ;;  %v192_v9 = vadd.f32 %v2658_v62, %v190_v55  ;;  %v161_v10 = vadd.f32 %v2662_v63, %v159_v56  ;;  %4754 = vst [vmem:[#allocation13_spill] sm:$0xff] %v2679_v12  ;;  %v2684_v13 = vld [vmem:[%s4701_s0 + $0x140] sm:$0xff]  ;;  %v112_v24 = vsel %vm94_vm0, %v2654_v61, 0.0  ;;  %v2707_v28 = vld [vmem:[%s4701_s0 + $0xa8] sm:$0xff]  ;;  %v2763_v23 = vld [vmem:[%s4701_s0 + $0xd8] sm:$0xff]  ;;  %s3678_s17 = sld [smem:[#allocation2 + $0x7]] }
  0x1b   :  { %v107_v45 = vadd.f32 %v2573_v40, %v105_v34  ;;  %4755 = vst [vmem:[#allocation14_spill] sm:$0xff] %v2684_v13  ;;  %v2692_v18 = vld [vmem:[%s4701_s0 + $0xa0] sm:$0xff]  ;;  %v2720_v55 = vsel %vm94_vm0, %v2679_v12, 0.0  ;;  %v2724_v56 = vsel %vm94_vm0, %v2684_v13, 0.0  ;;  %v2747_v30 = vld [vmem:[%s4701_s0 + $0xc8] sm:$0xff]  ;;  %4759 = vst [vmem:[#allocation18_spill] sm:$0xff] %v2763_v23 }
  0x1c   :  { %v138_v52 = vadd.f32 %v2569_v39, %v136_v38  ;;  %v143_v38 = vsel %vm94_vm0, %v2672_v8, 0.0  ;;  %4757 = vst [vmem:[#allocation16_spill] sm:$0xff] %v2747_v30  ;;  %v2777_v13 = vld [vmem:[%s4701_s0 + $0xe8] sm:$0xff]  ;;  %vm1221_vm3 = vcmask 1042434   ;;  %vm1223_vm4 = vcmask 1043459   ;;  %s2421_s21 = smov 113  }
  0x1d   :  { %427 = vadd.xlane.f32.xlu1 %v131_v21  ;;  %425 = vadd.xlane.f32.xlu0 %v100_v19  ;;  %v109_v60 = vadd.f32 %v2625_v53, %v107_v45  ;;  %v2696_v19 = vsel %vm94_vm0, %v2639_v57, 0.0  ;;  %v2700_v21 = vsel %vm94_vm0, %v2644_v58, 0.0  ;;  %4761 = vst [vmem:[#allocation20_spill] sm:$0xff] %v2777_v13  ;;  %vm1225_vm5 = vcmask 1044484   ;;  %s2242_s3 = sld [smem:[#allocation2 + $0x3]] }
  0x1e   :  { %v140_v3 = vadd.f32 %v2648_v59, %v138_v52  ;;  %v194_v31 = vadd.f32 %v2696_v19, %v192_v9  ;;  %v163_v34 = vadd.f32 %v2700_v21, %v161_v10  ;;  %v2716_v52 = vld [vmem:[%s4701_s0 + $0xb0] sm:$0xff]  ;;  %v145_v10 = vsel %vm94_vm0, %v2707_v28, 0.0  ;;  %s2244_s22 = sld [smem:[#allocation2 + $0x5]] }
  0x1f   :  { %v111_v16 = vadd.f32 %v2667_v4, %v109_v60  ;;  %v116_v35 = vsel %vm94_vm0, %v2716_v52, 0.0  ;;  %vm1227_vm6 = vcmask 1045509   ;;  %vm1229_vm7 = vcmask 1046534   ;;  %s1307_s23 = sld [smem:[#allocation2]] }
  0x20   :  { %v142_v22 = vadd.f32 %v141_v15, %v140_v3  ;;  %v196_v3 = vadd.f32 %v2720_v55, %v194_v31  ;;  %v165_v9 = vadd.f32 %v2724_v56, %v163_v34  ;;  %vm1231_vm8 = vcmask 1047559   ;;  %s2241_s24 = sld [smem:[#allocation2 + $0x2]] }
  0x21   :  { %431 = vadd.xlane.f32.xlu1 %v133_v27  ;;  %429 = vadd.xlane.f32.xlu0 %v102_v25  ;;  %v113_v45 = vadd.f32 %v112_v24, %v111_v16  ;;  %v114_v25 = vsel %vm94_vm0, %v2692_v18, 0.0  ;;  %v2731_v27 = vld [vmem:[%s4701_s0 + $0xb8] sm:$0xff]  ;;  %vm246_vm11 = vcmask 1043456   ;;  %vm2420_vm12 = vmmov 0   ;;  %s2243_s25 = sld [smem:[#allocation2 + $0x4]] }
  0x22   :  { %v144_v60 = vadd.f32 %v143_v38, %v142_v22  ;;  %v2740_v22 = vld [vmem:[%s4701_s0 + $0xc0] sm:$0xff]  ;;  %v147_v31 = vsel %vm94_vm0, %v2731_v27, 0.0  ;;  %s2245_s26 = sld [smem:[#allocation2 + $0x6]] }
  0x23   :  { %v115_v16 = vadd.f32 %v114_v25, %v113_v45  ;;  %4756 = vst [vmem:[#allocation15_spill] sm:$0xff] %v2740_v22  ;;  %v2756_v45 = vld [vmem:[%s4701_s0 + $0xd0] sm:$0xff]  ;;  %v118_v29 = vsel %vm94_vm0, %v2740_v22, 0.0  ;;  %s4016_s27 = sld [smem:[#allocation2 + $0x8]] }
  0x24   :  { %v146_v36 = vadd.f32 %v145_v10, %v144_v60  ;;  %4758 = vst [vmem:[#allocation17_spill] sm:$0xff] %v2756_v45  ;;  %s4036_s28 = sld [smem:[#allocation2 + $0x9]] }
  0x25   :  { %435 = vadd.xlane.f32.xlu1 %v2548_v33  ;;  %433 = vadd.xlane.f32.xlu0 %v2544_v32  ;;  %v117_v34 = vadd.f32 %v116_v35, %v115_v16  ;;  %v149_v32 = vsel %vm94_vm0, %v2747_v30, 0.0  ;;  %v2770_v16 = vld [vmem:[%s4701_s0 + $0xe0] sm:$0xff]  ;;  %v2793_v30 = vld [vmem:[%s4701_s0 + $0xf8] sm:$0xff] }
  0x26   :  { %v148_v60 = vadd.f32 %v147_v31, %v146_v36  ;;  %4760 = vst [vmem:[#allocation19_spill] sm:$0xff] %v2770_v16  ;;  %v120_v36 = vsel %vm94_vm0, %v2756_v45, 0.0  ;;  %v122_v45 = vsel %vm94_vm0, %v2770_v16, 0.0  ;;  %4763 = vst [vmem:[#allocation22_spill] sm:$0xff] %v2793_v30 }
  0x27   :  { %v119_v33 = vadd.f32 %v118_v29, %v117_v34  ;;  %v151_v34 = vsel %vm94_vm0, %v2763_v23, 0.0 }
  0x28   :  { %v150_v26 = vadd.f32 %v149_v32, %v148_v60  ;;  %v2786_v60 = vld [vmem:[%s4701_s0 + $0xf0] sm:$0xff] }
  0x29   :  { %439 = vadd.xlane.f32.xlu1 %v2569_v39  ;;  %437 = vadd.xlane.f32.xlu0 %v2573_v40  ;;  %v121_v12 = vadd.f32 %v120_v36, %v119_v33  ;;  %4762 = vst [vmem:[#allocation21_spill] sm:$0xff] %v2786_v60  ;;  %v153_v39 = vsel %vm94_vm0, %v2777_v13, 0.0  ;;  %v2799_v33 = vsel %vm94_vm0, %v2786_v60, 0.0 }
  0x2a   :  { %v152_v22 = vadd.f32 %v151_v34, %v150_v26  ;;  %v155_v26 = vsel %vm94_vm0, %v2793_v30, 0.0  ;;  %v2919_v30 = vld [vmem:[%s4701_s0 + $0x1a0] sm:$0xff] }
  0x2b   :  { %v123_v40 = vadd.f32 %v122_v45, %v121_v12 }
  0x2c   :  { %v154_v23 = vadd.f32 %v153_v39, %v152_v22 }
  0x2d   :  { %443 = vadd.xlane.f32.xlu1 %v2648_v59  ;;  %441 = vadd.xlane.f32.xlu0 %v2625_v53  ;;  %v125_v16 = vadd.f32 %v2799_v33, %v123_v40  ;;  %v2814_v59 = vld [vmem:[%s4701_s0 + $0x158] sm:$0xff]  ;;  %v2819_v53 = vld [vmem:[%s4701_s0 + $0x150] sm:$0xff] }
  0x2e   :  { %v156_v17 = vadd.f32 %v155_v26, %v154_v23  ;;  %4765 = vst [vmem:[#allocation24_spill] sm:$0xff] %v2814_v59  ;;  %4766 = vst [vmem:[#allocation25_spill] sm:$0xff] %v2819_v53  ;;  %v2823_v23 = vsel %vm94_vm0, %v2814_v59, 0.0 }
  0x2f   :  { %v219_v20 = vsel %vm94_vm0, %v125_v16, 0.0  ;;  %v2859_v16 = vld [vmem:[%s4701_s0 + $0x170] sm:$0xff] }
  0x30   :  { %v220_v13 = vsel %vm94_vm0, %v156_v17, 0.0  ;;  %v2827_v17 = vsel %vm94_vm0, %v2819_v53, 0.0  ;;  %4770 = vst [vmem:[#allocation29_spill] sm:$0xff] %v2859_v16 }
  0x31   :  { %447 = vadd.xlane.f32.xlu1 %v141_v15  ;;  %445 = vadd.xlane.f32.xlu0 %v2667_v4  ;;  %v2809_v12 = vadd.f32 %v220_v13, %v219_v20  ;;  %v198_v20 = vadd.f32 %v2823_v23, %v196_v3  ;;  %v167_v4 = vadd.f32 %v2827_v17, %v165_v9  ;;  %v2834_v13 = vld [vmem:[%s4701_s0 + $0x168] sm:$0xff]  ;;  %v2839_v15 = vld [vmem:[%s4701_s0 + $0x160] sm:$0xff]  ;;  %v2854_v9 = vld [vmem:[%s4701_s0 + $0x178] sm:$0xff] }
  0x32   :  { %4767 = vst [vmem:[#allocation26_spill] sm:$0xff] %v2834_v13  ;;  %4768 = vst [vmem:[#allocation27_spill] sm:$0xff] %v2839_v15  ;;  %v2843_v22 = vsel %vm94_vm0, %v2834_v13, 0.0  ;;  %v2863_v40 = vsel %vm94_vm0, %v2854_v9, 0.0  ;;  %v2933_v13 = vld [vmem:[%s4701_s0 + $0x1b0] sm:$0xff] }
  0x33   :  { %4764 = vst [vmem:[#allocation23_spill] sm:$0xff] %v2809_v12  ;;  %4769 = vst [vmem:[#allocation28_spill] sm:$0xff] %v2854_v9  ;;  %v2879_v12 = vld [vmem:[%s4701_s0 + $0x180] sm:$0xff]  ;;  %v2899_v9 = vld [vmem:[%s4701_s0 + $0x190] sm:$0xff]  ;;  %v178_v59 = vsel %vm94_vm0, %v2933_v13, 0.0 }
  0x35   :  { %451 = vadd.xlane.f32.xlu1 %v143_v38  ;;  %449 = vadd.xlane.f32.xlu0 %v112_v24  ;;  %v2847_v24 = vsel %vm94_vm0, %v2839_v15, 0.0  ;;  %v200_v38 = vadd.f32 %v2843_v22, %v198_v20 }
  0x36   :  { %v169_v3 = vadd.f32 %v2847_v24, %v167_v4  ;;  %v2874_v4 = vld [vmem:[%s4701_s0 + $0x188] sm:$0xff] }
  0x39   :  { %455 = vadd.xlane.f32.xlu1 %v145_v10  ;;  %453 = vadd.xlane.f32.xlu0 %v114_v25  ;;  %v2867_v25 = vsel %vm94_vm0, %v2859_v16, 0.0  ;;  %v202_v10 = vadd.f32 %v2863_v40, %v200_v38  ;;  %v2883_v16 = vsel %vm94_vm0, %v2874_v4, 0.0 }
  0x3a   :  { %v171_v20 = vadd.f32 %v2867_v25, %v169_v3  ;;  %v2894_v3 = vld [vmem:[%s4701_s0 + $0x198] sm:$0xff] }
  0x3b   :  { %v2903_v60 = vsel %vm94_vm0, %v2894_v3, 0.0 }
  0x3d   :  { %459 = vadd.xlane.f32.xlu1 %v147_v31  ;;  %457 = vadd.xlane.f32.xlu0 %v116_v35  ;;  %v2887_v35 = vsel %vm94_vm0, %v2879_v12, 0.0  ;;  %v204_v31 = vadd.f32 %v2883_v16, %v202_v10 }
  0x3e   :  { %v173_v38 = vadd.f32 %v2887_v35, %v171_v20  ;;  %v2914_v20 = vld [vmem:[%s4701_s0 + $0x1a8] sm:$0xff] }
  0x3f   :  { %v207_v15 = vsel %vm94_vm0, %v2914_v20, 0.0 }
  0x41   :  { %463 = vadd.xlane.f32.xlu1 %v149_v32  ;;  %461 = vadd.xlane.f32.xlu0 %v118_v29  ;;  %v2907_v29 = vsel %vm94_vm0, %v2899_v9, 0.0  ;;  %v206_v32 = vadd.f32 %v2903_v60, %v204_v31 }
  0x42   :  { %v175_v10 = vadd.f32 %v2907_v29, %v173_v38  ;;  %v2928_v38 = vld [vmem:[%s4701_s0 + $0x1b8] sm:$0xff] }
  0x43   :  { %4771 = vst [vmem:[#allocation30_spill] sm:$0xff] %v2928_v38  ;;  %v209_v53 = vsel %vm94_vm0, %v2928_v38, 0.0 }
  0x45   :  { %467 = vadd.xlane.f32.xlu1 %v151_v34  ;;  %465 = vadd.xlane.f32.xlu0 %v120_v36  ;;  %v176_v36 = vsel %vm94_vm0, %v2919_v30, 0.0  ;;  %v208_v34 = vadd.f32 %v207_v15, %v206_v32  ;;  %v2943_v32 = vld [vmem:[%s4701_s0 + $0x1c8] sm:$0xff] }
  0x46   :  { %v177_v31 = vadd.f32 %v176_v36, %v175_v10  ;;  %4772 = vst [vmem:[#allocation31_spill] sm:$0xff] %v2943_v32  ;;  %v2948_v10 = vld [vmem:[%s4701_s0 + $0x1c0] sm:$0xff]  ;;  %v2952_v38 = vsel %vm94_vm0, %v2943_v32, 0.0  ;;  %v2970_v32 = vld [vmem:[%s4701_s0 + $0x1d0] sm:$0xff] }
  0x47   :  { %4773 = vst [vmem:[#allocation32_spill] sm:$0xff] %v2948_v10  ;;  %4775 = vst [vmem:[#allocation34_spill] sm:$0xff] %v2970_v32 }
  0x49   :  { %471 = vadd.xlane.f32.xlu1 %v153_v39  ;;  %469 = vadd.xlane.f32.xlu0 %v122_v45  ;;  %v210_v45 = vadd.f32 %v209_v53, %v208_v34  ;;  %v179_v39 = vadd.f32 %v178_v59, %v177_v31  ;;  %v2965_v31 = vld [vmem:[%s4701_s0 + $0x1d8] sm:$0xff] }
  0x4a   :  { %4774 = vst [vmem:[#allocation33_spill] sm:$0xff] %v2965_v31 }
  0x4d   :  { %475 = vadd.xlane.f32.xlu1 %v155_v26  ;;  %473 = vadd.xlane.f32.xlu0 %v2799_v33  ;;  %v2956_v26 = vsel %vm94_vm0, %v2948_v10, 0.0  ;;  %v212_v33 = vadd.f32 %v2952_v38, %v210_v45  ;;  %v2974_v10 = vsel %vm94_vm0, %v2965_v31, 0.0  ;;  %v2992_v31 = vld [vmem:[%s4701_s0 + $0x1e0] sm:$0xff] }
  0x4e   :  { %v181_v34 = vadd.f32 %v2956_v26, %v179_v39  ;;  %v2987_v39 = vld [vmem:[%s4701_s0 + $0x1e8] sm:$0xff]  ;;  %4777 = vst [vmem:[#allocation36_spill] sm:$0xff] %v2992_v31 }
  0x4f   :  { %4776 = vst [vmem:[#allocation35_spill] sm:$0xff] %v2987_v39 }
  0x51   :  { %479 = vadd.xlane.f32.xlu1 %v2577_v41  ;;  %477 = vadd.xlane.f32.xlu0 %v2602_v47  ;;  %v2978_v41 = vsel %vm94_vm0, %v2970_v32, 0.0  ;;  %v214_v47 = vadd.f32 %v2974_v10, %v212_v33  ;;  %v2996_v32 = vsel %vm94_vm0, %v2987_v39, 0.0  ;;  %v3014_v39 = vld [vmem:[%s4701_s0 + $0x1f0] sm:$0xff] }
  0x52   :  { %v183_v45 = vadd.f32 %v2978_v41, %v181_v34  ;;  %4778 = vst [vmem:[#allocation37_spill] sm:$0xff] %v2996_v32  ;;  %v3009_v34 = vld [vmem:[%s4701_s0 + $0x1f8] sm:$0xff] }
  0x55   :  { %483 = vadd.xlane.f32.xlu1 %v2606_v48  ;;  %481 = vadd.xlane.f32.xlu0 %v2610_v49  ;;  %v3000_v48 = vsel %vm94_vm0, %v2992_v31, 0.0  ;;  %v216_v49 = vadd.f32 %v2996_v32, %v214_v47  ;;  %v3018_v31 = vsel %vm94_vm0, %v3009_v34, 0.0 }
  0x56   :  { %4779 = vst [vmem:[#allocation38_spill] sm:$0xff] %v3000_v48  ;;  %v185_v33 = vadd.f32 %v3000_v48, %v183_v45 }
  0x59   :  { %487 = vadd.xlane.f32.xlu1 %v2658_v62  ;;  %485 = vadd.xlane.f32.xlu0 %v2662_v63  ;;  %v3022_v62 = vsel %vm94_vm0, %v3014_v39, 0.0  ;;  %v218_v63 = vadd.f32 %v3018_v31, %v216_v49  ;;  %v719_v49 = vsel %vm94_vm0, %v2644_v58, -inf }
  0x5a   :  { %v187_v47 = vadd.f32 %v3022_v62, %v185_v33 }
  0x5b   :  { %v229_v45 = vsel %vm94_vm0, %v218_v63, 0.0  ;;  %v4780_v63 = vld [vmem:[#allocation30_spill] sm:$0xff] }
  0x5c   :  { %v228_v48 = vsel %vm94_vm0, %v187_v47, 0.0  ;;  %v767_v47 = vsel %vm94_vm0, %v2933_v13, -inf }
  0x5d   :  { %491 = vadd.xlane.f32.xlu1 %v2696_v19  ;;  %489 = vadd.xlane.f32.xlu0 %v2700_v21  ;;  %v3030_v32 = vadd.f32 %v229_v45, %v228_v48  ;;  %v608_v19 = vsel %vm94_vm0, %v2474_v5, -inf  ;;  %v605_v21 = vsel %vm94_vm0, %v2460_v1, -inf  ;;  %v662_v1 = vsel %vm94_vm0, %v2672_v8, -inf  ;;  %v4782_v58 = vld [vmem:[#allocation38_spill] sm:$0xff] }
  0x5e   :  { %v659_v5 = vsel %vm94_vm0, %v2654_v61, -inf  ;;  %v752_v61 = vsel %vm94_vm0, %v2874_v4, -inf  ;;  %v749_v8 = vsel %vm94_vm0, %v2879_v12, -inf  ;;  %v713_v4 = vsel %vm94_vm0, %v2620_v51, -inf }
  0x61   :  { %495 = vadd.xlane.f32.xlu1 %v2720_v55  ;;  %493 = vadd.xlane.f32.xlu0 %v2724_v56  ;;  %v614_v55 = vsel %vm94_vm0, %v2465_v2, -inf  ;;  %v611_v56 = vsel %vm94_vm0, %v2455_v0, -inf  ;;  %v704_v0 = vsel %vm94_vm0, %v2564_v37, -inf  ;;  %v701_v2 = vsel %vm94_vm0, %v2582_v42, -inf }
  0x65   :  { %499 = vadd.xlane.f32.xlu1 %v2823_v23  ;;  %497 = vadd.xlane.f32.xlu0 %v2827_v17 }
  0x69   :  { %503 = vadd.xlane.f32.xlu1 %v2843_v22  ;;  %501 = vadd.xlane.f32.xlu0 %v2847_v24  ;;  %v617_v22 = vsel %vm94_vm0, %v2484_v7, -inf  ;;  %v716_v7 = vsel %vm94_vm0, %v2615_v50, -inf }
  0x6d   :  { %507 = vadd.xlane.f32.xlu1 %v2863_v40  ;;  %505 = vadd.xlane.f32.xlu0 %v2867_v25  ;;  %v665_v40 = vsel %vm94_vm0, %v2692_v18, -inf  ;;  %v764_v18 = vsel %vm94_vm0, %v2914_v20, -inf  ;;  %v626_v20 = vsel %vm94_vm0, %v2500_v14, -inf }
  0x71   :  { %511 = vadd.xlane.f32.xlu1 %v2883_v16  ;;  %509 = vadd.xlane.f32.xlu0 %v2887_v35  ;;  %v668_v16 = vsel %vm94_vm0, %v2707_v28, -inf }
  0x75   :  { %515 = vadd.xlane.f32.xlu1 %v2903_v60  ;;  %513 = vadd.xlane.f32.xlu0 %v2907_v29  ;;  %v656_v60 = vsel %vm94_vm0, %v2630_v54, -inf  ;;  %v707_v54 = vsel %vm94_vm0, %v2592_v44, -inf  ;;  %v755_v44 = vsel %vm94_vm0, %v2899_v9, -inf }
  0x79   :  { %519 = vadd.xlane.f32.xlu1 %v207_v15  ;;  %517 = vadd.xlane.f32.xlu0 %v176_v36  ;;  %v620_v15 = vsel %vm94_vm0, %v2479_v6, -inf }
  0x7d   :  { %523 = vadd.xlane.f32.xlu1 %v209_v53  ;;  %521 = vadd.xlane.f32.xlu0 %v178_v59  ;;  %v653_v59 = vsel %vm94_vm0, %v2598_v46, -inf  ;;  %v710_v46 = vsel %vm94_vm0, %v2587_v43, -inf  ;;  %v758_v43 = vsel %vm94_vm0, %v2894_v3, -inf  ;;  %v761_v3 = vsel %vm94_vm0, %v2919_v30, -inf }
  0x7e   :  { %v623_v30 = vsel %vm94_vm0, %v2493_v11, -inf  ;;  %v722_v11 = vsel %vm94_vm0, %v2639_v57, -inf }
  0x81   :  { %609 = vmax.xlane.f32.xlu1 %v608_v19  ;;  %606 = vmax.xlane.f32.xlu0 %v605_v21  ;;  %v4781_v19 = vld [vmem:[#allocation37_spill] sm:$0xff] }
  0x85   :  { %615 = vmax.xlane.f32.xlu1 %v614_v55  ;;  %612 = vmax.xlane.f32.xlu0 %v611_v56  ;;  %v4783_v56 = vld [vmem:[#allocation6_spill] sm:$0xff] }
  0x89   :  { %657 = vmax.xlane.f32.xlu1 %v656_v60  ;;  %654 = vmax.xlane.f32.xlu0 %v653_v59  ;;  %v632_v60 = vsel %vm94_vm0, %v4783_v56, -inf  ;;  %v4784_v59 = vld [vmem:[#allocation5_spill] sm:$0xff] }
  0x8a   :  { %v629_v13 = vsel %vm94_vm0, %v4784_v59, -inf }
  0x8d   :  { %663 = vmax.xlane.f32.xlu1 %v662_v1  ;;  %660 = vmax.xlane.f32.xlu0 %v659_v5 }
  0x91   :  { %705 = vmax.xlane.f32.xlu1 %v704_v0  ;;  %702 = vmax.xlane.f32.xlu0 %v701_v2  ;;  %v4785_v0 = vld [vmem:[#allocation16_spill] sm:$0xff] }
  0x92   :  { %v680_v2 = vsel %vm94_vm0, %v4785_v0, -inf }
  0x95   :  { %711 = vmax.xlane.f32.xlu1 %v710_v46  ;;  %708 = vmax.xlane.f32.xlu0 %v707_v54  ;;  %v4786_v46 = vld [vmem:[#allocation15_spill] sm:$0xff] }
  0x96   :  { %v677_v54 = vsel %vm94_vm0, %v4786_v46, -inf }
  0x99   :  { %753 = vmax.xlane.f32.xlu1 %v752_v61  ;;  %750 = vmax.xlane.f32.xlu0 %v749_v8 }
  0x9a   :  { %v3072_v37 = vpop.xlane.xlu1 %417  ;;  %v3074_v42 = vpop.xlane.xlu0 %413 }
  0x9d   :  { %759 = vmax.xlane.f32.xlu1 %v758_v43  ;;  %756 = vmax.xlane.f32.xlu0 %v755_v44  ;;  %v4787_v43 = vld [vmem:[#allocation13_spill] sm:$0xff] }
  0x9e   :  { %v3080_v53 = vpop.xlane.xlu1 %419  ;;  %v3082_v23 = vpop.xlane.xlu0 %415  ;;  %v728_v44 = vsel %vm94_vm0, %v4787_v43, -inf }
  0xa1   :  { %527 = vadd.xlane.f32.xlu1 %v2952_v38  ;;  %525 = vadd.xlane.f32.xlu0 %v2956_v26 }
  0xa2   :  { %v3086_v12 = vpop.xlane.xlu1 %423  ;;  %v3088_v17 = vpop.xlane.xlu0 %421 }
  0xa5   :  { %621 = vmax.xlane.f32.xlu1 %v620_v15  ;;  %618 = vmax.xlane.f32.xlu0 %v617_v22  ;;  %v4788_v15 = vld [vmem:[#allocation14_spill] sm:$0xff] }
  0xa6   :  { %v3094_v24 = vpop.xlane.xlu1 %427  ;;  %v3096_v9 = vpop.xlane.xlu0 %425  ;;  %v725_v22 = vsel %vm94_vm0, %v4788_v15, -inf }
  0xa9   :  { %669 = vmax.xlane.f32.xlu1 %v668_v16  ;;  %666 = vmax.xlane.f32.xlu0 %v665_v40 }
  0xaa   :  { %v3102_v25 = vpop.xlane.xlu1 %431  ;;  %v3104_v6 = vpop.xlane.xlu0 %429 }
  0xad   :  { %717 = vmax.xlane.f32.xlu1 %v716_v7  ;;  %714 = vmax.xlane.f32.xlu0 %v713_v4  ;;  %v4789_v7 = vld [vmem:[#allocation31_spill] sm:$0xff] }
  0xae   :  { %v3110_v35 = vpop.xlane.xlu1 %435  ;;  %v3112_v28 = vpop.xlane.xlu0 %433  ;;  %v776_v4 = vsel %vm94_vm0, %v4789_v7, -inf }
  0xb1   :  { %765 = vmax.xlane.f32.xlu1 %v764_v18  ;;  %762 = vmax.xlane.f32.xlu0 %v761_v3  ;;  %v4790_v18 = vld [vmem:[#allocation32_spill] sm:$0xff] }
  0xb2   :  { %v3118_v29 = vpop.xlane.xlu1 %439  ;;  %v3120_v50 = vpop.xlane.xlu0 %437  ;;  %v773_v3 = vsel %vm94_vm0, %v4790_v18, -inf }
  0xb5   :  { %531 = vadd.xlane.f32.xlu1 %v2974_v10  ;;  %529 = vadd.xlane.f32.xlu0 %v2978_v41  ;;  %v674_v10 = vsel %vm94_vm0, %v2731_v27, -inf  ;;  %v671_v41 = vsel %vm94_vm0, %v2716_v52, -inf  ;;  %v770_v52 = vsel %vm94_vm0, %v4780_v63, -inf  ;;  %v4792_v63 = vld [vmem:[#allocation7_spill] sm:$0xff] }
  0xb6   :  { %v3124_v51 = vpop.xlane.xlu1 %443  ;;  %v3126_v36 = vpop.xlane.xlu0 %441 }
  0xb9   :  { %627 = vmax.xlane.f32.xlu1 %v626_v20  ;;  %624 = vmax.xlane.f32.xlu0 %v623_v30 }
  0xba   :  { %v3132_v38 = vpop.xlane.xlu1 %447  ;;  %v3134_v26 = vpop.xlane.xlu0 %445 }
  0xbd   :  { %675 = vmax.xlane.f32.xlu1 %v674_v10  ;;  %672 = vmax.xlane.f32.xlu0 %v671_v41 }
  0xbe   :  { %v3140_v48 = vpop.xlane.xlu1 %451  ;;  %v3142_v14 = vpop.xlane.xlu0 %449 }
  0xc1   :  { %723 = vmax.xlane.f32.xlu1 %v722_v11  ;;  %720 = vmax.xlane.f32.xlu0 %v719_v49  ;;  %v4791_v11 = vld [vmem:[#allocation8_spill] sm:$0xff] }
  0xc2   :  { %v3148_v33 = vpop.xlane.xlu1 %455  ;;  %v3150_v27 = vpop.xlane.xlu0 %453  ;;  %v638_v49 = vsel %vm94_vm0, %v4791_v11, -inf }
  0xc5   :  { %771 = vmax.xlane.f32.xlu1 %v770_v52  ;;  %768 = vmax.xlane.f32.xlu0 %v767_v47  ;;  %v635_v52 = vsel %vm94_vm0, %v4792_v63, -inf }
  0xc6   :  { %v3156_v45 = vpop.xlane.xlu1 %459  ;;  %v3158_v57 = vpop.xlane.xlu0 %457 }
  0xc9   :  { %535 = vadd.xlane.f32.xlu1 %v4781_v19  ;;  %533 = vadd.xlane.f32.xlu0 %v4782_v58  ;;  %v4793_v58 = vld [vmem:[#allocation18_spill] sm:$0xff] }
  0xca   :  { %v3162_v21 = vpop.xlane.xlu1 %463  ;;  %v3164_v55 = vpop.xlane.xlu0 %461 }
  0xcd   :  { %633 = vmax.xlane.f32.xlu1 %v632_v60  ;;  %630 = vmax.xlane.f32.xlu0 %v629_v13  ;;  %v4795_v13 = vld [vmem:[#allocation24_spill] sm:$0xff] }
  0xce   :  { %v3170_v1 = vpop.xlane.xlu1 %467  ;;  %v3172_v5 = vpop.xlane.xlu0 %465  ;;  %v734_v0 = vsel %vm94_vm0, %v4795_v13, -inf }
  0xd1   :  { %681 = vmax.xlane.f32.xlu1 %v680_v2  ;;  %678 = vmax.xlane.f32.xlu0 %v677_v54  ;;  %v4796_v2 = vld [vmem:[#allocation25_spill] sm:$0xff] }
  0xd2   :  { %v3178_v61 = vpop.xlane.xlu1 %471  ;;  %v3180_v8 = vpop.xlane.xlu0 %469  ;;  %v731_v46 = vsel %vm94_vm0, %v4796_v2, -inf }
  0xd5   :  { %729 = vmax.xlane.f32.xlu1 %v728_v44  ;;  %726 = vmax.xlane.f32.xlu0 %v725_v22  ;;  %v4797_v44 = vld [vmem:[#allocation33_spill] sm:$0xff]  ;;  %v4798_v22 = vld [vmem:[#allocation34_spill] sm:$0xff] }
  0xd6   :  { %v3186_v16 = vpop.xlane.xlu1 %475  ;;  %v3188_v40 = vpop.xlane.xlu0 %473  ;;  %v782_v15 = vsel %vm94_vm0, %v4797_v44, -inf  ;;  %v779_v7 = vsel %vm94_vm0, %v4798_v22, -inf }
  0xd9   :  { %777 = vmax.xlane.f32.xlu1 %v776_v4  ;;  %774 = vmax.xlane.f32.xlu0 %v773_v3  ;;  %v4799_v3 = vld [vmem:[#allocation9_spill] sm:$0xff] }
  0xda   :  { %v3194_v20 = vpop.xlane.xlu1 %479  ;;  %v3196_v30 = vpop.xlane.xlu0 %477  ;;  %v644_v11 = vsel %vm94_vm0, %v4799_v3, -inf }
  0xdd   :  { %539 = vadd.xlane.f32.xlu1 %v3018_v31  ;;  %537 = vadd.xlane.f32.xlu0 %v3022_v62  ;;  %v686_v31 = vsel %vm94_vm0, %v4793_v58, -inf  ;;  %v4794_v62 = vld [vmem:[#allocation17_spill] sm:$0xff] }
  0xde   :  { %v3200_v10 = vpop.xlane.xlu1 %483  ;;  %v3202_v41 = vpop.xlane.xlu0 %481  ;;  %v683_v56 = vsel %vm94_vm0, %v4794_v62, -inf }
  0xe1   :  { %639 = vmax.xlane.f32.xlu1 %v638_v49  ;;  %636 = vmax.xlane.f32.xlu0 %v635_v52  ;;  %v4800_v49 = vld [vmem:[#allocation10_spill] sm:$0xff] }
  0xe2   :  { %v3208_v47 = vpop.xlane.xlu1 %487  ;;  %v3210_v19 = vpop.xlane.xlu0 %485  ;;  %v641_v63 = vsel %vm94_vm0, %v4800_v49, -inf }
  0xe5   :  { %687 = vmax.xlane.f32.xlu1 %v686_v31  ;;  %684 = vmax.xlane.f32.xlu0 %v683_v56  ;;  %v4802_v31 = vld [vmem:[#allocation20_spill] sm:$0xff]  ;;  %v4803_v56 = vld [vmem:[#allocation19_spill] sm:$0xff] }
  0xe6   :  { %v3216_v60 = vpop.xlane.xlu1 %491  ;;  %v3218_v59 = vpop.xlane.xlu0 %489  ;;  %v692_v62 = vsel %vm94_vm0, %v4802_v31, -inf  ;;  %v689_v13 = vsel %vm94_vm0, %v4803_v56, -inf }
  0xe9   :  { %735 = vmax.xlane.f32.xlu1 %v734_v0  ;;  %732 = vmax.xlane.f32.xlu0 %v731_v46  ;;  %v4806_v46 = vld [vmem:[#allocation26_spill] sm:$0xff] }
  0xea   :  { %v3224_v54 = vpop.xlane.xlu1 %495  ;;  %v3226_v43 = vpop.xlane.xlu0 %493  ;;  %v740_v44 = vsel %vm94_vm0, %v4806_v46, -inf  ;;  %v4814_v46 = vld [vmem:[#allocation11_spill] sm:$0xff] }
  0xed   :  { %783 = vmax.xlane.f32.xlu1 %v782_v15  ;;  %780 = vmax.xlane.f32.xlu0 %v779_v7  ;;  %v4807_v15 = vld [vmem:[#allocation27_spill] sm:$0xff] }
  0xee   :  { %v3232_v4 = vpop.xlane.xlu1 %499  ;;  %v3234_v18 = vpop.xlane.xlu0 %497  ;;  %v737_v22 = vsel %vm94_vm0, %v4807_v15, -inf  ;;  %v4815_v15 = vld [vmem:[#allocation12_spill] sm:$0xff] }
  0xf1   :  { %645 = vmax.xlane.f32.xlu1 %v644_v11  ;;  %642 = vmax.xlane.f32.xlu0 %v641_v63  ;;  %v4810_v11 = vld [vmem:[#allocation35_spill] sm:$0xff]  ;;  %v4811_v63 = vld [vmem:[#allocation36_spill] sm:$0xff] }
  0xf2   :  { %v3240_v52 = vpop.xlane.xlu1 %503  ;;  %v3242_v58 = vpop.xlane.xlu0 %501  ;;  %v788_v49 = vsel %vm94_vm0, %v4810_v11, -inf  ;;  %v785_v31 = vsel %vm94_vm0, %v4811_v63, -inf }
  0xf3   :  { %4801 = vst [vmem:[#allocation30_spill] sm:$0xff] %v3242_v58 }
  0xf5   :  { %693 = vmax.xlane.f32.xlu1 %v692_v62  ;;  %690 = vmax.xlane.f32.xlu0 %v689_v13  ;;  %v861_v62 = vlaneseq }
  0xf6   :  { %v3248_v0 = vpop.xlane.xlu1 %507  ;;  %v3250_v2 = vpop.xlane.xlu0 %505 }
  0xf7   :  { %4804 = vst [vmem:[#allocation37_spill] sm:$0xff] %v3248_v0  ;;  %4805 = vst [vmem:[#allocation38_spill] sm:$0xff] %v3250_v2 }
  0xf9   :  { %741 = vmax.xlane.f32.xlu1 %v740_v44  ;;  %738 = vmax.xlane.f32.xlu0 %v737_v22  ;;  %v650_v44 = vsel %vm94_vm0, %v4814_v46, -inf  ;;  %v647_v22 = vsel %vm94_vm0, %v4815_v15, -inf  ;;  %v3282_v46 = vshrl.u32 %v861_v62, 7 }
  0xfa   :  { %v3256_v7 = vpop.xlane.xlu1 %511  ;;  %v3258_v3 = vpop.xlane.xlu0 %509 }
  0xfb   :  { %4808 = vst [vmem:[#allocation6_spill] sm:$0xff] %v3256_v7  ;;  %4809 = vst [vmem:[#allocation5_spill] sm:$0xff] %v3258_v3  ;;  %v3272_v3 = vand.u32 127, %v861_v62  ;;  %v4824_v7 = vld [vmem:[#allocation28_spill] sm:$0xff] }
  0xfc   :  { %4821 = vst [vmem:[#allocation32_spill] sm:$0xff] %v3282_v46 }
  0xfd   :  { %789 = vmax.xlane.f32.xlu1 %v788_v49  ;;  %786 = vmax.xlane.f32.xlu0 %v785_v31  ;;  %4816 = vst [vmem:[#allocation13_spill] sm:$0xff] %v3272_v3  ;;  %v4819_v49 = vld [vmem:[#allocation22_spill] sm:$0xff]  ;;  %v934_v15 = vadd.s32 4294967288, %v3272_v3 }
  0xfe   :  { %v3264_v56 = vpop.xlane.xlu1 %515  ;;  %v3266_v13 = vpop.xlane.xlu0 %513  ;;  %v698_v31 = vsel %vm94_vm0, %v4819_v49, -inf  ;;  %v541_v49 = vmul.f32 0.25, %v3074_v42 }
  0xff   :  { %4812 = vst [vmem:[#allocation16_spill] sm:$0xff] %v3264_v56  ;;  %4813 = vst [vmem:[#allocation15_spill] sm:$0xff] %v3266_v13  ;;  %v4820_v56 = vld [vmem:[#allocation21_spill] sm:$0xff]  ;;  %v3296_v62 = vsub.s32 %v934_v15, %v3282_v46 }
 0x100   :  { %v695_v13 = vsel %vm94_vm0, %v4820_v56, -inf  ;;  %v542_v56 = vmul.f32 0.25, %v3082_v23  ;;  %v543_v23 = vmul.f32 0.25, %v3072_v37 }
 0x101   :  { %651 = vmax.xlane.f32.xlu1 %v650_v44  ;;  %648 = vmax.xlane.f32.xlu0 %v647_v22 }
 0x102   :  { %v3274_v11 = vpop.xlane.xlu1 %519  ;;  %v3276_v63 = vpop.xlane.xlu0 %517 }
 0x103   :  { %4817 = vst [vmem:[#allocation14_spill] sm:$0xff] %v3274_v11  ;;  %4818 = vst [vmem:[#allocation31_spill] sm:$0xff] %v3276_v63  ;;  %v746_v11 = vsel %vm94_vm0, %v4824_v7, -inf  ;;  %v4825_v63 = vld [vmem:[#allocation29_spill] sm:$0xff]  ;;  %v794_v7 = vsel %vm94_vm0, %v3009_v34, -inf }
 0x104   :  { %v743_v2 = vsel %vm94_vm0, %v4825_v63, -inf  ;;  %v791_v63 = vsel %vm94_vm0, %v3014_v39, -inf  ;;  %v558_v39 = vmul.f32 0.25, %v3132_v38 }
 0x105   :  { %699 = vmax.xlane.f32.xlu1 %v698_v31  ;;  %696 = vmax.xlane.f32.xlu0 %v695_v13  ;;  %v3300_v13 = vsub.s32 %v3272_v3, %v3282_v46 }
 0x106   :  { %v3285_v44 = vpop.xlane.xlu1 %523  ;;  %v3287_v22 = vpop.xlane.xlu0 %521 }
 0x107   :  { %4822 = vst [vmem:[#allocation8_spill] sm:$0xff] %v3285_v44  ;;  %4823 = vst [vmem:[#allocation7_spill] sm:$0xff] %v3287_v22 }
 0x109   :  { %747 = vmax.xlane.f32.xlu1 %v746_v11  ;;  %744 = vmax.xlane.f32.xlu0 %v743_v2  ;;  %v544_v2 = vmul.f32 0.25, %v3080_v53 }
 0x10a   :  { %v610_v31 = vpop.xlane.xlu1 %609  ;;  %v607_v22 = vpop.xlane.xlu0 %606 }
 0x10b   :  { %v798_v42 = vadd.f32 %v610_v31, %v542_v56  ;;  %v797_v44 = vadd.f32 %v607_v22, %v541_v49  ;;  %v557_v22 = vmul.f32 0.25, %v3134_v26 }
 0x10d   :  { %v938_v11 = vrot.slane %v798_v42, %v3296_v62  ;;  %v933_v15 = vrot.slane %v797_v44, %v3300_v13  ;;  %795 = vmax.xlane.f32.xlu1 %v794_v7  ;;  %792 = vmax.xlane.f32.xlu0 %v791_v63 }
 0x10e   :  { %v616_v3 = vpop.xlane.xlu1 %615  ;;  %v613_v46 = vpop.xlane.xlu0 %612 }
 0x10f   :  { %v940_v34 = vsel %vm939_vm1, %v938_v11, %v933_v15  ;;  %v800_v0 = vadd.f32 %v616_v3, %v544_v2  ;;  %v799_v58 = vadd.f32 %v613_v46, %v543_v23  ;;  %v560_v3 = vmul.f32 0.25, %v3140_v48 }
 0x110   :  { %v559_v46 = vmul.f32 0.25, %v3142_v14 }
 0x111   :  { %v948_v37 = vrot.slane %v800_v0, %v3296_v62  ;;  %v944_v53 = vrot.slane %v799_v58, %v3300_v13 }
 0x112   :  { %v658_v49 = vpop.xlane.xlu1 %657  ;;  %v655_v56 = vpop.xlane.xlu0 %654 }
 0x113   :  { %v949_v44 = vsel %vm939_vm1, %v948_v37, %v944_v53  ;;  %v814_v31 = vadd.f32 %v658_v49, %v558_v39  ;;  %v813_v7 = vadd.f32 %v655_v56, %v557_v22 }
 0x114   :  { %v1220_v63 = vsel %vm242_vm2, %v949_v44, %v940_v34 }
 0x115   :  { %v1011_v38 = vrot.slane %v814_v31, %v3296_v62  ;;  %v1007_v26 = vrot.slane %v813_v7, %v3300_v13 }
 0x116   :  { %v664_v42 = vpop.xlane.xlu1 %663  ;;  %v661_v0 = vpop.xlane.xlu0 %660 }
 0x117   :  { %v1012_v58 = vsel %vm939_vm1, %v1011_v38, %v1007_v26  ;;  %v816_v23 = vadd.f32 %v664_v42, %v560_v3  ;;  %v815_v2 = vadd.f32 %v661_v0, %v559_v46  ;;  %v546_v3 = vmul.f32 0.25, %v3086_v12 }
 0x118   :  { %v545_v46 = vmul.f32 0.25, %v3088_v17 }
 0x119   :  { %v1020_v11 = vrot.slane %v816_v23, %v3296_v62  ;;  %v1016_v15 = vrot.slane %v815_v2, %v3300_v13  ;;  %v561_v23 = vmul.f32 0.25, %v3150_v27 }
 0x11a   :  { %v3324_v39 = vpop.xlane.xlu1 %705  ;;  %v3326_v34 = vpop.xlane.xlu0 %702 }
 0x11b   :  { %v1021_v48 = vsel %vm939_vm1, %v1020_v11, %v1016_v15 }
 0x11c   :  { %v1233_v14 = vsel %vm242_vm2, %v1021_v48, %v1012_v58  ;;  %v562_v58 = vmul.f32 0.25, %v3148_v33 }
 0x11e   :  { %v3330_v22 = vpop.xlane.xlu1 %711  ;;  %v3332_v37 = vpop.xlane.xlu0 %708 }
 0x122   :  { %v3334_v53 = vpop.xlane.xlu1 %753  ;;  %v3336_v49 = vpop.xlane.xlu0 %750 }
 0x126   :  { %v3338_v56 = vpop.xlane.xlu1 %759  ;;  %v3340_v44 = vpop.xlane.xlu0 %756 }
 0x12a   :  { %v3342_v31 = vpop.xlane.xlu1 %527  ;;  %v3344_v7 = vpop.xlane.xlu0 %525 }
 0x12b   :  { %4826 = vst [vmem:[#allocation18_spill] sm:$0xff] %v3342_v31  ;;  %4827 = vst [vmem:[#allocation17_spill] sm:$0xff] %v3344_v7 }
 0x12e   :  { %v622_v38 = vpop.xlane.xlu1 %621  ;;  %v619_v26 = vpop.xlane.xlu0 %618 }
 0x12f   :  { %v802_v42 = vadd.f32 %v622_v38, %v546_v3  ;;  %v801_v0 = vadd.f32 %v619_v26, %v545_v46 }
 0x131   :  { %v957_v2 = vrot.slane %v802_v42, %v3296_v62  ;;  %v953_v11 = vrot.slane %v801_v0, %v3300_v13 }
 0x132   :  { %v670_v15 = vpop.xlane.xlu1 %669  ;;  %v667_v48 = vpop.xlane.xlu0 %666 }
 0x133   :  { %v958_v7 = vsel %vm939_vm1, %v957_v2, %v953_v11  ;;  %v818_v12 = vadd.f32 %v670_v15, %v562_v58  ;;  %v817_v31 = vadd.f32 %v667_v48, %v561_v23  ;;  %v564_v48 = vmul.f32 0.25, %v3156_v45 }
 0x134   :  { %v1222_v17 = vsel %vm1221_vm3, %v958_v7, %v1220_v63  ;;  %v548_v63 = vmul.f32 0.25, %v3094_v24 }
 0x135   :  { %v1029_v3 = vrot.slane %v818_v12, %v3296_v62  ;;  %v1025_v46 = vrot.slane %v817_v31, %v3300_v13  ;;  %v547_v31 = vmul.f32 0.25, %v3096_v9 }
 0x136   :  { %v3356_v38 = vpop.xlane.xlu1 %717  ;;  %v3358_v33 = vpop.xlane.xlu0 %714 }
 0x137   :  { %v1030_v27 = vsel %vm939_vm1, %v1029_v3, %v1025_v46 }
 0x138   :  { %v1234_v26 = vsel %vm1221_vm3, %v1030_v27, %v1233_v14  ;;  %v563_v14 = vmul.f32 0.25, %v3158_v57 }
 0x13a   :  { %v3362_v42 = vpop.xlane.xlu1 %765  ;;  %v3364_v0 = vpop.xlane.xlu0 %762 }
 0x13e   :  { %v3366_v58 = vpop.xlane.xlu1 %531  ;;  %v3368_v23 = vpop.xlane.xlu0 %529 }
 0x13f   :  { %4828 = vst [vmem:[#allocation24_spill] sm:$0xff] %v3366_v58  ;;  %4829 = vst [vmem:[#allocation25_spill] sm:$0xff] %v3368_v23 }
 0x142   :  { %v628_v7 = vpop.xlane.xlu1 %627  ;;  %v625_v2 = vpop.xlane.xlu0 %624 }
 0x143   :  { %v804_v11 = vadd.f32 %v628_v7, %v548_v63  ;;  %v803_v15 = vadd.f32 %v625_v2, %v547_v31 }
 0x145   :  { %v966_v12 = vrot.slane %v804_v11, %v3296_v62  ;;  %v962_v3 = vrot.slane %v803_v15, %v3300_v13 }
 0x146   :  { %v676_v46 = vpop.xlane.xlu1 %675  ;;  %v673_v27 = vpop.xlane.xlu0 %672 }
 0x147   :  { %v967_v23 = vsel %vm939_vm1, %v966_v12, %v962_v3  ;;  %v820_v24 = vadd.f32 %v676_v46, %v564_v48  ;;  %v819_v58 = vadd.f32 %v673_v27, %v563_v14  ;;  %v566_v27 = vmul.f32 0.25, %v3162_v21 }
 0x148   :  { %v1224_v9 = vsel %vm1223_vm4, %v967_v23, %v1222_v17  ;;  %v550_v17 = vmul.f32 0.25, %v3102_v25 }
 0x149   :  { %v1038_v63 = vrot.slane %v820_v24, %v3296_v62  ;;  %v1034_v31 = vrot.slane %v819_v58, %v3300_v13  ;;  %v549_v58 = vmul.f32 0.25, %v3104_v6 }
 0x14a   :  { %v3380_v7 = vpop.xlane.xlu1 %723  ;;  %v3382_v45 = vpop.xlane.xlu0 %720 }
 0x14b   :  { %v1039_v57 = vsel %vm939_vm1, %v1038_v63, %v1034_v31 }
 0x14c   :  { %v1235_v2 = vsel %vm1223_vm4, %v1039_v57, %v1234_v26  ;;  %v565_v26 = vmul.f32 0.25, %v3164_v55 }
 0x14e   :  { %v3386_v11 = vpop.xlane.xlu1 %771  ;;  %v3388_v15 = vpop.xlane.xlu0 %768 }
 0x152   :  { %v3390_v48 = vpop.xlane.xlu1 %535  ;;  %v3392_v14 = vpop.xlane.xlu0 %533 }
 0x153   :  { %4830 = vst [vmem:[#allocation33_spill] sm:$0xff] %v3390_v48  ;;  %4831 = vst [vmem:[#allocation34_spill] sm:$0xff] %v3392_v14 }
 0x156   :  { %v634_v23 = vpop.xlane.xlu1 %633  ;;  %v631_v12 = vpop.xlane.xlu0 %630 }
 0x157   :  { %v806_v3 = vadd.f32 %v634_v23, %v550_v17  ;;  %v805_v46 = vadd.f32 %v631_v12, %v549_v58 }
 0x159   :  { %v975_v24 = vrot.slane %v806_v3, %v3296_v62  ;;  %v971_v63 = vrot.slane %v805_v46, %v3300_v13  ;;  %v4832_v3 = vld [vmem:[#allocation23_spill] sm:$0xff] }
 0x15a   :  { %v682_v31 = vpop.xlane.xlu1 %681  ;;  %v679_v57 = vpop.xlane.xlu0 %678  ;;  %v222_v46 = vrot.slane %v4832_v3, 4 }
 0x15b   :  { %v976_v14 = vsel %vm939_vm1, %v975_v24, %v971_v63  ;;  %v822_v25 = vadd.f32 %v682_v31, %v566_v27  ;;  %v821_v48 = vadd.f32 %v679_v57, %v565_v26  ;;  %v231_v24 = vrot.slane %v3030_v32, 4 }
 0x15c   :  { %v1226_v6 = vsel %vm1225_vm5, %v976_v14, %v1224_v9  ;;  %v223_v9 = vadd.f32 %v222_v46, %v4832_v3  ;;  %v552_v31 = vmul.f32 0.25, %v3110_v35  ;;  %v567_v3 = vmul.f32 0.25, %v3172_v5 }
 0x15d   :  { %v1047_v17 = vrot.slane %v822_v25, %v3296_v62  ;;  %v1043_v58 = vrot.slane %v821_v48, %v3300_v13  ;;  %v232_v48 = vadd.f32 %v231_v24, %v3030_v32  ;;  %v554_v35 = vmul.f32 0.25, %v3118_v29 }
 0x15e   :  { %v3404_v21 = vpop.xlane.xlu1 %729  ;;  %v3406_v55 = vpop.xlane.xlu0 %726  ;;  %v224_v57 = vrot.slane %v223_v9, 2  ;;  %v3445_v29 = vmul.f32 0.25, %v3180_v8  ;;  %v576_v8 = vmul.f32 0.25, %v3200_v10  ;;  %v3475_v10 = vmul.f32 0.25, %v3226_v43  ;;  %v4844_v43 = vld [vmem:[#allocation38_spill] sm:$0xff] }
 0x15f   :  { %v1048_v23 = vsel %vm939_vm1, %v1047_v17, %v1043_v58  ;;  %v233_v25 = vrot.slane %v232_v48, 2 }
 0x160   :  { %v1236_v12 = vsel %vm1225_vm5, %v1048_v23, %v1235_v2  ;;  %v551_v2 = vmul.f32 0.25, %v3112_v28  ;;  %v3428_v24 = vadd.f32 %v224_v57, %v223_v9  ;;  %v553_v28 = vmul.f32 0.25, %v3120_v50 }
 0x161   :  { %v3451_v9 = vmul.f32 0.25, %v3186_v16  ;;  %v578_v16 = vmul.f32 0.25, %v3208_v47  ;;  %v3484_v47 = vmul.f32 0.25, %v3234_v18 }
 0x162   :  { %v3412_v27 = vpop.xlane.xlu1 %777  ;;  %v3414_v26 = vpop.xlane.xlu0 %774  ;;  %4837 = vst [vmem:[#allocation26_spill] sm:$0xff] %v3428_v24 }
 0x163   :  { %4833 = vst [vmem:[#allocation9_spill] sm:$0xff] %v3412_v27  ;;  %4834 = vst [vmem:[#allocation10_spill] sm:$0xff] %v3414_v26  ;;  %v568_v26 = vmul.f32 0.25, %v3170_v1 }
 0x164   :  { %4839 = vst [vmem:[#allocation35_spill] sm:$0xff] %v3451_v9 }
 0x166   :  { %v3418_v14 = vpop.xlane.xlu1 %539  ;;  %v3420_v63 = vpop.xlane.xlu0 %537 }
 0x167   :  { %4835 = vst [vmem:[#allocation20_spill] sm:$0xff] %v3418_v14  ;;  %4836 = vst [vmem:[#allocation19_spill] sm:$0xff] %v3420_v63  ;;  %v3432_v63 = vadd.f32 %v233_v25, %v232_v48  ;;  %v574_v48 = vmul.f32 0.25, %v3194_v20  ;;  %v580_v25 = vmul.f32 0.25, %v3216_v60  ;;  %v579_v20 = vmul.f32 0.25, %v3218_v59  ;;  %v4841_v60 = vld [vmem:[#allocation30_spill] sm:$0xff] }
 0x168   :  { %v3490_v59 = vmul.f32 0.25, %v4841_v60  ;;  %v832_v60 = vadd.f32 %v3330_v22, %v576_v8 }
 0x169   :  { %4838 = vst [vmem:[#allocation27_spill] sm:$0xff] %v3432_v63 }
 0x16a   :  { %v640_v17 = vpop.xlane.xlu1 %639  ;;  %v637_v58 = vpop.xlane.xlu0 %636 }
 0x16b   :  { %v808_v23 = vadd.f32 %v640_v17, %v552_v31  ;;  %v807_v27 = vadd.f32 %v637_v58, %v551_v2  ;;  %v3435_v2 = vmul.f32 0.25, %v3124_v51  ;;  %v3439_v58 = vmul.f32 0.25, %v3126_v36 }
 0x16c   :  { %v3454_v51 = vmul.f32 0.25, %v3188_v40  ;;  %v577_v40 = vmul.f32 0.25, %v3210_v19  ;;  %v3487_v19 = vmul.f32 0.25, %v3240_v52 }
 0x16d   :  { %v984_v32 = vrot.slane %v808_v23, %v3296_v62  ;;  %v980_v46 = vrot.slane %v807_v27, %v3300_v13  ;;  %v3442_v27 = vmul.f32 0.25, %v3178_v61  ;;  %v573_v61 = vmul.f32 0.25, %v3196_v30 }
 0x16e   :  { %v688_v14 = vpop.xlane.xlu1 %687  ;;  %v685_v31 = vpop.xlane.xlu0 %684  ;;  %4840 = vst [vmem:[#allocation36_spill] sm:$0xff] %v3454_v51  ;;  %v3472_v30 = vmul.f32 0.25, %v3224_v54  ;;  %v4842_v54 = vld [vmem:[#allocation37_spill] sm:$0xff]  ;;  %v833_v22 = vadd.f32 %v3358_v33, %v577_v40 }
 0x16f   :  { %v985_v1 = vsel %vm939_vm1, %v984_v32, %v980_v46  ;;  %v824_v5 = vadd.f32 %v688_v14, %v568_v26  ;;  %v823_v17 = vadd.f32 %v685_v31, %v567_v3  ;;  %v575_v14 = vmul.f32 0.25, %v3202_v41 }
 0x170   :  { %v3448_v50 = vsel %vm1227_vm6, %v985_v1, %v1226_v6  ;;  %v3481_v3 = vmul.f32 0.25, %v3232_v4  ;;  %v3493_v32 = vmul.f32 0.25, %v4842_v54  ;;  %v3496_v46 = vmul.f32 0.25, %v4844_v43  ;;  %v4847_v1 = vld [vmem:[#allocation16_spill] sm:$0xff]  ;;  %v4850_v54 = vld [vmem:[#allocation14_spill] sm:$0xff] }
 0x171   :  { %v1056_v26 = vrot.slane %v824_v5, %v3296_v62  ;;  %v1052_v36 = vrot.slane %v823_v17, %v3300_v13  ;;  %v592_v4 = vmul.f32 0.25, %v4847_v1  ;;  %v4848_v17 = vld [vmem:[#allocation5_spill] sm:$0xff]  ;;  %v594_v63 = vmul.f32 0.25, %v4850_v54  ;;  %v4851_v1 = vld [vmem:[#allocation31_spill] sm:$0xff] }
 0x172   :  { %v3462_v6 = vpop.xlane.xlu1 %735  ;;  %v3464_v57 = vpop.xlane.xlu0 %732  ;;  %4843 = vst [vmem:[#allocation11_spill] sm:$0xff] %v3493_v32  ;;  %4845 = vst [vmem:[#allocation12_spill] sm:$0xff] %v3496_v46  ;;  %v589_v52 = vmul.f32 0.25, %v4848_v17  ;;  %v831_v43 = vadd.f32 %v3332_v37, %v575_v14  ;;  %v593_v24 = vmul.f32 0.25, %v4851_v1  ;;  %v4852_v46 = vld [vmem:[#allocation8_spill] sm:$0xff]  ;;  %v834_v17 = vadd.f32 %v3356_v38, %v578_v16 }
 0x173   :  { %v1057_v23 = vsel %vm939_vm1, %v1056_v26, %v1052_v36  ;;  %v4849_v26 = vld [vmem:[#allocation15_spill] sm:$0xff]  ;;  %v596_v32 = vmul.f32 0.25, %v4852_v46  ;;  %v4854_v37 = vld [vmem:[#allocation32_spill] sm:$0xff] }
 0x174   :  { %v3478_v41 = vsel %vm1227_vm6, %v1057_v23, %v1236_v12  ;;  %v4846_v12 = vld [vmem:[#allocation6_spill] sm:$0xff]  ;;  %v591_v36 = vmul.f32 0.25, %v4849_v26  ;;  %v830_v23 = vadd.f32 %v3324_v39, %v574_v48  ;;  %v4853_v26 = vld [vmem:[#allocation7_spill] sm:$0xff]  ;;  %v829_v39 = vadd.f32 %v3326_v34, %v573_v61 }
 0x175   :  { %v590_v31 = vmul.f32 0.25, %v4846_v12  ;;  %v848_v12 = vadd.f32 %v3338_v56, %v592_v4  ;;  %v595_v9 = vmul.f32 0.25, %v4853_v26  ;;  %v863_v14 = vadd.s32 8, %v4854_v37 }
 0x176   :  { %v3500_v5 = vpop.xlane.xlu1 %783  ;;  %v3502_v18 = vpop.xlane.xlu0 %780  ;;  %v847_v51 = vadd.f32 %v3340_v44, %v591_v36  ;;  %v1083_v56 = vrot.slane %v830_v23, %v3296_v62  ;;  %v1092_v4 = vrot.slane %v832_v60, %v3296_v62  ;;  %v1088_v44 = vrot.slane %v831_v43, %v3300_v13 }
 0x177   :  { %v846_v38 = vadd.f32 %v3334_v53, %v590_v31  ;;  %v845_v16 = vadd.f32 %v3336_v49, %v589_v52  ;;  %v1164_v34 = vrot.slane %v848_v12, %v3296_v62  ;;  %v1101_v61 = vrot.slane %v834_v17, %v3296_v62 }
 0x178   :  { %v1160_v33 = vrot.slane %v847_v51, %v3300_v13  ;;  %v1097_v23 = vrot.slane %v833_v22, %v3300_v13  ;;  %v836_v53 = vadd.f32 %v3380_v7, %v580_v25  ;;  %v835_v52 = vadd.f32 %v3382_v45, %v579_v20 }
 0x179   :  { %v1079_v12 = vrot.slane %v829_v39, %v3300_v13  ;;  %v1093_v1 = vsel %vm939_vm1, %v1092_v4, %v1088_v44  ;;  %v1151_v7 = vrot.slane %v845_v16, %v3300_v13  ;;  %v852_v39 = vadd.f32 %v3386_v11, %v596_v32 }
 0x17a   :  { %v646_v48 = vpop.xlane.xlu1 %645  ;;  %v643_v8 = vpop.xlane.xlu0 %642  ;;  %v1165_v45 = vsel %vm939_vm1, %v1164_v34, %v1160_v33  ;;  %v1110_v20 = vrot.slane %v836_v53, %v3296_v62  ;;  %v851_v22 = vadd.f32 %v3388_v15, %v595_v9  ;;  %v838_v4 = vadd.f32 %v3404_v21, %v3472_v30  ;;  %v4855_v21 = vld [vmem:[#allocation18_spill] sm:$0xff]  ;;  %v4859_v53 = vld [vmem:[#allocation24_spill] sm:$0xff] }
 0x17b   :  { %v810_v54 = vadd.f32 %v646_v48, %v554_v35  ;;  %v809_v46 = vadd.f32 %v643_v8, %v553_v28  ;;  %v850_v35 = vadd.f32 %v3362_v42, %v594_v63  ;;  %v849_v28 = vadd.f32 %v3364_v0, %v593_v24 }
 0x17c   :  { %v1155_v42 = vrot.slane %v846_v38, %v3296_v62  ;;  %v1084_v8 = vsel %vm939_vm1, %v1083_v56, %v1079_v12  ;;  %v3568_v15 = vadd.s32 4294967295, %v4854_v37  ;;  %v3570_v9 = vadd.s32 1, %v863_v14  ;;  %v4856_v56 = vld [vmem:[#allocation17_spill] sm:$0xff] }
 0x17d   :  { %v993_v40 = vrot.slane %v810_v54, %v3296_v62  ;;  %v989_v36 = vrot.slane %v809_v46, %v3300_v13  ;;  %v1169_v25 = vrot.slane %v849_v28, %v3300_v13  ;;  %v837_v54 = vadd.f32 %v3406_v55, %v3475_v10 }
 0x17e   :  { %v694_v31 = vpop.xlane.xlu1 %693  ;;  %v691_v49 = vpop.xlane.xlu0 %690  ;;  %v1240_v44 = vsel %vm242_vm2, %v1093_v1, %v1084_v8  ;;  %v1156_v11 = vsel %vm939_vm1, %v1155_v42, %v1151_v7  ;;  %v598_v30 = vmul.f32 0.25, %v4855_v21  ;;  %v597_v55 = vmul.f32 0.25, %v4856_v56  ;;  %v4865_v56 = vld [vmem:[#allocation20_spill] sm:$0xff] }
 0x17f   :  { %v994_v51 = vsel %vm939_vm1, %v993_v40, %v989_v36  ;;  %v826_v60 = vadd.f32 %v694_v31, %v3442_v27  ;;  %v825_v43 = vadd.f32 %v691_v49, %v3445_v29  ;;  %v1102_v27 = vsel %vm939_vm1, %v1101_v61, %v1097_v23  ;;  %v4857_v36 = vld [vmem:[#allocation9_spill] sm:$0xff] }
 0x180   :  { %v3542_v0 = vsel %vm1229_vm7, %v994_v51, %v3448_v50  ;;  %v1173_v29 = vrot.slane %v850_v35, %v3296_v62  ;;  %v1106_v50 = vrot.slane %v835_v52, %v3300_v13  ;;  %v1247_v32 = vsel %vm242_vm2, %v1165_v45, %v1156_v11  ;;  %v4858_v35 = vld [vmem:[#allocation10_spill] sm:$0xff]  ;;  %v4860_v49 = vld [vmem:[#allocation25_spill] sm:$0xff]  ;;  %v4864_v11 = vld [vmem:[#allocation36_spill] sm:$0xff] }
 0x181   :  { %v1065_v63 = vrot.slane %v826_v60, %v3296_v62  ;;  %v1061_v24 = vrot.slane %v825_v43, %v3300_v13  ;;  %v1241_v10 = vsel %vm1221_vm3, %v1102_v27, %v1240_v44  ;;  %v1182_v33 = vrot.slane %v852_v39, %v3296_v62 }
 0x182   :  { %v742_v17 = vpop.xlane.xlu1 %741  ;;  %v739_v26 = vpop.xlane.xlu0 %738  ;;  %v1174_v16 = vsel %vm939_vm1, %v1173_v29, %v1169_v25  ;;  %v1111_v34 = vsel %vm939_vm1, %v1110_v20, %v1106_v50  ;;  %v1178_v61 = vrot.slane %v851_v22, %v3300_v13  ;;  %v1119_v14 = vrot.slane %v838_v4, %v3296_v62 }
 0x183   :  { %v1066_v48 = vsel %vm939_vm1, %v1065_v63, %v1061_v24  ;;  %v1115_v40 = vrot.slane %v837_v54, %v3300_v13  ;;  %v854_v23 = vadd.f32 %v4857_v36, %v598_v30  ;;  %v853_v28 = vadd.f32 %v4858_v35, %v597_v55  ;;  %v4861_v24 = vld [vmem:[#allocation33_spill] sm:$0xff]  ;;  %v4863_v54 = vld [vmem:[#allocation35_spill] sm:$0xff] }
 0x184   :  { %v3563_v46 = vsel %vm1229_vm7, %v1066_v48, %v3478_v41  ;;  %v600_v31 = vmul.f32 0.25, %v4859_v53  ;;  %v599_v52 = vmul.f32 0.25, %v4860_v49  ;;  %v840_v51 = vadd.f32 %v3462_v6, %v3481_v3 }
 0x185   :  { %v839_v60 = vadd.f32 %v3464_v57, %v3484_v47  ;;  %v3591_v43 = vsel %vm1221_vm3, %v1174_v16, %v1247_v32  ;;  %v1242_v12 = vsel %vm1223_vm4, %v1111_v34, %v1241_v10  ;;  %v842_v1 = vadd.f32 %v742_v17, %v3487_v19  ;;  %v4862_v57 = vld [vmem:[#allocation34_spill] sm:$0xff]  ;;  %v4866_v10 = vld [vmem:[#allocation19_spill] sm:$0xff] }
 0x186   :  { %v790_v41 = vpop.xlane.xlu1 %789  ;;  %v787_v38 = vpop.xlane.xlu0 %786  ;;  %v841_v42 = vadd.f32 %v739_v26, %v3490_v59  ;;  %v1183_v63 = vsel %vm939_vm1, %v1182_v33, %v1178_v61  ;;  %v602_v27 = vmul.f32 0.25, %v4861_v24  ;;  %v601_v47 = vmul.f32 0.25, %v4862_v57 }
 0x187   :  { %v1120_v29 = vsel %vm939_vm1, %v1119_v14, %v1115_v40  ;;  %v1191_v25 = vrot.slane %v854_v23, %v3296_v62  ;;  %v1187_v19 = vrot.slane %v853_v28, %v3300_v13  ;;  %vm1262_vm9 = vcmp.lt.s32.totalorder %v4854_v37, 1  ;;  %v4867_v23 = vld [vmem:[#allocation11_spill] sm:$0xff]  ;;  %v4868_v28 = vld [vmem:[#allocation12_spill] sm:$0xff] }
 0x188   :  { %v1128_v59 = vrot.slane %v840_v51, %v3296_v62  ;;  %v1124_v20 = vrot.slane %v839_v60, %v3300_v13  ;;  %v855_v26 = vadd.f32 %v3502_v18, %v599_v52  ;;  %v1137_v50 = vrot.slane %v842_v1, %v3296_v62 }
 0x189   :  { %v1133_v39 = vrot.slane %v841_v42, %v3300_v13  ;;  %v1243_v8 = vsel %vm1225_vm5, %v1120_v29, %v1242_v12  ;;  %v1192_v21 = vsel %vm939_vm1, %v1191_v25, %v1187_v19  ;;  %v858_v30 = vadd.f32 %v790_v41, %v602_v27  ;;  %v4870_v12 = vld [vmem:[#allocation27_spill] sm:$0xff] }
 0x18a   :  { %v652_v7 = vpop.xlane.xlu1 %651  ;;  %v649_v45 = vpop.xlane.xlu0 %648  ;;  %v604_v55 = vmul.f32 0.25, %v4865_v56  ;;  %v603_v16 = vmul.f32 0.25, %v4866_v10  ;;  %v1129_v61 = vsel %vm939_vm1, %v1128_v59, %v1124_v20  ;;  %v1196_v40 = vrot.slane %v855_v26, %v3300_v13 }
 0x18b   :  { %v812_v6 = vadd.f32 %v652_v7, %v3435_v2  ;;  %v811_v3 = vadd.f32 %v649_v45, %v3439_v58  ;;  %v856_v58 = vadd.f32 %v3500_v5, %v600_v31  ;;  %v857_v5 = vadd.f32 %v787_v38, %v601_v47  ;;  %v4869_v31 = vld [vmem:[#allocation26_spill] sm:$0xff] }
 0x18c   :  { %v1138_v41 = vsel %vm939_vm1, %v1137_v50, %v1133_v39  ;;  %v226_v49 = vrot.slane %v4869_v31, 1  ;;  %vm1294_vm10 = vcmp.ge.s32.totalorder %v3568_v15, 0  ;;  %v1209_v52 = vrot.slane %v858_v30, %v3296_v62  ;;  %v239_v39 = vld [vmem:[%s4702_s1] sm:$0xf] }
 0x18d   :  { %v1002_v17 = vrot.slane %v812_v6, %v3296_v62  ;;  %v998_v2 = vrot.slane %v811_v3, %v3300_v13  ;;  %v1200_v14 = vrot.slane %v856_v58, %v3296_v62  ;;  %v1205_v51 = vrot.slane %v857_v5, %v3300_v13 }
 0x18e   :  { %v700_v22 = vpop.xlane.xlu1 %699  ;;  %v697_v48 = vpop.xlane.xlu0 %696  ;;  %v235_v1 = vrot.slane %v4870_v12, 1  ;;  %v1244_v27 = vsel %vm1227_vm6, %v1129_v61, %v1243_v8  ;;  %v227_v47 = vadd.f32 %v226_v49, %v4869_v31  ;;  %v1249_v20 = vsel %vm1223_vm4, %v1183_v63, %v3591_v43 }
 0x18f   :  { %v1003_v4 = vsel %vm939_vm1, %v1002_v17, %v998_v2  ;;  %v828_v44 = vadd.f32 %v700_v22, %v4863_v54  ;;  %v827_v32 = vadd.f32 %v697_v48, %v4864_v11  ;;  %v1201_v6 = vsel %vm939_vm1, %v1200_v14, %v1196_v40  ;;  %v4871_v11 = vld [vmem:[#allocation13_spill] sm:$0xff] }
 0x190   :  { %v3620_v18 = vsel %vm1231_vm8, %v1003_v4, %v3542_v0  ;;  %v1245_v17 = vsel %vm1229_vm7, %v1138_v41, %v1244_v27  ;;  %v1210_v2 = vsel %vm939_vm1, %v1209_v52, %v1205_v51  ;;  %v1250_v26 = vsel %vm1225_vm5, %v1192_v21, %v1249_v20 }
 0x191   :  { %v1074_v34 = vrot.slane %v828_v44, %v3296_v62  ;;  %v1070_v33 = vrot.slane %v827_v32, %v3300_v13  ;;  %v1258_v45 = vrot.slane %v3620_v18, 7  ;;  %v1251_v22 = vsel %vm1227_vm6, %v1201_v6, %v1250_v26 }
 0x192   :  { %v748_v38 = vpop.xlane.xlu1 %747  ;;  %v745_v36 = vpop.xlane.xlu0 %744  ;;  %v1252_v48 = vsel %vm1229_vm7, %v1210_v2, %v1251_v22  ;;  %v237_v8 = vmul.f32 0.00390625, %v227_v47  ;;  %vm1340_vm13 = vcmp.lt.s32.totalorder %v4871_v11, 16  ;;  %vm1540_vm14 = vcmp.lt.s32.totalorder %v3570_v9, 16  ;;  %v333_v22 = vld [vmem:[%s4703_s2 + $0x60] sm:$0xff] }
 0x193   :  { %v1075_v0 = vsel %vm939_vm1, %v1074_v34, %v1070_v33  ;;  %v844_v35 = vadd.f32 %v748_v38, %v4867_v23  ;;  %v843_v53 = vadd.f32 %v745_v36, %v4868_v28  ;;  %vm1506_vm15 = vcmp.lt.s32.totalorder %v4854_v37, 7 }
 0x194   :  { %v3639_v60 = vsel %vm1231_vm8, %v1075_v0, %v3563_v46  ;;  %v236_v46 = vadd.f32 %v235_v1, %v4870_v12  ;;  %v3731_v33 = vstv %s3665_s14  ;;  %v1502_v40 = vrot.slane %v3620_v18, 1 }
 0x195   :  { %v1146_v42 = vrot.slane %v844_v35, %v3296_v62  ;;  %v1142_v7 = vrot.slane %v843_v53, %v3300_v13  ;;  %v1260_v24 = vrot.slane %v3639_v60, 7  ;;  %v1504_v10 = vrot.slane %v3639_v60, 1 }
 0x196   :  { %v796_v3 = vpop.xlane.xlu1 %795  ;;  %v793_v57 = vpop.xlane.xlu0 %792  ;;  %v238_v4 = vmul.f32 0.00390625, %v236_v46  ;;  %v3744_v38 = vstv %s3678_s17  ;;  %vm1267_vm3 = vcmask 1047680  }
 0x197   :  { %v1147_v29 = vsel %vm939_vm1, %v1146_v42, %v1142_v7  ;;  %v860_v25 = vadd.f32 %v796_v3, %v604_v55  ;;  %v859_v19 = vadd.f32 %v793_v57, %v603_v16  ;;  %v3653_v59 = vsel %vm1262_vm9, %v1260_v24, %v1258_v45 }
 0x198   :  { %1268 = vrot.lane.b32.xlu0 %v3653_v59, %s2418_s13  ;;  %v3663_v58 = vsel %vm1262_vm9, %v1258_v45, %v1260_v24  ;;  %v3673_v63 = vsel %vm1231_vm8, %v1147_v29, %v1245_v17  ;;  %v243_v5 = vsel %vm242_vm2, %v238_v4, %v237_v8  ;;  %vm3722_vm2 = vmand %vm1540_vm14, %vm1340_vm13  ;;  %v3751_v0 = vsel %vm1506_vm15, %v1502_v40, %v1504_v10  ;;  %v330_v8 = vld [vmem:[%s4703_s2 + $0x48] sm:$0xff]  ;;  %v329_v4 = vld [vmem:[%s4703_s2 + $0x40] sm:$0xff] }
 0x199   :  { %v1218_v50 = vrot.slane %v860_v25, %v3296_v62  ;;  %v1214_v43 = vrot.slane %v859_v19, %v3300_v13  ;;  %1271 = vrot.lane.b32.xlu1 %v3663_v58, %s2418_s13  ;;  %v2419_v13 = vmov 0.0   ;;  %v1259_v44 = vrot.slane %v3673_v63, 7 }
 0x19a   :  { %2272 = vmatprep.subr.mxu0 %v2419_v13  ;;  %2274 = vmatprep.mubr.msk.f32.mxu0 %vm2420_vm12, %v2419_v13  ;;  %v1503_v21 = vrot.slane %v3673_v63, 1  ;;  %v3773_v28 = vsel %vm1506_vm15, %v1504_v10, %v1502_v40  ;;  %v323_v10 = vld [vmem:[%s4703_s2 + $0x10] sm:$0xff] }
 0x19b   :  { %v1219_v62 = vsel %vm939_vm1, %v1218_v50, %v1214_v43  ;;  %2273 = vmatpush3.msk.msra.mxu0 %vm246_vm11, %v239_v39  ;;  %2277 = vmatprep.subr.mxu1 %v2419_v13  ;;  %vm3705_vm1 = vmand %vm1294_vm10, %vm1340_vm13  ;;  %v336_v50 = vld [vmem:[%s4703_s2 + $0x78] sm:$0xff]  ;;  %v335_v43 = vld [vmem:[%s4703_s2 + $0x70] sm:$0xff] }
 0x19c   :  { %v3686_v54 = vsel %vm1231_vm8, %v1219_v62, %v1252_v48  ;;  %1390 = vrot.lane.b32.xlu0 %v3620_v18, %s2418_s13  ;;  %2309 = vmatprep.mubr.msk.f32.mxu1 %vm2420_vm12, %v2419_v13  ;;  %v334_v39 = vld [vmem:[%s4703_s2 + $0x68] sm:$0xff]  ;;  %v332_v48 = vld [vmem:[%s4703_s2 + $0x58] sm:$0xff]  ;;  %v331_v62 = vld [vmem:[%s4703_s2 + $0x50] sm:$0xff] }
 0x19d   :  { %v1261_v32 = vrot.slane %v3686_v54, 7  ;;  %v1505_v30 = vrot.slane %v3686_v54, 1  ;;  %2275 = vmatmul.mubr.msk.f32.vlgmr.msra.gmra.mxu0 %vm94_vm0, %v243_v5  ;;  %2278 = vmatpush3.msra.mxu1 %v336_v50  ;;  %v324_v5 = vld [vmem:[%s4703_s2 + $0x18] sm:$0xff]  ;;  %v3927_v50 = vadd.s32 4294967295, %v4871_v11 }
 0x19e   :  { %2279 = vmatprep.subr.mxu1 %v2419_v13 }
 0x19f   :  { %v3711_v55 = vsel %vm1262_vm9, %v1261_v32, %v1259_v44  ;;  %v3716_v16 = vsel %vm1506_vm15, %v1505_v30, %v1503_v21  ;;  %v3755_v23 = vsel %vm1262_vm9, %v1259_v44, %v1261_v32  ;;  %v3763_v35 = vsel %vm1506_vm15, %v1503_v21, %v1505_v30  ;;  %2280 = vmatpush3.msra.mxu1 %v335_v43  ;;  %v328_v44 = vld [vmem:[%s4703_s2 + $0x38] sm:$0xff]  ;;  %v327_v32 = vld [vmem:[%s4703_s2 + $0x30] sm:$0xff]  ;;  %v326_v21 = vld [vmem:[%s4703_s2 + $0x28] sm:$0xff] }
 0x1a0   :  { %1396 = vrot.lane.b32.xlu0 %v3673_v63, %s2418_s13  ;;  %1274 = vrot.lane.b32.xlu1 %v3711_v55, %s2418_s13  ;;  %v1346_v61 = vsel %vm3705_vm1, %v3711_v55, 0.0  ;;  %v1585_v14 = vsel %vm3722_vm2, %v3716_v16, 0.0  ;;  %v325_v30 = vld [vmem:[%s4703_s2 + $0x20] sm:$0xff]  ;;  %vm1301_vm4 = vcmp.ge.s32.totalorder %v3927_v50, 0  ;;  %vm1304_vm5 = vcmp.lt.s32.totalorder %v3927_v50, 16 }
 0x1a1   :  { %v3741_v41 = vmul.f32 %v3731_v33, %v1346_v61  ;;  %v3747_v36 = vmul.f32 %v3744_v38, %v1585_v14  ;;  %2281 = vmatprep.subr.mxu1 %v2419_v13  ;;  %v322_v61 = vld [vmem:[%s4703_s2 + $0x8] sm:$0xff]  ;;  %v321_v14 = vld [vmem:[%s4703_s2] sm:$0xff]  ;;  %s2422_s2 = smov 127   ;;  %vm3935_vm6 = vmand %vm1301_vm4, %vm1304_vm5 }
 0x1a2   :  { %2282 = vmatpush3.msra.mxu1 %v334_v39  ;;  %vm1302_vm8 = vmand %vm1294_vm10, %vm1301_vm4 }
 0x1a3   :  { %2283 = vmatprep.subr.mxu1 %v2419_v13  ;;  %vm1305_vm9 = vmand %vm1302_vm8, %vm1304_vm5 }
 0x1a4   :  { %1511 = vrot.lane.b32.xlu0 %v3751_v0, %s2418_s13  ;;  %1277 = vrot.lane.b32.xlu1 %v3755_v23, %s2418_s13 }
 0x1a5   :  { %2284 = vmatpush3.msra.mxu1 %v333_v22 }
 0x1a6   :  { %2285 = vmatprep.subr.mxu1 %v2419_v13 }
 0x1a7   :  { %2286 = vmatpush3.msra.mxu1 %v332_v48  ;;  %v3941_v48 = vstv %s2242_s3 }
 0x1a8   :  { %1517 = vrot.lane.b32.xlu0 %v3763_v35, %s2418_s13  ;;  %1393 = vrot.lane.b32.xlu1 %v3639_v60, %s2418_s13 }
 0x1a9   :  { %2287 = vmatprep.subr.mxu1 %v2419_v13 }
 0x1aa   :  { %2288 = vmatpush3.msra.mxu1 %v331_v62 }
 0x1ab   :  { %2289 = vmatprep.subr.mxu1 %v2419_v13 }
 0x1ac   :  { %1399 = vrot.lane.b32.xlu1 %v3686_v54, %s2418_s13  ;;  %2290 = vmatpush3.msra.mxu1 %v330_v8 }
 0x1ad   :  { %2291 = vmatprep.subr.mxu1 %v2419_v13 }
 0x1ae   :  { %2292 = vmatpush3.msra.mxu1 %v329_v4 }
 0x1af   :  { %2293 = vmatprep.subr.mxu1 %v2419_v13 }
 0x1b0   :  { %1514 = vrot.lane.b32.xlu1 %v3773_v28, %s2418_s13  ;;  %2294 = vmatpush3.msra.mxu1 %v328_v44  ;;  %v3949_v44 = vadd.s32 1, %v4871_v11 }
 0x1b1   :  { %2295 = vmatprep.subr.mxu1 %v2419_v13 }
 0x1b2   :  { %2296 = vmatpush3.msra.mxu1 %v327_v32  ;;  %vm1361_vm7 = vcmp.lt.s32.totalorder %v3949_v44, 16 }
 0x1b3   :  { %2297 = vmatprep.subr.mxu1 %v2419_v13  ;;  %vm3984_vm11 = vmand %vm1294_vm10, %vm1361_vm7 }
 0x1b4   :  { %1520 = vrot.lane.b32.xlu1 %v3716_v16, %s2418_s13  ;;  %2298 = vmatpush3.msra.mxu1 %v326_v21  ;;  %vm1544_vm10 = vmand %vm1540_vm14, %vm1301_vm4 }
 0x1b5   :  { %2299 = vmatprep.subr.mxu1 %v2419_v13  ;;  %vm4063_vm12 = vmand %vm1544_vm10, %vm1304_vm5 }
 0x1b6   :  { %2300 = vmatpush3.msra.mxu1 %v325_v30  ;;  %vm4088_vm15 = vmand %vm1540_vm14, %vm1361_vm7 }
 0x1b7   :  { %2301 = vmatprep.subr.mxu1 %v2419_v13 }
 0x1b8   :  { %2302 = vmatpush3.msra.mxu1 %v324_v5 }
 0x1b9   :  { %2303 = vmatprep.subr.mxu1 %v2419_v13 }
 0x1ba   :  { %2304 = vmatpush3.msra.mxu1 %v323_v10 }
 0x1bb   :  { %2305 = vmatprep.subr.mxu1 %v2419_v13 }
 0x1bc   :  { %2306 = vmatpush3.msra.mxu1 %v322_v61  ;;  %v3959_v61 = vstv %s2244_s22 }
 0x1bd   :  { %2307 = vmatprep.subr.mxu1 %v2419_v13 }
 0x1be   :  { %2308 = vmatpush3.msra.mxu1 %v321_v14 }
 0x20a   :  { %v1269_v53 = vpop.permute.xlu0 %1268 }
 0x20b   :  { %v1272_v31 = vpop.permute.xlu1 %1271  ;;  %v1270_v49 = vsel %vm1267_vm3, %v1269_v53, %v3653_v59 }
 0x20c   :  { %v1273_v52 = vsel %vm1267_vm3, %v1272_v31, %v3663_v58  ;;  %1280 = vrot.lane.b32.xlu0 %v1270_v49, %s2418_s13 }
 0x20d   :  { %1282 = vrot.lane.b32.xlu1 %v1273_v52, %s2418_s13 }
 0x20e   :  { %v1391_v51 = vpop.permute.xlu0 %1390 }
 0x20f   :  { %v1392_v45 = vsel %vm1267_vm3, %v1391_v51, %v3620_v18 }
 0x212   :  { %v1275_v12 = vpop.permute.xlu1 %1274  ;;  %v1397_v42 = vpop.permute.xlu0 %1396 }
 0x213   :  { %v1276_v1 = vsel %vm1267_vm3, %v1275_v12, %v3711_v55  ;;  %v1398_v3 = vsel %vm1267_vm3, %v1397_v42, %v3673_v63 }
 0x214   :  { %1284 = vrot.lane.b32.xlu0 %v1276_v1, %s2418_s13 }
 0x216   :  { %v1278_v7 = vpop.permute.xlu1 %1277  ;;  %v1512_v27 = vpop.permute.xlu0 %1511 }
 0x217   :  { %v1279_v24 = vsel %vm1267_vm3, %v1278_v7, %v3755_v23  ;;  %v1513_v46 = vsel %vm1267_vm3, %v1512_v27, %v3751_v0 }
 0x218   :  { %1286 = vrot.lane.b32.xlu1 %v1279_v24, %s2418_s13  ;;  %1402 = vrot.lane.b32.xlu0 %v1392_v45, %s2418_s13 }
 0x21a   :  { %v1394_v6 = vpop.permute.xlu1 %1393  ;;  %v1518_v25 = vpop.permute.xlu0 %1517 }
 0x21b   :  { %v1395_v57 = vsel %vm1267_vm3, %v1394_v6, %v3639_v60  ;;  %v1519_v20 = vsel %vm1267_vm3, %v1518_v25, %v3763_v35 }
 0x21c   :  { %1404 = vrot.lane.b32.xlu1 %v1395_v57, %s2418_s13  ;;  %1406 = vrot.lane.b32.xlu0 %v1398_v3, %s2418_s13 }
 0x21e   :  { %v1400_v47 = vpop.permute.xlu1 %1399 }
 0x21f   :  { %v1401_v29 = vsel %vm1267_vm3, %v1400_v47, %v3686_v54 }
 0x220   :  { %1408 = vrot.lane.b32.xlu1 %v1401_v29, %s2418_s13  ;;  %1523 = vrot.lane.b32.xlu0 %v1513_v46, %s2418_s13 }
 0x222   :  { %v1515_v19 = vpop.permute.xlu1 %1514 }
 0x223   :  { %v1516_v17 = vsel %vm1267_vm3, %v1515_v19, %v3773_v28 }
 0x224   :  { %1525 = vrot.lane.b32.xlu1 %v1516_v17, %s2418_s13  ;;  %1527 = vrot.lane.b32.xlu0 %v1519_v20, %s2418_s13 }
 0x226   :  { %v1521_v2 = vpop.permute.xlu1 %1520 }
 0x227   :  { %v1522_v26 = vsel %vm1267_vm3, %v1521_v2, %v3716_v16 }
 0x228   :  { %1529 = vrot.lane.b32.xlu1 %v1522_v26, %s2418_s13 }
 0x25d   :  { %v316_v40 = vpop.f32.mrf.mxu0 }
 0x25e   :  { %v320_v53 = vmax.f32 %v316_v40, 0.0 }
 0x25f   :  { %v2276_v31 = vpop.f32.mrf.mxu0 }
 0x260   :  { %2310 = vmatmul.mubr.f32.vlgmr.msra.gmra.mxu1 %v320_v53 }
 0x27e   :  { %v1281_v49 = vpop.permute.xlu0 %1280 }
 0x27f   :  { %v1283_v52 = vpop.permute.xlu1 %1282  ;;  %v1288_v3 = vsel %vm1267_vm3, %v1281_v49, %v3653_v59 }
 0x280   :  { %v1289_v57 = vsel %vm1267_vm3, %v1283_v52, %v3663_v58 }
 0x286   :  { %v1285_v51 = vpop.permute.xlu0 %1284 }
 0x287   :  { %v1290_v47 = vsel %vm1267_vm3, %v1285_v51, %v3711_v55  ;;  %v1328_v51 = vstv %s1307_s23 }
 0x28a   :  { %v1287_v12 = vpop.permute.xlu1 %1286  ;;  %v1403_v1 = vpop.permute.xlu0 %1402 }
 0x28b   :  { %v1410_v42 = vsel %vm1267_vm3, %v1403_v1, %v3620_v18  ;;  %v1291_v46 = vsel %vm1267_vm3, %v1287_v12, %v3755_v23 }
 0x28c   :  { %1429 = vrot.lane.b32.xlu0 %v1410_v42, %s2421_s21 }
 0x28e   :  { %v1405_v7 = vpop.permute.xlu1 %1404  ;;  %v1407_v45 = vpop.permute.xlu0 %1406 }
 0x28f   :  { %v1411_v13 = vsel %vm1267_vm3, %v1405_v7, %v3639_v60  ;;  %v1412_v24 = vsel %vm1267_vm3, %v1407_v45, %v3673_v63  ;;  %v1344_v7 = vsel %vm3705_vm1, %v3653_v59, 0.0 }
 0x290   :  { %1431 = vrot.lane.b32.xlu1 %v1411_v13, %s2421_s21  ;;  %1433 = vrot.lane.b32.xlu0 %v1412_v24, %s2421_s21  ;;  %v1349_v56 = vmul.f32 %v3731_v33, %v1344_v7 }
 0x292   :  { %v1409_v27 = vpop.permute.xlu1 %1408  ;;  %v1524_v29 = vpop.permute.xlu0 %1523 }
 0x293   :  { %v1413_v6 = vsel %vm1267_vm3, %v1409_v27, %v3686_v54  ;;  %v1531_v55 = vsel %vm1267_vm3, %v1524_v29, %v3751_v0 }
 0x294   :  { %1435 = vrot.lane.b32.xlu1 %v1413_v6, %s2421_s21  ;;  %1477 = vrot.lane.b32.xlu0 %v1410_v42, %s2422_s2 }
 0x296   :  { %v1526_v25 = vpop.permute.xlu1 %1525  ;;  %v1528_v19 = vpop.permute.xlu0 %1527 }
 0x297   :  { %v1532_v20 = vsel %vm1267_vm3, %v1526_v25, %v3773_v28  ;;  %v1533_v17 = vsel %vm1267_vm3, %v1528_v19, %v3763_v35 }
 0x298   :  { %1479 = vrot.lane.b32.xlu1 %v1411_v13, %s2422_s2  ;;  %1481 = vrot.lane.b32.xlu0 %v1412_v24, %s2422_s2 }
 0x29a   :  { %v1530_v2 = vpop.permute.xlu1 %1529 }
 0x29b   :  { %v1534_v26 = vsel %vm1267_vm3, %v1530_v2, %v3716_v16 }
 0x29c   :  { %1483 = vrot.lane.b32.xlu1 %v1413_v6, %s2422_s2  ;;  %1312 = vrot.lane.b32.xlu0 %v1288_v3, %s2421_s21  ;;  %v1347_v6 = vsel %vm1340_vm13, %v3755_v23, 0.0 }
 0x29d   :  { %v1352_v23 = vmul.f32 %v3731_v33, %v1347_v6 }
 0x2a0   :  { %1314 = vrot.lane.b32.xlu1 %v1289_v57, %s2421_s21  ;;  %1316 = vrot.lane.b32.xlu0 %v1290_v47, %s2421_s21 }
 0x2a4   :  { %1318 = vrot.lane.b32.xlu1 %v1291_v46, %s2421_s21  ;;  %1365 = vrot.lane.b32.xlu0 %v1288_v3, %s2422_s2  ;;  %v1381_v3 = vstv %s2241_s24 }
 0x2a8   :  { %1367 = vrot.lane.b32.xlu1 %v1289_v57, %s2422_s2  ;;  %1369 = vrot.lane.b32.xlu0 %v1290_v47, %s2422_s2 }
 0x2ac   :  { %1371 = vrot.lane.b32.xlu1 %v1291_v46, %s2422_s2  ;;  %1552 = vrot.lane.b32.xlu0 %v1531_v55, %s2421_s21 }
 0x2b0   :  { %1554 = vrot.lane.b32.xlu1 %v1532_v20, %s2421_s21  ;;  %1556 = vrot.lane.b32.xlu0 %v1533_v17, %s2421_s21 }
 0x2b4   :  { %1558 = vrot.lane.b32.xlu1 %v1534_v26, %s2421_s21  ;;  %1600 = vrot.lane.b32.xlu0 %v1531_v55, %s2422_s2 }
 0x2b8   :  { %1602 = vrot.lane.b32.xlu1 %v1532_v20, %s2422_s2  ;;  %1604 = vrot.lane.b32.xlu0 %v1533_v17, %s2422_s2  ;;  %v4003_v20 = vstv %s2243_s25 }
 0x2bc   :  { %1606 = vrot.lane.b32.xlu1 %v1534_v26, %s2422_s2 }
 0x2fe   :  { %v1430_v43 = vpop.permute.xlu0 %1429 }
 0x2ff   :  { %v1441_v46 = vsel %vm3935_vm6, %v1430_v43, 0.0 }
 0x300   :  { %v1446_v17 = vmul.f32 %v3941_v48, %v1441_v46  ;;  %v1582_v46 = vsel %vm1340_vm13, %v3751_v0, 0.0 }
 0x302   :  { %v3939_v39 = vpop.permute.xlu1 %1431  ;;  %v1434_v22 = vpop.permute.xlu0 %1433 }
 0x303   :  { %v1443_v62 = vsel %vm3935_vm6, %v1434_v22, 0.0 }
 0x304   :  { %v3946_v8 = vmul.f32 %v3941_v48, %v1443_v62 }
 0x306   :  { %v1436_v4 = vpop.permute.xlu1 %1435  ;;  %v1478_v32 = vpop.permute.xlu0 %1477 }
 0x307   :  { %v1444_v21 = vsel %vm3935_vm6, %v1436_v4, 0.0  ;;  %v1489_v62 = vsel %vm1361_vm7, %v1478_v32, 0.0 }
 0x308   :  { %v3954_v30 = vmul.f32 %v3941_v48, %v1444_v21 }
 0x30a   :  { %v3957_v5 = vpop.permute.xlu1 %1479  ;;  %v1482_v10 = vpop.permute.xlu0 %1481 }
 0x30b   :  { %v1491_v14 = vsel %vm1361_vm7, %v1482_v10, 0.0 }
 0x30c   :  { %v3968_v40 = vmul.f32 %v3959_v61, %v1491_v14 }
 0x30e   :  { %v1484_v53 = vpop.permute.xlu1 %1483  ;;  %v1313_v31 = vpop.permute.xlu0 %1312 }
 0x30f   :  { %v1492_v49 = vsel %vm1361_vm7, %v1484_v53, 0.0  ;;  %v1324_v12 = vsel %vm1305_vm9, %v1313_v31, 0.0  ;;  %v4014_v53 = vstv %s2245_s26  ;;  %v1494_v31 = vmul.f32 %v3959_v61, %v1489_v62 }
 0x310   :  { %v3975_v52 = vmul.f32 %v3959_v61, %v1492_v49  ;;  %v1329_v13 = vmul.f32 %v1328_v51, %v1324_v12  ;;  %v1587_v62 = vmul.f32 %v3744_v38, %v1582_v46 }
 0x312   :  { %v1315_v1 = vpop.permute.xlu1 %1314  ;;  %v1317_v42 = vpop.permute.xlu0 %1316  ;;  %v1353_v25 = vadd.f32 %v1349_v56, %v1329_v13 }
 0x313   :  { %v1326_v45 = vsel %vm1305_vm9, %v1317_v42, 0.0  ;;  %v1325_v32 = vsel %vm3935_vm6, %v1315_v1, 0.0 }
 0x314   :  { %v1331_v24 = vmul.f32 %v1328_v51, %v1326_v45  ;;  %v1345_v45 = vsel %vm1340_vm13, %v3663_v58, 0.0  ;;  %v1462_v58 = vsel %vm1340_vm13, %v3686_v54, 0.0 }
 0x315   :  { %v1350_v54 = vmul.f32 %v3731_v33, %v1345_v45 }
 0x316   :  { %v1355_v59 = vadd.f32 %v3741_v41, %v1331_v24  ;;  %v1319_v57 = vpop.permute.xlu1 %1318  ;;  %v1366_v47 = vpop.permute.xlu0 %1365  ;;  %v1459_v41 = vsel %vm1340_vm13, %v3620_v18, 0.0  ;;  %v1461_v18 = vsel %vm1340_vm13, %v3673_v63, 0.0 }
 0x317   :  { %v1327_v15 = vsel %vm3935_vm6, %v1319_v57, 0.0  ;;  %v1377_v29 = vsel %vm3984_vm11, %v1366_v47, 0.0  ;;  %v1464_v14 = vmul.f32 %v4003_v20, %v1459_v41  ;;  %v1466_v24 = vmul.f32 %v4003_v20, %v1461_v18 }
 0x318   :  { %v1332_v55 = vmul.f32 %v1328_v51, %v1327_v15  ;;  %v1382_v19 = vmul.f32 %v1381_v3, %v1377_v29 }
 0x31a   :  { %v1356_v2 = vadd.f32 %v1352_v23, %v1332_v55  ;;  %v1386_v26 = vadd.f32 %v1382_v19, %v1353_v25  ;;  %v1368_v43 = vpop.permute.xlu1 %1367  ;;  %v1370_v22 = vpop.permute.xlu0 %1369  ;;  %v1584_v55 = vsel %vm1340_vm13, %v3763_v35, 0.0 }
 0x31b   :  { %v1379_v4 = vsel %vm3984_vm11, %v1370_v22, 0.0  ;;  %v1378_v27 = vsel %vm1361_vm7, %v1368_v43, 0.0  ;;  %v1442_v43 = vsel %vm3935_vm6, %v3939_v39, 0.0 }
 0x31c   :  { %v1450_v21 = vadd.f32 %v1446_v17, %v1386_v26  ;;  %v1384_v10 = vmul.f32 %v1381_v3, %v1379_v4  ;;  %v1383_v23 = vmul.f32 %v1381_v3, %v1378_v27  ;;  %v1467_v26 = vmul.f32 %v4003_v20, %v1462_v58 }
 0x31d   :  { %v1490_v58 = vsel %vm1361_vm7, %v3957_v5, 0.0 }
 0x31e   :  { %v1388_v49 = vadd.f32 %v1384_v10, %v1355_v59  ;;  %v1372_v12 = vpop.permute.xlu1 %1371  ;;  %v1468_v42 = vadd.f32 %v1464_v14, %v1450_v21  ;;  %v1553_v7 = vpop.permute.xlu0 %1552  ;;  %v1330_v59 = vmul.f32 %v1328_v51, %v1325_v32  ;;  %v1589_v21 = vmul.f32 %v3744_v38, %v1584_v55 }
 0x31f   :  { %v1380_v63 = vsel %vm1361_vm7, %v1372_v12, 0.0  ;;  %v1564_v13 = vsel %vm3935_vm6, %v1553_v7, 0.0 }
 0x320   :  { %v1452_v1 = vadd.f32 %v3946_v8, %v1388_v49  ;;  %v1385_v6 = vmul.f32 %v1381_v3, %v1380_v63  ;;  %v1498_v56 = vadd.f32 %v1494_v31, %v1468_v42  ;;  %v1569_v57 = vmul.f32 %v4014_v53, %v1564_v13  ;;  %v403_v47 = vpop.f32.mrf.mxu1 }
 0x321   :  { %v2239_v51 = vmul.f32 -1.442695, %v403_v47  ;;  %v1354_v35 = vadd.f32 %v1350_v54, %v1330_v59  ;;  %v1616_v3 = vstv %s4016_s27  ;;  %v1626_v49 = vstv %s4036_s28 }
 0x322   :  { %v1389_v15 = vadd.f32 %v1385_v6, %v1356_v2  ;;  %v4041_v29 = vpop.permute.xlu1 %1554  ;;  %v1470_v8 = vadd.f32 %v1466_v24, %v1452_v1  ;;  %v1557_v25 = vpop.permute.xlu0 %1556  ;;  %v1573_v17 = vadd.f32 %v1569_v57, %v1498_v56  ;;  %v1447_v42 = vmul.f32 %v3941_v48, %v1442_v43 }
 0x323   :  { %v1566_v0 = vsel %vm3935_vm6, %v1557_v25, 0.0  ;;  %v2311_v19 = vpop.f32.mrf.mxu1  ;;  %2319 = vpow2.f32 %v2239_v51  ;;  %v1387_v10 = vadd.f32 %v1383_v23, %v1354_v35  ;;  %v1460_v24 = vsel %vm1340_vm13, %v3639_v60, 0.0 }
 0x324   :  { %v1453_v41 = vadd.f32 %v3954_v30, %v1389_v15  ;;  %v1500_v2 = vadd.f32 %v3968_v40, %v1470_v8  ;;  %v1571_v33 = vmul.f32 %v4014_v53, %v1566_v0  ;;  %v1591_v31 = vadd.f32 %v1587_v62, %v1573_v17 }
 0x325   :  { %v1465_v59 = vmul.f32 %v4003_v20, %v1460_v24  ;;  %v1565_v9 = vsel %vm4063_vm12, %v4041_v29, 0.0  ;;  %v1495_v8 = vmul.f32 %v3959_v61, %v1490_v58  ;;  %v1583_v0 = vsel %vm3722_vm2, %v3773_v28, 0.0 }
 0x326   :  { %v1559_v30 = vpop.permute.xlu1 %1558  ;;  %v1471_v40 = vadd.f32 %v1467_v26, %v1453_v41  ;;  %v1601_v4 = vpop.permute.xlu0 %1600  ;;  %v1575_v14 = vadd.f32 %v1571_v33, %v1500_v2  ;;  %v1570_v44 = vmul.f32 %v4014_v53, %v1565_v9  ;;  %v2423_v61 = vmov 1966171168  }
 0x327   :  { %v1567_v16 = vsel %vm4063_vm12, %v1559_v30, 0.0  ;;  %v1612_v39 = vsel %vm1361_vm7, %v1601_v4, 0.0  ;;  %v1657_v41 = vunpack.c.l.s4 %v2423_v61  ;;  %v1588_v17 = vmul.f32 %v3744_v38, %v1583_v0 }
 0x328   :  { %v1501_v50 = vadd.f32 %v3975_v52, %v1471_v40  ;;  %v1572_v18 = vmul.f32 %v4014_v53, %v1567_v16  ;;  %v1617_v32 = vmul.f32 %v1616_v3, %v1612_v39  ;;  %v1593_v12 = vadd.f32 %v1589_v21, %v1575_v14 }
 0x329   :  { %v1451_v52 = vadd.f32 %v1447_v42, %v1387_v10  ;;  %v1658_v53 = vunpack.c.0.s8 %v1657_v41  ;;  %v4110_v21 = vsub.s32 0, %v4854_v37  ;;  %v1746_v24 = vsub.s32 6, %v4854_v37 }
 0x32a   :  { %v1576_v7 = vadd.f32 %v1572_v18, %v1501_v50  ;;  %v1621_v45 = vadd.f32 %v1617_v32, %v1591_v31  ;;  %v1603_v63 = vpop.permute.xlu1 %1602  ;;  %v1605_v13 = vpop.permute.xlu0 %1604  ;;  %v1691_v32 = vsub.s32 1, %v4854_v37 }
 0x32b   :  { %v1614_v27 = vsel %vm1361_vm7, %v1605_v13, 0.0  ;;  %v1469_v47 = vadd.f32 %v1465_v59, %v1451_v52  ;;  %v1613_v29 = vsel %vm4088_vm15, %v1603_v63, 0.0  ;;  %v1661_v22 = vsub.s32 %v1658_v53, %v4854_v37 }
 0x32c   :  { %v1627_v1 = vadd.f32 %v1626_v49, %v1621_v45  ;;  %v1619_v6 = vmul.f32 %v1616_v3, %v1614_v27  ;;  %v1594_v56 = vadd.f32 %v3747_v36, %v1576_v7  ;;  %v1618_v2 = vmul.f32 %v1616_v3, %v1613_v29 }
 0x32d   :  { %v1499_v54 = vadd.f32 %v1495_v8, %v1469_v47  ;;  %v1713_v7 = vsub.s32 3, %v4854_v37  ;;  %v1724_v63 = vsub.s32 4, %v4854_v37  ;;  %v1735_v13 = vsub.s32 5, %v4854_v37 }
 0x32e   :  { %v2249_v57 = vmul.f32 -1.442695, %v1627_v1  ;;  %v1623_v60 = vadd.f32 %v1619_v6, %v1593_v12  ;;  %v1607_v11 = vpop.permute.xlu1 %1606  ;;  %v1757_v27 = vsub.s32 7, %v4854_v37 }
 0x32f   :  { %v1615_v36 = vsel %vm4088_vm15, %v1607_v11, 0.0  ;;  %v1574_v19 = vadd.f32 %v1570_v44, %v1499_v54 }
 0x330   :  { %2321 = vpow2.f32 %v2249_v57  ;;  %v1629_v20 = vadd.f32 %v1626_v49, %v1623_v60  ;;  %v1620_v46 = vmul.f32 %v1616_v3, %v1615_v36  ;;  %v2320_v15 = vpop.eup %2319 }
 0x331   :  { %v410_v55 = vadd.f32 1.0, %v2320_v15  ;;  %v1592_v26 = vadd.f32 %v1588_v17, %v1574_v19 }
 0x332   :  { %v2251_v25 = vmul.f32 -1.442695, %v1629_v20  ;;  %v1624_v51 = vadd.f32 %v1620_v46, %v1594_v56 }
 0x333   :  { %v1622_v43 = vadd.f32 %v1618_v2, %v1592_v26 }
 0x334   :  { %v1630_v5 = vadd.f32 %v1626_v49, %v1624_v51  ;;  %2323 = vpow2.f32 %v2251_v25 }
 0x335   :  { %2325 = vrcp.f32 %v410_v55  ;;  %v1628_v28 = vadd.f32 %v1626_v49, %v1622_v43  ;;  %v1702_v49 = vsub.s32 2, %v4854_v37 }
 0x336   :  { %v2252_v23 = vmul.f32 -1.442695, %v1630_v5 }
 0x337   :  { %v2250_v38 = vmul.f32 -1.442695, %v1628_v28  ;;  %v2340_v28 = vld [vmem:[%s4701_s0] sm:$0xff] }
 0x338   :  { %2327 = vpow2.f32 %v2252_v23 }
 0x33d   :  { %v2322_v35 = vpop.eup %2321 }
 0x33e   :  { %v1643_v33 = vadd.f32 1.0, %v2322_v35 }
 0x340   :  { %2329 = vrcp.f32 %v1643_v33 }
 0x341   :  { %v2324_v34 = vpop.eup %2323 }
 0x342   :  { %v2326_v30 = vpop.eup %2325  ;;  %v1645_v40 = vadd.f32 1.0, %v2324_v34 }
 0x343   :  { %v1662_v62 = vrot.slane %v2326_v30, %v1661_v22 }
 0x344   :  { %2331 = vrcp.f32 %v1645_v40 }
 0x345   :  { %v2328_v4 = vpop.eup %2327  ;;  %v1663_v10 = vcombine.high %v1662_v62, %v1662_v62  ;;  %v1670_v14 = vrot.slane %v1662_v62, %v1661_v22 }
 0x346   :  { %v1646_v3 = vadd.f32 1.0, %v2328_v4 }
 0x347   :  { %v1677_v16 = vrot.slane %v1663_v10, %v1661_v22  ;;  %v4113_v39 = vrot.slane %v1670_v14, %v4110_v21  ;;  %v2339_v22 = vld [vmem:[%s4701_s0 + $0x8] sm:$0xff]  ;;  %v2342_v10 = vld [vmem:[%s4701_s0 + $0x10] sm:$0xff] }
 0x348   :  { %2333 = vrcp.f32 %v1646_v3 }
 0x349   :  { %2335 = vpow2.f32 %v2250_v38  ;;  %v4116_v50 = vrot.slane %v1677_v16, %v4110_v21  ;;  %v2341_v38 = vld [vmem:[%s4701_s0 + $0x18] sm:$0xff] }
 0x34d   :  { %v2330_v18 = vpop.eup %2329 }
 0x34e   :  { %v1681_v31 = vrot.slane %v2330_v18, %v4110_v21  ;;  %v1692_v42 = vrot.slane %v2330_v18, %v1691_v32  ;;  %v1703_v45 = vrot.slane %v2330_v18, %v1702_v49  ;;  %v1714_v51 = vrot.slane %v2330_v18, %v1713_v7 }
 0x34f   :  { %v1725_v55 = vrot.slane %v2330_v18, %v1724_v63  ;;  %v1736_v54 = vrot.slane %v2330_v18, %v1735_v13  ;;  %v1747_v44 = vrot.slane %v2330_v18, %v1746_v24  ;;  %v1758_v5 = vrot.slane %v2330_v18, %v1757_v27 }
 0x350   :  { %1687 = vbcast.lane.b32.xlu1 %v1681_v31, 264  ;;  %1683 = vbcast.lane.b32.xlu0 %v1681_v31, 256 }
 0x351   :  { %v2332_v12 = vpop.eup %2331 }
 0x352   :  { %v1857_v52 = vrot.slane %v2332_v12, %v4110_v21  ;;  %v4127_v1 = vrot.slane %v2332_v12, %v1691_v32  ;;  %v4129_v6 = vrot.slane %v2332_v12, %v1702_v49  ;;  %v4131_v59 = vrot.slane %v2332_v12, %v1713_v7 }
 0x353   :  { %v4133_v57 = vrot.slane %v2332_v12, %v1724_v63  ;;  %v4135_v48 = vrot.slane %v2332_v12, %v1735_v13  ;;  %v4137_v60 = vrot.slane %v2332_v12, %v1746_v24  ;;  %v4139_v11 = vrot.slane %v2332_v12, %v1757_v27 }
 0x354   :  { %1698 = vbcast.lane.b32.xlu1 %v1692_v42, 264  ;;  %1694 = vbcast.lane.b32.xlu0 %v1692_v42, 256  ;;  %v2344_v42 = vld [vmem:[%s4701_s0 + $0x20] sm:$0xff] }
 0x355   :  { %v2334_v56 = vpop.eup %2333 }
 0x356   :  { %v4142_v58 = vrot.slane %v2334_v56, %v4110_v21  ;;  %v4144_v37 = vrot.slane %v2334_v56, %v1691_v32  ;;  %v4146_v36 = vrot.slane %v2334_v56, %v1702_v49  ;;  %v2336_v47 = vpop.eup %2335  ;;  %v4148_v20 = vrot.slane %v2334_v56, %v1713_v7 }
 0x357   :  { %v4150_v46 = vrot.slane %v2334_v56, %v1724_v63  ;;  %v4152_v9 = vrot.slane %v2334_v56, %v1735_v13  ;;  %v4154_v15 = vrot.slane %v2334_v56, %v1746_v24  ;;  %v4156_v8 = vrot.slane %v2334_v56, %v1757_v27 }
 0x358   :  { %1709 = vbcast.lane.b32.xlu1 %v1703_v45, 264  ;;  %1705 = vbcast.lane.b32.xlu0 %v1703_v45, 256  ;;  %v1644_v25 = vadd.f32 1.0, %v2336_v47 }
 0x35a   :  { %2337 = vrcp.f32 %v1644_v25 }
 0x35c   :  { %1720 = vbcast.lane.b32.xlu1 %v1714_v51, 264  ;;  %1716 = vbcast.lane.b32.xlu0 %v1714_v51, 256 }
 0x360   :  { %1731 = vbcast.lane.b32.xlu1 %v1725_v55, 264  ;;  %1727 = vbcast.lane.b32.xlu0 %v1725_v55, 256 }
 0x364   :  { %1742 = vbcast.lane.b32.xlu1 %v1736_v54, 264  ;;  %1738 = vbcast.lane.b32.xlu0 %v1736_v54, 256 }
 0x367   :  { %v2338_v23 = vpop.eup %2337 }
 0x368   :  { %1753 = vbcast.lane.b32.xlu1 %v1747_v44, 264  ;;  %1749 = vbcast.lane.b32.xlu0 %v1747_v44, 256  ;;  %v1769_v0 = vrot.slane %v2338_v23, %v4110_v21  ;;  %v1780_v29 = vrot.slane %v2338_v23, %v1691_v32  ;;  %v1791_v19 = vrot.slane %v2338_v23, %v1702_v49  ;;  %v2343_v49 = vld [vmem:[%s4701_s0 + $0x28] sm:$0xff] }
 0x369   :  { %v1802_v61 = vrot.slane %v2338_v23, %v1713_v7  ;;  %v1813_v41 = vrot.slane %v2338_v23, %v1724_v63  ;;  %v1824_v17 = vrot.slane %v2338_v23, %v1735_v13  ;;  %v1835_v2 = vrot.slane %v2338_v23, %v1746_v24 }
 0x36a   :  { %v1846_v26 = vrot.slane %v2338_v23, %v1757_v27  ;;  %v2345_v27 = vld [vmem:[%s4701_s0 + $0x38] sm:$0xff] }
 0x36c   :  { %1764 = vbcast.lane.b32.xlu1 %v1758_v5, 264  ;;  %1760 = vbcast.lane.b32.xlu0 %v1758_v5, 256  ;;  %v2351_v5 = vld [vmem:[%s4701_s0 + $0x68] sm:$0xff] }
 0x370   :  { %1775 = vbcast.lane.b32.xlu1 %v1769_v0, 264  ;;  %1771 = vbcast.lane.b32.xlu0 %v1769_v0, 256  ;;  %v2352_v0 = vld [vmem:[%s4701_s0 + $0x60] sm:$0xff] }
 0x374   :  { %1786 = vbcast.lane.b32.xlu1 %v1780_v29, 264  ;;  %1782 = vbcast.lane.b32.xlu0 %v1780_v29, 256 }
 0x378   :  { %1797 = vbcast.lane.b32.xlu1 %v1791_v19, 264  ;;  %1793 = vbcast.lane.b32.xlu0 %v1791_v19, 256 }
 0x37c   :  { %1808 = vbcast.lane.b32.xlu1 %v1802_v61, 264  ;;  %1804 = vbcast.lane.b32.xlu0 %v1802_v61, 256 }
 0x380   :  { %1819 = vbcast.lane.b32.xlu1 %v1813_v41, 264  ;;  %1815 = vbcast.lane.b32.xlu0 %v1813_v41, 256 }
 0x384   :  { %1830 = vbcast.lane.b32.xlu1 %v1824_v17, 264  ;;  %1826 = vbcast.lane.b32.xlu0 %v1824_v17, 256 }
 0x388   :  { %1841 = vbcast.lane.b32.xlu1 %v1835_v2, 264  ;;  %1837 = vbcast.lane.b32.xlu0 %v1835_v2, 256  ;;  %v2353_v2 = vld [vmem:[%s4701_s0 + $0x78] sm:$0xff] }
 0x38c   :  { %1852 = vbcast.lane.b32.xlu1 %v1846_v26, 264  ;;  %1848 = vbcast.lane.b32.xlu0 %v1846_v26, 256 }
 0x390   :  { %1863 = vbcast.lane.b32.xlu1 %v1857_v52, 264  ;;  %1859 = vbcast.lane.b32.xlu0 %v1857_v52, 256 }
 0x394   :  { %1874 = vbcast.lane.b32.xlu1 %v4127_v1, 264  ;;  %1870 = vbcast.lane.b32.xlu0 %v4127_v1, 256  ;;  %v2346_v1 = vld [vmem:[%s4701_s0 + $0x30] sm:$0xff] }
 0x398   :  { %1885 = vbcast.lane.b32.xlu1 %v4129_v6, 264  ;;  %1881 = vbcast.lane.b32.xlu0 %v4129_v6, 256 }
 0x39c   :  { %1896 = vbcast.lane.b32.xlu1 %v4131_v59, 264  ;;  %1892 = vbcast.lane.b32.xlu0 %v4131_v59, 256 }
 0x3a0   :  { %1907 = vbcast.lane.b32.xlu1 %v4133_v57, 264  ;;  %1903 = vbcast.lane.b32.xlu0 %v4133_v57, 256 }
 0x3a4   :  { %1918 = vbcast.lane.b32.xlu1 %v4135_v48, 264  ;;  %1914 = vbcast.lane.b32.xlu0 %v4135_v48, 256 }
 0x3a8   :  { %1929 = vbcast.lane.b32.xlu1 %v4137_v60, 264  ;;  %1925 = vbcast.lane.b32.xlu0 %v4137_v60, 256  ;;  %v2347_v60 = vld [vmem:[%s4701_s0 + $0x48] sm:$0xff] }
 0x3ac   :  { %1940 = vbcast.lane.b32.xlu1 %v4139_v11, 264  ;;  %1936 = vbcast.lane.b32.xlu0 %v4139_v11, 256 }
 0x3b0   :  { %1951 = vbcast.lane.b32.xlu1 %v4142_v58, 264  ;;  %1947 = vbcast.lane.b32.xlu0 %v4142_v58, 256  ;;  %v2348_v58 = vld [vmem:[%s4701_s0 + $0x40] sm:$0xff] }
 0x3b4   :  { %1962 = vbcast.lane.b32.xlu1 %v4144_v37, 264  ;;  %1958 = vbcast.lane.b32.xlu0 %v4144_v37, 256 }
 0x3b8   :  { %1973 = vbcast.lane.b32.xlu1 %v4146_v36, 264  ;;  %1969 = vbcast.lane.b32.xlu0 %v4146_v36, 256 }
 0x3bc   :  { %1984 = vbcast.lane.b32.xlu1 %v4148_v20, 264  ;;  %1980 = vbcast.lane.b32.xlu0 %v4148_v20, 256 }
 0x3c0   :  { %1995 = vbcast.lane.b32.xlu1 %v4150_v46, 264  ;;  %1991 = vbcast.lane.b32.xlu0 %v4150_v46, 256 }
 0x3c2   :  { %v1688_v53 = vpop.permute.xlu1 %1687  ;;  %v1684_v35 = vpop.permute.xlu0 %1683 }
 0x3c3   :  { %v2041_v33 = vadd.f32 %v4113_v39, %v1688_v53  ;;  %v2040_v43 = vadd.f32 %v4113_v39, %v1684_v35  ;;  %v2354_v53 = vld [vmem:[%s4701_s0 + $0x70] sm:$0xff] }
 0x3c4   :  { %2006 = vbcast.lane.b32.xlu1 %v4152_v9, 264  ;;  %2002 = vbcast.lane.b32.xlu0 %v4152_v9, 256  ;;  %v2349_v9 = vld [vmem:[%s4701_s0 + $0x58] sm:$0xff] }
 0x3c5   :  { %v2105_v34 = vmul.f32 %v2339_v22, %v2041_v33  ;;  %v2104_v30 = vmul.f32 %v2340_v28, %v2040_v43  ;;  %v2355_v28 = vld [vmem:[%s4701_s0 + $0x88] sm:$0xff] }
 0x3c6   :  { %v1699_v40 = vpop.permute.xlu1 %1698  ;;  %v1695_v62 = vpop.permute.xlu0 %1694 }
 0x3c7   :  { %2169 = vst.msk [vmem:[%s4705_s4 + $0x8] sm:$0xff] %vm94_vm0, %v2105_v34  ;;  %2168 = vst.msk [vmem:[%s4705_s4] sm:$0xff] %vm94_vm0, %v2104_v30  ;;  %v2043_v4 = vadd.f32 %v4113_v39, %v1699_v40  ;;  %v2042_v21 = vadd.f32 %v4113_v39, %v1695_v62  ;;  %v2356_v40 = vld [vmem:[%s4701_s0 + $0x80] sm:$0xff] }
 0x3c8   :  { %2017 = vbcast.lane.b32.xlu1 %v4154_v15, 264  ;;  %2013 = vbcast.lane.b32.xlu0 %v4154_v15, 256 }
 0x3c9   :  { %v2107_v3 = vmul.f32 %v2341_v38, %v2043_v4  ;;  %v2106_v14 = vmul.f32 %v2342_v10, %v2042_v21  ;;  %v2357_v10 = vld [vmem:[%s4701_s0 + $0x98] sm:$0xff] }
 0x3ca   :  { %v1710_v16 = vpop.permute.xlu1 %1709  ;;  %v1706_v18 = vpop.permute.xlu0 %1705 }
 0x3cb   :  { %2171 = vst.msk [vmem:[%s4705_s4 + $0x18] sm:$0xff] %vm94_vm0, %v2107_v3  ;;  %2170 = vst.msk [vmem:[%s4705_s4 + $0x10] sm:$0xff] %vm94_vm0, %v2106_v14  ;;  %v2045_v31 = vadd.f32 %v4113_v39, %v1710_v16  ;;  %v2044_v32 = vadd.f32 %v4113_v39, %v1706_v18  ;;  %v2358_v16 = vld [vmem:[%s4701_s0 + $0x90] sm:$0xff] }
 0x3cc   :  { %2028 = vbcast.lane.b32.xlu1 %v4156_v8, 264  ;;  %2024 = vbcast.lane.b32.xlu0 %v4156_v8, 256  ;;  %v2350_v8 = vld [vmem:[%s4701_s0 + $0x50] sm:$0xff] }
 0x3cd   :  { %v2109_v12 = vmul.f32 %v2343_v49, %v2045_v31  ;;  %v2108_v7 = vmul.f32 %v2344_v42, %v2044_v32  ;;  %v2359_v42 = vld [vmem:[%s4701_s0 + $0xa8] sm:$0xff] }
 0x3ce   :  { %v1721_v45 = vpop.permute.xlu1 %1720  ;;  %v1717_v63 = vpop.permute.xlu0 %1716 }
 0x3cf   :  { %2173 = vst.msk [vmem:[%s4705_s4 + $0x28] sm:$0xff] %vm94_vm0, %v2109_v12  ;;  %2172 = vst.msk [vmem:[%s4705_s4 + $0x20] sm:$0xff] %vm94_vm0, %v2108_v7  ;;  %v2047_v13 = vadd.f32 %v4113_v39, %v1721_v45  ;;  %v2046_v24 = vadd.f32 %v4113_v39, %v1717_v63  ;;  %v2360_v45 = vld [vmem:[%s4701_s0 + $0xa0] sm:$0xff] }
 0x3d1   :  { %v2111_v52 = vmul.f32 %v2345_v27, %v2047_v13  ;;  %v2110_v6 = vmul.f32 %v2346_v1, %v2046_v24  ;;  %v2361_v1 = vld [vmem:[%s4701_s0 + $0xb8] sm:$0xff] }
 0x3d2   :  { %v1732_v56 = vpop.permute.xlu1 %1731  ;;  %v1728_v59 = vpop.permute.xlu0 %1727 }
 0x3d3   :  { %2175 = vst.msk [vmem:[%s4705_s4 + $0x38] sm:$0xff] %vm94_vm0, %v2111_v52  ;;  %2174 = vst.msk [vmem:[%s4705_s4 + $0x30] sm:$0xff] %vm94_vm0, %v2110_v6  ;;  %v2049_v57 = vadd.f32 %v4113_v39, %v1732_v56  ;;  %v2048_v48 = vadd.f32 %v4113_v39, %v1728_v59  ;;  %v2362_v56 = vld [vmem:[%s4701_s0 + $0xb0] sm:$0xff] }
 0x3d5   :  { %v2113_v11 = vmul.f32 %v2347_v60, %v2049_v57  ;;  %v2112_v37 = vmul.f32 %v2348_v58, %v2048_v48  ;;  %v2363_v58 = vld [vmem:[%s4701_s0 + $0xc8] sm:$0xff] }
 0x3d6   :  { %v1743_v36 = vpop.permute.xlu1 %1742  ;;  %v1739_v47 = vpop.permute.xlu0 %1738 }
 0x3d7   :  { %2177 = vst.msk [vmem:[%s4705_s4 + $0x48] sm:$0xff] %vm94_vm0, %v2113_v11  ;;  %2176 = vst.msk [vmem:[%s4705_s4 + $0x40] sm:$0xff] %vm94_vm0, %v2112_v37  ;;  %v2051_v20 = vadd.f32 %v4113_v39, %v1743_v36  ;;  %v2050_v46 = vadd.f32 %v4113_v39, %v1739_v47  ;;  %v2364_v36 = vld [vmem:[%s4701_s0 + $0xc0] sm:$0xff] }
 0x3d9   :  { %v2115_v15 = vmul.f32 %v2349_v9, %v2051_v20  ;;  %v2114_v25 = vmul.f32 %v2350_v8, %v2050_v46  ;;  %v2365_v8 = vld [vmem:[%s4701_s0 + $0xd8] sm:$0xff] }
 0x3da   :  { %v1754_v51 = vpop.permute.xlu1 %1753  ;;  %v1750_v55 = vpop.permute.xlu0 %1749 }
 0x3db   :  { %2179 = vst.msk [vmem:[%s4705_s4 + $0x58] sm:$0xff] %vm94_vm0, %v2115_v15  ;;  %2178 = vst.msk [vmem:[%s4705_s4 + $0x50] sm:$0xff] %vm94_vm0, %v2114_v25  ;;  %v2053_v54 = vadd.f32 %v4113_v39, %v1754_v51  ;;  %v2052_v44 = vadd.f32 %v4113_v39, %v1750_v55  ;;  %v2366_v51 = vld [vmem:[%s4701_s0 + $0xd0] sm:$0xff] }
 0x3dd   :  { %v2117_v23 = vmul.f32 %v2351_v5, %v2053_v54  ;;  %v2116_v29 = vmul.f32 %v2352_v0, %v2052_v44  ;;  %v2367_v0 = vld [vmem:[%s4701_s0 + $0xe8] sm:$0xff] }
 0x3de   :  { %v1765_v19 = vpop.permute.xlu1 %1764  ;;  %v1761_v61 = vpop.permute.xlu0 %1760 }
 0x3df   :  { %2181 = vst.msk [vmem:[%s4705_s4 + $0x68] sm:$0xff] %vm94_vm0, %v2117_v23  ;;  %2180 = vst.msk [vmem:[%s4705_s4 + $0x60] sm:$0xff] %vm94_vm0, %v2116_v29  ;;  %v2055_v41 = vadd.f32 %v4113_v39, %v1765_v19  ;;  %v2054_v17 = vadd.f32 %v4113_v39, %v1761_v61  ;;  %v2368_v19 = vld [vmem:[%s4701_s0 + $0xe0] sm:$0xff] }
 0x3e1   :  { %v2119_v26 = vmul.f32 %v2353_v2, %v2055_v41  ;;  %v2118_v35 = vmul.f32 %v2354_v53, %v2054_v17  ;;  %v2369_v53 = vld [vmem:[%s4701_s0 + $0xf8] sm:$0xff] }
 0x3e2   :  { %v1776_v33 = vpop.permute.xlu1 %1775  ;;  %v1772_v43 = vpop.permute.xlu0 %1771 }
 0x3e3   :  { %2183 = vst.msk [vmem:[%s4705_s4 + $0x78] sm:$0xff] %vm94_vm0, %v2119_v26  ;;  %2182 = vst.msk [vmem:[%s4705_s4 + $0x70] sm:$0xff] %vm94_vm0, %v2118_v35  ;;  %v2057_v22 = vadd.f32 %v4113_v39, %v1776_v33  ;;  %v2056_v34 = vadd.f32 %v4113_v39, %v1772_v43  ;;  %v2370_v33 = vld [vmem:[%s4701_s0 + $0xf0] sm:$0xff] }
 0x3e5   :  { %v2121_v30 = vmul.f32 %v2355_v28, %v2057_v22  ;;  %v2120_v62 = vmul.f32 %v2356_v40, %v2056_v34 }
 0x3e6   :  { %v1787_v4 = vpop.permute.xlu1 %1786  ;;  %v1783_v21 = vpop.permute.xlu0 %1782 }
 0x3e7   :  { %2185 = vst.msk [vmem:[%s4705_s4 + $0x88] sm:$0xff] %vm94_vm0, %v2121_v30  ;;  %2184 = vst.msk [vmem:[%s4705_s4 + $0x80] sm:$0xff] %vm94_vm0, %v2120_v62  ;;  %v2059_v38 = vadd.f32 %v4113_v39, %v1787_v4  ;;  %v2058_v3 = vadd.f32 %v4113_v39, %v1783_v21  ;;  %v2371_v30 = vld [vmem:[%s4701_s0 + $0x108] sm:$0xff]  ;;  %v2372_v62 = vld [vmem:[%s4701_s0 + $0x100] sm:$0xff] }
 0x3e9   :  { %v2123_v14 = vmul.f32 %v2357_v10, %v2059_v38  ;;  %v2122_v18 = vmul.f32 %v2358_v16, %v2058_v3 }
 0x3ea   :  { %v1798_v31 = vpop.permute.xlu1 %1797  ;;  %v1794_v32 = vpop.permute.xlu0 %1793 }
 0x3eb   :  { %2187 = vst.msk [vmem:[%s4705_s4 + $0x98] sm:$0xff] %vm94_vm0, %v2123_v14  ;;  %2186 = vst.msk [vmem:[%s4705_s4 + $0x90] sm:$0xff] %vm94_vm0, %v2122_v18  ;;  %v2061_v49 = vadd.f32 %v4113_v39, %v1798_v31  ;;  %v2060_v12 = vadd.f32 %v4113_v39, %v1794_v32  ;;  %v2373_v14 = vld [vmem:[%s4701_s0 + $0x118] sm:$0xff]  ;;  %v2374_v18 = vld [vmem:[%s4701_s0 + $0x110] sm:$0xff] }
 0x3ed   :  { %v2125_v7 = vmul.f32 %v2359_v42, %v2061_v49  ;;  %v2124_v63 = vmul.f32 %v2360_v45, %v2060_v12 }
 0x3ee   :  { %v1809_v13 = vpop.permute.xlu1 %1808  ;;  %v1805_v24 = vpop.permute.xlu0 %1804 }
 0x3ef   :  { %2189 = vst.msk [vmem:[%s4705_s4 + $0xa8] sm:$0xff] %vm94_vm0, %v2125_v7  ;;  %2188 = vst.msk [vmem:[%s4705_s4 + $0xa0] sm:$0xff] %vm94_vm0, %v2124_v63  ;;  %v2063_v27 = vadd.f32 %v4113_v39, %v1809_v13  ;;  %v2062_v52 = vadd.f32 %v4113_v39, %v1805_v24  ;;  %v2375_v7 = vld [vmem:[%s4701_s0 + $0x128] sm:$0xff]  ;;  %v2376_v63 = vld [vmem:[%s4701_s0 + $0x120] sm:$0xff] }
 0x3f1   :  { %v2127_v6 = vmul.f32 %v2361_v1, %v2063_v27  ;;  %v2126_v59 = vmul.f32 %v2362_v56, %v2062_v52 }
 0x3f2   :  { %v1820_v57 = vpop.permute.xlu1 %1819  ;;  %v1816_v48 = vpop.permute.xlu0 %1815 }
 0x3f3   :  { %2191 = vst.msk [vmem:[%s4705_s4 + $0xb8] sm:$0xff] %vm94_vm0, %v2127_v6  ;;  %2190 = vst.msk [vmem:[%s4705_s4 + $0xb0] sm:$0xff] %vm94_vm0, %v2126_v59  ;;  %v2065_v60 = vadd.f32 %v4113_v39, %v1820_v57  ;;  %v2064_v11 = vadd.f32 %v4113_v39, %v1816_v48  ;;  %v2377_v6 = vld [vmem:[%s4701_s0 + $0x138] sm:$0xff]  ;;  %v2378_v59 = vld [vmem:[%s4701_s0 + $0x130] sm:$0xff] }
 0x3f5   :  { %v2129_v37 = vmul.f32 %v2363_v58, %v2065_v60  ;;  %v2128_v47 = vmul.f32 %v2364_v36, %v2064_v11 }
 0x3f6   :  { %v1831_v20 = vpop.permute.xlu1 %1830  ;;  %v1827_v46 = vpop.permute.xlu0 %1826 }
 0x3f7   :  { %2193 = vst.msk [vmem:[%s4705_s4 + $0xc8] sm:$0xff] %vm94_vm0, %v2129_v37  ;;  %2192 = vst.msk [vmem:[%s4705_s4 + $0xc0] sm:$0xff] %vm94_vm0, %v2128_v47  ;;  %v2067_v9 = vadd.f32 %v4113_v39, %v1831_v20  ;;  %v2066_v15 = vadd.f32 %v4113_v39, %v1827_v46  ;;  %v2379_v37 = vld [vmem:[%s4701_s0 + $0x148] sm:$0xff]  ;;  %v2380_v47 = vld [vmem:[%s4701_s0 + $0x140] sm:$0xff] }
 0x3f9   :  { %v2131_v25 = vmul.f32 %v2365_v8, %v2067_v9  ;;  %v2130_v55 = vmul.f32 %v2366_v51, %v2066_v15 }
 0x3fa   :  { %v1842_v54 = vpop.permute.xlu1 %1841  ;;  %v1838_v44 = vpop.permute.xlu0 %1837 }
 0x3fb   :  { %2195 = vst.msk [vmem:[%s4705_s4 + $0xd8] sm:$0xff] %vm94_vm0, %v2131_v25  ;;  %2194 = vst.msk [vmem:[%s4705_s4 + $0xd0] sm:$0xff] %vm94_vm0, %v2130_v55  ;;  %v2069_v5 = vadd.f32 %v4113_v39, %v1842_v54  ;;  %v2068_v23 = vadd.f32 %v4113_v39, %v1838_v44  ;;  %v2381_v25 = vld [vmem:[%s4701_s0 + $0x158] sm:$0xff]  ;;  %v2382_v55 = vld [vmem:[%s4701_s0 + $0x150] sm:$0xff] }
 0x3fd   :  { %v2133_v29 = vmul.f32 %v2367_v0, %v2069_v5  ;;  %v2132_v61 = vmul.f32 %v2368_v19, %v2068_v23 }
 0x3fe   :  { %v1853_v41 = vpop.permute.xlu1 %1852  ;;  %v1849_v17 = vpop.permute.xlu0 %1848 }
 0x3ff   :  { %2197 = vst.msk [vmem:[%s4705_s4 + $0xe8] sm:$0xff] %vm94_vm0, %v2133_v29  ;;  %2196 = vst.msk [vmem:[%s4705_s4 + $0xe0] sm:$0xff] %vm94_vm0, %v2132_v61  ;;  %v2071_v2 = vadd.f32 %v4113_v39, %v1853_v41  ;;  %v2070_v26 = vadd.f32 %v4113_v39, %v1849_v17  ;;  %v2383_v29 = vld [vmem:[%s4701_s0 + $0x168] sm:$0xff]  ;;  %v2384_v61 = vld [vmem:[%s4701_s0 + $0x160] sm:$0xff] }
 0x401   :  { %v2135_v35 = vmul.f32 %v2369_v53, %v2071_v2  ;;  %v2134_v43 = vmul.f32 %v2370_v33, %v2070_v26 }
 0x402   :  { %v1864_v22 = vpop.permute.xlu1 %1863  ;;  %v1860_v34 = vpop.permute.xlu0 %1859 }
 0x403   :  { %2199 = vst.msk [vmem:[%s4705_s4 + $0xf8] sm:$0xff] %vm94_vm0, %v2135_v35  ;;  %2198 = vst.msk [vmem:[%s4705_s4 + $0xf0] sm:$0xff] %vm94_vm0, %v2134_v43  ;;  %v2073_v39 = vadd.f32 %v4116_v50, %v1864_v22  ;;  %v2072_v28 = vadd.f32 %v4116_v50, %v1860_v34  ;;  %v2385_v35 = vld [vmem:[%s4701_s0 + $0x178] sm:$0xff]  ;;  %v2386_v43 = vld [vmem:[%s4701_s0 + $0x170] sm:$0xff] }
 0x405   :  { %v2137_v40 = vmul.f32 %v2371_v30, %v2073_v39  ;;  %v2136_v4 = vmul.f32 %v2372_v62, %v2072_v28 }
 0x406   :  { %v1875_v21 = vpop.permute.xlu1 %1874  ;;  %v1871_v38 = vpop.permute.xlu0 %1870 }
 0x407   :  { %2201 = vst.msk [vmem:[%s4705_s4 + $0x108] sm:$0xff] %vm94_vm0, %v2137_v40  ;;  %2200 = vst.msk [vmem:[%s4705_s4 + $0x100] sm:$0xff] %vm94_vm0, %v2136_v4  ;;  %v2075_v3 = vadd.f32 %v4116_v50, %v1875_v21  ;;  %v2074_v10 = vadd.f32 %v4116_v50, %v1871_v38  ;;  %v2387_v40 = vld [vmem:[%s4701_s0 + $0x188] sm:$0xff]  ;;  %v2388_v4 = vld [vmem:[%s4701_s0 + $0x180] sm:$0xff] }
 0x409   :  { %v2139_v16 = vmul.f32 %v2373_v14, %v2075_v3  ;;  %v2138_v31 = vmul.f32 %v2374_v18, %v2074_v10 }
 0x40a   :  { %v1886_v32 = vpop.permute.xlu1 %1885  ;;  %v1882_v49 = vpop.permute.xlu0 %1881 }
 0x40b   :  { %2203 = vst.msk [vmem:[%s4705_s4 + $0x118] sm:$0xff] %vm94_vm0, %v2139_v16  ;;  %2202 = vst.msk [vmem:[%s4705_s4 + $0x110] sm:$0xff] %vm94_vm0, %v2138_v31  ;;  %v2077_v12 = vadd.f32 %v4116_v50, %v1886_v32  ;;  %v2076_v42 = vadd.f32 %v4116_v50, %v1882_v49  ;;  %v2389_v16 = vld [vmem:[%s4701_s0 + $0x198] sm:$0xff]  ;;  %v2390_v31 = vld [vmem:[%s4701_s0 + $0x190] sm:$0xff] }
 0x40d   :  { %v2141_v45 = vmul.f32 %v2375_v7, %v2077_v12  ;;  %v2140_v13 = vmul.f32 %v2376_v63, %v2076_v42 }
 0x40e   :  { %v1897_v24 = vpop.permute.xlu1 %1896  ;;  %v1893_v27 = vpop.permute.xlu0 %1892 }
 0x40f   :  { %2205 = vst.msk [vmem:[%s4705_s4 + $0x128] sm:$0xff] %vm94_vm0, %v2141_v45  ;;  %2204 = vst.msk [vmem:[%s4705_s4 + $0x120] sm:$0xff] %vm94_vm0, %v2140_v13  ;;  %v2079_v52 = vadd.f32 %v4116_v50, %v1897_v24  ;;  %v2078_v1 = vadd.f32 %v4116_v50, %v1893_v27  ;;  %v2391_v45 = vld [vmem:[%s4701_s0 + $0x1a8] sm:$0xff]  ;;  %v2392_v13 = vld [vmem:[%s4701_s0 + $0x1a0] sm:$0xff] }
 0x411   :  { %v2143_v56 = vmul.f32 %v2377_v6, %v2079_v52  ;;  %v2142_v57 = vmul.f32 %v2378_v59, %v2078_v1 }
 0x412   :  { %v1908_v48 = vpop.permute.xlu1 %1907  ;;  %v1904_v60 = vpop.permute.xlu0 %1903 }
 0x413   :  { %2207 = vst.msk [vmem:[%s4705_s4 + $0x138] sm:$0xff] %vm94_vm0, %v2143_v56  ;;  %2206 = vst.msk [vmem:[%s4705_s4 + $0x130] sm:$0xff] %vm94_vm0, %v2142_v57  ;;  %v2081_v11 = vadd.f32 %v4116_v50, %v1908_v48  ;;  %v2080_v58 = vadd.f32 %v4116_v50, %v1904_v60  ;;  %v2393_v56 = vld [vmem:[%s4701_s0 + $0x1b8] sm:$0xff]  ;;  %v2394_v57 = vld [vmem:[%s4701_s0 + $0x1b0] sm:$0xff] }
 0x415   :  { %v2145_v36 = vmul.f32 %v2379_v37, %v2081_v11  ;;  %v2144_v20 = vmul.f32 %v2380_v47, %v2080_v58 }
 0x416   :  { %v1919_v46 = vpop.permute.xlu1 %1918  ;;  %v1915_v9 = vpop.permute.xlu0 %1914 }
 0x417   :  { %2209 = vst.msk [vmem:[%s4705_s4 + $0x148] sm:$0xff] %vm94_vm0, %v2145_v36  ;;  %2208 = vst.msk [vmem:[%s4705_s4 + $0x140] sm:$0xff] %vm94_vm0, %v2144_v20  ;;  %v2083_v15 = vadd.f32 %v4116_v50, %v1919_v46  ;;  %v2082_v8 = vadd.f32 %v4116_v50, %v1915_v9  ;;  %v2395_v36 = vld [vmem:[%s4701_s0 + $0x1c8] sm:$0xff]  ;;  %v2396_v20 = vld [vmem:[%s4701_s0 + $0x1c0] sm:$0xff] }
 0x419   :  { %v2147_v51 = vmul.f32 %v2381_v25, %v2083_v15  ;;  %v2146_v54 = vmul.f32 %v2382_v55, %v2082_v8 }
 0x41a   :  { %v1930_v44 = vpop.permute.xlu1 %1929  ;;  %v1926_v5 = vpop.permute.xlu0 %1925 }
 0x41b   :  { %2211 = vst.msk [vmem:[%s4705_s4 + $0x158] sm:$0xff] %vm94_vm0, %v2147_v51  ;;  %2210 = vst.msk [vmem:[%s4705_s4 + $0x150] sm:$0xff] %vm94_vm0, %v2146_v54  ;;  %v2085_v23 = vadd.f32 %v4116_v50, %v1930_v44  ;;  %v2084_v0 = vadd.f32 %v4116_v50, %v1926_v5  ;;  %v2397_v51 = vld [vmem:[%s4701_s0 + $0x1d8] sm:$0xff]  ;;  %v2398_v54 = vld [vmem:[%s4701_s0 + $0x1d0] sm:$0xff] }
 0x41d   :  { %v2149_v19 = vmul.f32 %v2383_v29, %v2085_v23  ;;  %v2148_v41 = vmul.f32 %v2384_v61, %v2084_v0 }
 0x41e   :  { %v1941_v17 = vpop.permute.xlu1 %1940  ;;  %v1937_v2 = vpop.permute.xlu0 %1936 }
 0x41f   :  { %2213 = vst.msk [vmem:[%s4705_s4 + $0x168] sm:$0xff] %vm94_vm0, %v2149_v19  ;;  %2212 = vst.msk [vmem:[%s4705_s4 + $0x160] sm:$0xff] %vm94_vm0, %v2148_v41  ;;  %v2087_v26 = vadd.f32 %v4116_v50, %v1941_v17  ;;  %v2086_v53 = vadd.f32 %v4116_v50, %v1937_v2  ;;  %v2399_v19 = vld [vmem:[%s4701_s0 + $0x1e8] sm:$0xff]  ;;  %v2400_v41 = vld [vmem:[%s4701_s0 + $0x1e0] sm:$0xff] }
 0x421   :  { %v2151_v33 = vmul.f32 %v2385_v35, %v2087_v26  ;;  %v2150_v22 = vmul.f32 %v2386_v43, %v2086_v53 }
 0x422   :  { %v1952_v34 = vpop.permute.xlu1 %1951  ;;  %v1948_v39 = vpop.permute.xlu0 %1947 }
 0x423   :  { %2215 = vst.msk [vmem:[%s4705_s4 + $0x178] sm:$0xff] %vm94_vm0, %v2151_v33  ;;  %2214 = vst.msk [vmem:[%s4705_s4 + $0x170] sm:$0xff] %vm94_vm0, %v2150_v22  ;;  %v2089_v28 = vadd.f32 %v4116_v50, %v1952_v34  ;;  %v2088_v30 = vadd.f32 %v4116_v50, %v1948_v39  ;;  %v2401_v33 = vld [vmem:[%s4701_s0 + $0x1f8] sm:$0xff]  ;;  %v2402_v22 = vld [vmem:[%s4701_s0 + $0x1f0] sm:$0xff] }
 0x425   :  { %v2153_v62 = vmul.f32 %v2387_v40, %v2089_v28  ;;  %v2152_v21 = vmul.f32 %v2388_v4, %v2088_v30 }
 0x426   :  { %v1963_v38 = vpop.permute.xlu1 %1962  ;;  %v1959_v3 = vpop.permute.xlu0 %1958 }
 0x427   :  { %2217 = vst.msk [vmem:[%s4705_s4 + $0x188] sm:$0xff] %vm94_vm0, %v2153_v62  ;;  %2216 = vst.msk [vmem:[%s4705_s4 + $0x180] sm:$0xff] %vm94_vm0, %v2152_v21  ;;  %v2091_v10 = vadd.f32 %v4116_v50, %v1963_v38  ;;  %v2090_v14 = vadd.f32 %v4116_v50, %v1959_v3 }
 0x429   :  { %v2155_v18 = vmul.f32 %v2389_v16, %v2091_v10  ;;  %v2154_v32 = vmul.f32 %v2390_v31, %v2090_v14 }
 0x42a   :  { %v1974_v49 = vpop.permute.xlu1 %1973  ;;  %v1970_v12 = vpop.permute.xlu0 %1969 }
 0x42b   :  { %2219 = vst.msk [vmem:[%s4705_s4 + $0x198] sm:$0xff] %vm94_vm0, %v2155_v18  ;;  %2218 = vst.msk [vmem:[%s4705_s4 + $0x190] sm:$0xff] %vm94_vm0, %v2154_v32  ;;  %v2093_v42 = vadd.f32 %v4116_v50, %v1974_v49  ;;  %v2092_v7 = vadd.f32 %v4116_v50, %v1970_v12 }
 0x42d   :  { %v2157_v63 = vmul.f32 %v2391_v45, %v2093_v42  ;;  %v2156_v24 = vmul.f32 %v2392_v13, %v2092_v7 }
 0x42e   :  { %v1985_v27 = vpop.permute.xlu1 %1984  ;;  %v1981_v52 = vpop.permute.xlu0 %1980 }
 0x42f   :  { %2221 = vst.msk [vmem:[%s4705_s4 + $0x1a8] sm:$0xff] %vm94_vm0, %v2157_v63  ;;  %2220 = vst.msk [vmem:[%s4705_s4 + $0x1a0] sm:$0xff] %vm94_vm0, %v2156_v24  ;;  %v2095_v1 = vadd.f32 %v4116_v50, %v1985_v27  ;;  %v2094_v6 = vadd.f32 %v4116_v50, %v1981_v52 }
 0x431   :  { %v2159_v59 = vmul.f32 %v2393_v56, %v2095_v1  ;;  %v2158_v48 = vmul.f32 %v2394_v57, %v2094_v6 }
 0x432   :  { %v1996_v60 = vpop.permute.xlu1 %1995  ;;  %v1992_v11 = vpop.permute.xlu0 %1991 }
 0x433   :  { %2223 = vst.msk [vmem:[%s4705_s4 + $0x1b8] sm:$0xff] %vm94_vm0, %v2159_v59  ;;  %2222 = vst.msk [vmem:[%s4705_s4 + $0x1b0] sm:$0xff] %vm94_vm0, %v2158_v48  ;;  %v2097_v58 = vadd.f32 %v4116_v50, %v1996_v60  ;;  %v2096_v37 = vadd.f32 %v4116_v50, %v1992_v11 }
 0x435   :  { %v2161_v47 = vmul.f32 %v2395_v36, %v2097_v58  ;;  %v2160_v46 = vmul.f32 %v2396_v20, %v2096_v37 }
 0x436   :  { %v2007_v9 = vpop.permute.xlu1 %2006  ;;  %v2003_v15 = vpop.permute.xlu0 %2002 }
 0x437   :  { %2225 = vst.msk [vmem:[%s4705_s4 + $0x1c8] sm:$0xff] %vm94_vm0, %v2161_v47  ;;  %2224 = vst.msk [vmem:[%s4705_s4 + $0x1c0] sm:$0xff] %vm94_vm0, %v2160_v46  ;;  %v2099_v8 = vadd.f32 %v4116_v50, %v2007_v9  ;;  %v2098_v25 = vadd.f32 %v4116_v50, %v2003_v15 }
 0x439   :  { %v2163_v55 = vmul.f32 %v2397_v51, %v2099_v8  ;;  %v2162_v44 = vmul.f32 %v2398_v54, %v2098_v25 }
 0x43a   :  { %v2018_v5 = vpop.permute.xlu1 %2017  ;;  %v2014_v23 = vpop.permute.xlu0 %2013 }
 0x43b   :  { %2227 = vst.msk [vmem:[%s4705_s4 + $0x1d8] sm:$0xff] %vm94_vm0, %v2163_v55  ;;  %2226 = vst.msk [vmem:[%s4705_s4 + $0x1d0] sm:$0xff] %vm94_vm0, %v2162_v44  ;;  %v2101_v0 = vadd.f32 %v4116_v50, %v2018_v5  ;;  %v2100_v29 = vadd.f32 %v4116_v50, %v2014_v23 }
 0x43d   :  { %v2165_v61 = vmul.f32 %v2399_v19, %v2101_v0  ;;  %v2164_v17 = vmul.f32 %v2400_v41, %v2100_v29 }
 0x43e   :  { %v2029_v2 = vpop.permute.xlu1 %2028  ;;  %v2025_v26 = vpop.permute.xlu0 %2024 }
 0x43f   :  { %2229 = vst.msk [vmem:[%s4705_s4 + $0x1e8] sm:$0xff] %vm94_vm0, %v2165_v61  ;;  %2228 = vst.msk [vmem:[%s4705_s4 + $0x1e0] sm:$0xff] %vm94_vm0, %v2164_v17  ;;  %v2103_v53 = vadd.f32 %v4116_v50, %v2029_v2  ;;  %v2102_v35 = vadd.f32 %v4116_v50, %v2025_v26 }
 0x441   :  { %v2167_v43 = vmul.f32 %v2401_v33, %v2103_v53  ;;  %v2166_v34 = vmul.f32 %v2402_v22, %v2102_v35 }
 0x443   :  { %2231 = vst.msk [vmem:[%s4705_s4 + $0x1f8] sm:$0xff] %vm94_vm0, %v2167_v43  ;;  %2230 = vst.msk [vmem:[%s4705_s4 + $0x1f0] sm:$0xff] %vm94_vm0, %v2166_v34 }
 0x444   :  { %2236 = vsyncpa [#allocation3], 1 }

</bundles_post_ra>
